<compile_context>
chip_gen: v7x
topology: tpu7x:2x2x1
jax: 0.10.0
libtpu: 0.0.40
codegen_flags: <defaults>
</compile_context>

<pallas_src>
import jax
import jax.numpy as jnp
from jax.experimental import pallas as pl
from jax.experimental.pallas import tpu as pltpu

# Small synthetic config (original: context_length=256, hidden=768, 12 layers)
B = 2              # batch
L = 8              # sequence length ("context_length")
D = 256            # hidden size  (multiple of 128 -> lane dense)
H = 2              # attention heads
DH = D // H        # head dim = 128 (multiple of 128 -> vreg-aligned head slabs)
FF = 4 * D         # MLP hidden
V = 64             # vocab size
NUM_LAYERS = 2
N_ROWS = B * L     # rows of the fused (B*L, D) activation slab


def _layernorm(x, g, b, eps=1e-12):
    mu = jnp.mean(x, axis=-1, keepdims=True)
    var = jnp.mean(jnp.square(x - mu), axis=-1, keepdims=True)
    return (x - mu) * jax.lax.rsqrt(var + eps) * g + b


def _erf_approx(x):
    # Abramowitz & Stegun 7.1.26 polynomial (|err| < 1.5e-7): exp goes to the
    # EUP, the rest is plain VPU work -- guaranteed to lower on Mosaic.
    a1, a2, a3, a4, a5 = 0.254829592, -0.284496736, 1.421413741, -1.453152027, 1.061405429
    p = 0.3275911
    sgn = jnp.where(x >= 0, 1.0, -1.0).astype(x.dtype)
    ax = jnp.abs(x)
    t = 1.0 / (1.0 + p * ax)
    poly = ((((a5 * t + a4) * t + a3) * t + a2) * t + a1) * t
    return sgn * (1.0 - poly * jnp.exp(-ax * ax))


def _gelu_exact(x):
    # Exact (erf) GELU, matching PubMedBERT (not the tanh approximation).
    return 0.5 * x * (1.0 + _erf_approx(x * 0.7071067811865476))


def fused_encoder_kernel(x_ref, mask_ref, gemb_ref, bemb_ref,
                         wqkv_ref, bqkv_ref, wo_ref, bo_ref,
                         g1_ref, be1_ref, w1_ref, bf1_ref,
                         w2_ref, bf2_ref, g2_ref, be2_ref,
                         o_ref, act_ref):
    """All NUM_LAYERS post-LN encoder layers; grid axis = layer ("arbitrary").

    The activation lives in the VMEM scratch `act_ref` across the whole layer
    axis; per-layer weights are streamed per grid step by the BlockSpec
    pipeline.
    """
    layer = pl.program_id(0)

    # Layer 0: apply the BERT embedding LayerNorm and seed the resident
    # activation from the (embedding) input slab.
    @pl.when(layer == 0)
    def _():
        act_ref[...] = _layernorm(x_ref[...], gemb_ref[...], bemb_ref[...])

    x = act_ref[...]                                  # [N, D] f32, VMEM-resident
    x_bf = x.astype(jnp.bfloat16)

    # ---- multi-head self attention -------------------------------------
    # One fused QKV matmul on the MXU (bf16 operands, f32 accumulation).
    qkv = jnp.dot(x_bf, wqkv_ref[0],
                  preferred_element_type=jnp.float32) + bqkv_ref[0]   # [N, 3D] f32
    key_bias = mask_ref[...]                          # [B, 1, L] additive key mask
    scale = 1.0 / (float(DH) ** 0.5)

    attn = jnp.zeros((N_ROWS, D), jnp.float32)
    for h in range(H):
        # DH == 128: these are whole-vreg column selects (no lane relayout),
        # and the reshapes split the row dim at an (8,128) tile boundary.
        q = qkv[:, h * DH:(h + 1) * DH].reshape(B, L, DH).astype(jnp.bfloat16)
        k = qkv[:, D + h * DH:D + (h + 1) * DH].reshape(B, L, DH).astype(jnp.bfloat16)
        v = qkv[:, 2 * D + h * DH:2 * D + (h + 1) * DH].reshape(B, L, DH).astype(jnp.bfloat16)

        # Batched dot_general contracting the last dim -- no explicit .T.
        s = jnp.einsum('bqd,bkd->bqk', q, k,
                       preferred_element_type=jnp.float32) * scale    # [B, L, L]
        s = s + key_bias                                              # padding mask
        s = s - jnp.max(s, axis=-1, keepdims=True)
        p = jnp.exp(s)
        p = p * pl.reciprocal(jnp.sum(p, axis=-1, keepdims=True), approx=True)

        ctx = jnp.einsum('bqk,bkd->bqd', p.astype(jnp.bfloat16), v,
                         preferred_element_type=jnp.float32)          # [B, L, DH]
        # Head-major W_o slab: accumulate per head instead of concatenating.
        attn = attn + jnp.dot(ctx.reshape(N_ROWS, DH).astype(jnp.bfloat16),
                              wo_ref[0, h],
                              preferred_element_type=jnp.float32)     # [N, D]
    attn = attn + bo_ref[0]

    h1 = _layernorm(x + attn, g1_ref[0], be1_ref[0])                  # post-LN, f32

    # ---- MLP ------------------------------------------------------------
    ff = jnp.dot(h1.astype(jnp.bfloat16), w1_ref[0],
                 preferred_element_type=jnp.float32) + bf1_ref[0]
    ff = _gelu_exact(ff)
    ff = jnp.dot(ff.astype(jnp.bfloat16), w2_ref[0],
                 preferred_element_type=jnp.float32) + bf2_ref[0]

    out = _layernorm(h1 + ff, g2_ref[0], be2_ref[0])
    act_ref[...] = out                                # stays resident for next layer

    @pl.when(layer == pl.num_programs(0) - 1)
    def _():
        o_ref[...] = out.astype(o_ref.dtype)          # single lane-dense HBM writeback


def init_params(key):
    """Synthetic, deterministic weights; per-layer weights stacked on axis 0."""
    ks = jax.random.split(key, 8)
    s = 0.02
    tok_emb = s * jax.random.normal(ks[0], (V, D), jnp.float32)
    pos_emb = s * jax.random.normal(ks[1], (L, D), jnp.float32)
    type_emb = s * jax.random.normal(ks[2], (2, D), jnp.float32)
    g_emb = jnp.ones((1, D), jnp.float32)
    b_emb = jnp.zeros((1, D), jnp.float32)

    wqkv = (s * jax.random.normal(ks[3], (NUM_LAYERS, D, 3 * D))).astype(jnp.bfloat16)
    bqkv = jnp.zeros((NUM_LAYERS, 1, 3 * D), jnp.float32)
    wo = (s * jax.random.normal(ks[4], (NUM_LAYERS, H, DH, D))).astype(jnp.bfloat16)
    bo = jnp.zeros((NUM_LAYERS, 1, D), jnp.float32)
    g1 = jnp.ones((NUM_LAYERS, 1, D), jnp.float32)
    be1 = jnp.zeros((NUM_LAYERS, 1, D), jnp.float32)
    w1 = (s * jax.random.normal(ks[5], (NUM_LAYERS, D, FF))).astype(jnp.bfloat16)
    bf1 = jnp.zeros((NUM_LAYERS, 1, FF), jnp.float32)
    w2 = (s * jax.random.normal(ks[6], (NUM_LAYERS, FF, D))).astype(jnp.bfloat16)
    bf2 = jnp.zeros((NUM_LAYERS, 1, D), jnp.float32)
    g2 = jnp.ones((NUM_LAYERS, 1, D), jnp.float32)
    be2 = jnp.zeros((NUM_LAYERS, 1, D), jnp.float32)

    layer_params = (wqkv, bqkv, wo, bo, g1, be1, w1, bf1, w2, bf2, g2, be2)
    return tok_emb, pos_emb, type_emb, g_emb, b_emb, layer_params


def biomedclip_text_forward(tokens, segment_ids, key_mask,
                            tok_emb, pos_emb, type_emb, g_emb, b_emb,
                            layer_params):
    """Returns last_hidden_state [B, L, D] of the synthetic text encoder."""
    # TODO(synk): the open_clip tokenizer (text string -> ids) has no Pallas
    # equivalent; embedding gathers stay in XLA glue (could be fused via
    # PrefetchScalarGridSpec + pl.Element at production scale).
    x = tok_emb[tokens] + pos_emb[None] + type_emb[segment_ids]       # [B, L, D]
    x2 = x.reshape(N_ROWS, D).astype(jnp.float32)                     # lane-dense slab
    mask_bias = jnp.where(key_mask, 0.0, -1e9).astype(jnp.float32).reshape(B, 1, L)

    per_layer = lambda d1, d2: pl.BlockSpec((1, d1, d2), lambda l: (l, 0, 0))
    in_specs = [
        pl.BlockSpec((N_ROWS, D), lambda l: (0, 0)),          # x2 (embeddings)
        pl.BlockSpec((B, 1, L), lambda l: (0, 0, 0)),         # key padding bias
        pl.BlockSpec((1, D), lambda l: (0, 0)),               # g_emb
        pl.BlockSpec((1, D), lambda l: (0, 0)),               # b_emb
        per_layer(D, 3 * D),                                  # wqkv
        per_layer(1, 3 * D),                                  # bqkv
        pl.BlockSpec((1, H, DH, D), lambda l: (l, 0, 0, 0)),  # wo (head-major slabs)
        per_layer(1, D),                                      # bo
        per_layer(1, D), per_layer(1, D),                     # g1, be1
        per_layer(D, FF), per_layer(1, FF),                   # w1, bf1
        per_layer(FF, D), per_layer(1, D),                    # w2, bf2
        per_layer(1, D), per_layer(1, D),                     # g2, be2
    ]

    out2 = pl.pallas_call(
        fused_encoder_kernel,
        out_shape=jax.ShapeDtypeStruct((N_ROWS, D), jnp.float32),
        grid=(NUM_LAYERS,),
        in_specs=in_specs,
        out_specs=pl.BlockSpec((N_ROWS, D), lambda l: (0, 0)),
        scratch_shapes=[pltpu.VMEM((N_ROWS, D), jnp.float32)],   # resident activation
        compiler_params=pltpu.CompilerParams(
            dimension_semantics=("arbitrary",),       # layers carry state sequentially
            vmem_limit_bytes=64 * 1024 * 1024),
    )(x2, mask_bias, g_emb, b_emb, *layer_params)

    return out2.reshape(B, L, D)


if __name__ == "__main__":
    key = jax.random.PRNGKey(0)
    k_tok, k_params = jax.random.split(key, 2)

    # "tokenizer output": synthetic token ids [B, context_length].
    tokens = jax.random.randint(k_tok, (B, L), 0, V, dtype=jnp.int32)
    segment_ids = jnp.zeros((B, L), jnp.int32)
    # key-padding mask: second sequence has 2 padded tokens at the end.
    lengths = jnp.array([L, L - 2], jnp.int32)
    key_mask = jnp.arange(L)[None, :] < lengths[:, None]              # [B, L] bool

    tok_emb, pos_emb, type_emb, g_emb, b_emb, layer_params = init_params(k_params)

    last_hidden_state = biomedclip_text_forward(
        tokens, segment_ids, key_mask,
        tok_emb, pos_emb, type_emb, g_emb, b_emb, layer_params)
    last_hidden_state = jax.block_until_ready(last_hidden_state)

    assert last_hidden_state.shape == (B, L, D)
    assert last_hidden_state.dtype == jnp.float32
    assert bool(jnp.all(jnp.isfinite(last_hidden_state)))
    print("KERNEL_OK")
</pallas_src>

<mosaic_0001>
module attributes {stable_mosaic.version = 11 : i64} {
  func.func @fused_encoder_kernel(%arg0: i32, %arg1: memref<16x256xf32, #tpu.memory_space<vmem>>, %arg2: memref<2x1x8xf32, #tpu.memory_space<vmem>>, %arg3: memref<1x256xf32, #tpu.memory_space<vmem>>, %arg4: memref<1x256xf32, #tpu.memory_space<vmem>>, %arg5: memref<1x256x768xbf16, #tpu.memory_space<vmem>>, %arg6: memref<1x1x768xf32, #tpu.memory_space<vmem>>, %arg7: memref<1x2x128x256xbf16, #tpu.memory_space<vmem>>, %arg8: memref<1x1x256xf32, #tpu.memory_space<vmem>>, %arg9: memref<1x1x256xf32, #tpu.memory_space<vmem>>, %arg10: memref<1x1x256xf32, #tpu.memory_space<vmem>>, %arg11: memref<1x256x1024xbf16, #tpu.memory_space<vmem>>, %arg12: memref<1x1x1024xf32, #tpu.memory_space<vmem>>, %arg13: memref<1x1024x256xbf16, #tpu.memory_space<vmem>>, %arg14: memref<1x1x256xf32, #tpu.memory_space<vmem>>, %arg15: memref<1x1x256xf32, #tpu.memory_space<vmem>>, %arg16: memref<1x1x256xf32, #tpu.memory_space<vmem>>, %arg17: memref<16x256xf32, #tpu.memory_space<vmem>>, %arg18: memref<16x256xf32, #tpu.memory_space<vmem>>) attributes {dimension_semantics = [#tpu.dimension_semantics<arbitrary>], iteration_bounds = array<i64: 2>, scalar_prefetch = 0 : i64, scratch_operands = 1 : i64, tpu.core_type = #tpu.core_type<tc>, window_params = [{pipeline_mode = #tpu.pipeline_mode<synchronous>, transform_indices = @transform_0, window_bounds = array<i64: 16, 256>}, {pipeline_mode = #tpu.pipeline_mode<synchronous>, transform_indices = @transform_1, window_bounds = array<i64: 2, 1, 8>}, {pipeline_mode = #tpu.pipeline_mode<synchronous>, transform_indices = @transform_2, window_bounds = array<i64: 1, 256>}, {pipeline_mode = #tpu.pipeline_mode<synchronous>, transform_indices = @transform_3, window_bounds = array<i64: 1, 256>}, {transform_indices = @transform_4, window_bounds = array<i64: 1, 256, 768>}, {transform_indices = @transform_5, window_bounds = array<i64: 1, 1, 768>}, {transform_indices = @transform_6, window_bounds = array<i64: 1, 2, 128, 256>}, {transform_indices = @transform_7, window_bounds = array<i64: 1, 1, 256>}, {transform_indices = @transform_8, window_bounds = array<i64: 1, 1, 256>}, {transform_indices = @transform_9, window_bounds = array<i64: 1, 1, 256>}, {transform_indices = @transform_10, window_bounds = array<i64: 1, 256, 1024>}, {transform_indices = @transform_11, window_bounds = array<i64: 1, 1, 1024>}, {transform_indices = @transform_12, window_bounds = array<i64: 1, 1024, 256>}, {transform_indices = @transform_13, window_bounds = array<i64: 1, 1, 256>}, {transform_indices = @transform_14, window_bounds = array<i64: 1, 1, 256>}, {transform_indices = @transform_15, window_bounds = array<i64: 1, 1, 256>}, {pipeline_mode = #tpu.pipeline_mode<synchronous>, transform_indices = @transform_16, window_bounds = array<i64: 16, 256>}]} {
    %c0_i32 = arith.constant 0 : i32
    %0 = arith.cmpi eq, %arg0, %c0_i32 : i32
    %1 = arith.extui %0 : i1 to i32
    %c0_i32_0 = arith.constant 0 : i32
    %2 = arith.cmpi ne, %1, %c0_i32_0 : i32
    scf.if %2 {
      %c0_89 = arith.constant 0 : index
      %c0_90 = arith.constant 0 : index
      %197 = vector.load %arg1[%c0_89, %c0_90] : memref<16x256xf32, #tpu.memory_space<vmem>>, vector<16x256xf32>
      %c0_91 = arith.constant 0 : index
      %c0_92 = arith.constant 0 : index
      %198 = vector.load %arg3[%c0_91, %c0_92] : memref<1x256xf32, #tpu.memory_space<vmem>>, vector<1x256xf32>
      %c0_93 = arith.constant 0 : index
      %c0_94 = arith.constant 0 : index
      %199 = vector.load %arg4[%c0_93, %c0_94] : memref<1x256xf32, #tpu.memory_space<vmem>>, vector<1x256xf32>
      %cst_95 = arith.constant dense<0.000000e+00> : vector<16xf32>
      %200 = vector.multi_reduction <add>, %197, %cst_95 [1] : vector<16x256xf32> to vector<16xf32>
      %201 = vector.shape_cast %200 : vector<16xf32> to vector<16x1xf32>
      %cst_96 = arith.constant 2.560000e+02 : f32
      %202 = vector.broadcast %cst_96 : f32 to vector<16x1xf32>
      %203 = arith.divf %201, %202 : vector<16x1xf32>
      %204 = vector.broadcast %203 : vector<16x1xf32> to vector<16x256xf32>
      %205 = arith.subf %197, %204 : vector<16x256xf32>
      %206 = arith.mulf %205, %205 : vector<16x256xf32>
      %cst_97 = arith.constant dense<0.000000e+00> : vector<16xf32>
      %207 = vector.multi_reduction <add>, %206, %cst_97 [1] : vector<16x256xf32> to vector<16xf32>
      %208 = vector.shape_cast %207 : vector<16xf32> to vector<16x1xf32>
      %cst_98 = arith.constant 2.560000e+02 : f32
      %209 = vector.broadcast %cst_98 : f32 to vector<16x1xf32>
      %210 = arith.divf %208, %209 : vector<16x1xf32>
      %211 = vector.broadcast %203 : vector<16x1xf32> to vector<16x256xf32>
      %212 = arith.subf %197, %211 : vector<16x256xf32>
      %cst_99 = arith.constant 9.99999996E-13 : f32
      %213 = vector.broadcast %cst_99 : f32 to vector<16x1xf32>
      %214 = arith.addf %210, %213 : vector<16x1xf32>
      %215 = math.rsqrt %214 : vector<16x1xf32>
      %216 = vector.broadcast %215 : vector<16x1xf32> to vector<16x256xf32>
      %217 = arith.mulf %212, %216 : vector<16x256xf32>
      %218 = vector.broadcast %198 : vector<1x256xf32> to vector<16x256xf32>
      %219 = arith.mulf %217, %218 : vector<16x256xf32>
      %220 = vector.broadcast %199 : vector<1x256xf32> to vector<16x256xf32>
      %221 = arith.addf %219, %220 : vector<16x256xf32>
      %c0_100 = arith.constant 0 : index
      %c0_101 = arith.constant 0 : index
      %222 = vector.load %arg18[%c0_100, %c0_101] : memref<16x256xf32, #tpu.memory_space<vmem>>, vector<16x256xf32>
      tpu.vector_store %arg18[%c0_100, %c0_101], %221 {strides = array<i32>} : memref<16x256xf32, #tpu.memory_space<vmem>>, vector<16x256xf32>,
    } else {
    }
    %c0 = arith.constant 0 : index
    %c0_1 = arith.constant 0 : index
    %3 = vector.load %arg18[%c0, %c0_1] : memref<16x256xf32, #tpu.memory_space<vmem>>, vector<16x256xf32>
    %4 = arith.truncf %3 : vector<16x256xf32> to vector<16x256xbf16>
    %c0_2 = arith.constant 0 : index
    %c0_3 = arith.constant 0 : index
    %c0_4 = arith.constant 0 : index
    %5 = vector.load %arg5[%c0_2, %c0_3, %c0_4] : memref<1x256x768xbf16, #tpu.memory_space<vmem>>, vector<1x256x768xbf16>
    %6 = vector.shape_cast %5 : vector<1x256x768xbf16> to vector<256x768xbf16>
    %cst = arith.constant dense<0.000000e+00> : vector<16x768xf32>
    %7 = tpu.matmul %4, %6, %cst {dimension_numbers = #tpu.dot_dimension_numbers<[1], [0], [0], [1], [0, 0, 1, 1], [], []>} : vector<16x256xbf16>, vector<256x768xbf16>, vector<16x768xf32> -> vector<16x768xf32>
    %c0_5 = arith.constant 0 : index
    %c0_6 = arith.constant 0 : index
    %c0_7 = arith.constant 0 : index
    %8 = vector.load %arg6[%c0_5, %c0_6, %c0_7] : memref<1x1x768xf32, #tpu.memory_space<vmem>>, vector<1x1x768xf32>
    %9 = vector.shape_cast %8 : vector<1x1x768xf32> to vector<1x768xf32>
    %10 = vector.broadcast %9 : vector<1x768xf32> to vector<16x768xf32>
    %11 = arith.addf %7, %10 : vector<16x768xf32>
    %c0_8 = arith.constant 0 : index
    %c0_9 = arith.constant 0 : index
    %c0_10 = arith.constant 0 : index
    %12 = vector.load %arg2[%c0_8, %c0_9, %c0_10] : memref<2x1x8xf32, #tpu.memory_space<vmem>>, vector<2x1x8xf32>
    %cst_11 = arith.constant 0.000000e+00 : f32
    %13 = vector.broadcast %cst_11 : f32 to vector<16x256xf32>
    %14 = vector.extract_strided_slice %11 {offsets = [0, 0], sizes = [16, 128], strides = [1, 1]} : vector<16x768xf32> to vector<16x128xf32>
    %15 = vector.shape_cast %14 : vector<16x128xf32> to vector<2x8x128xf32>
    %16 = arith.truncf %15 : vector<2x8x128xf32> to vector<2x8x128xbf16>
    %17 = vector.extract_strided_slice %11 {offsets = [0, 256], sizes = [16, 128], strides = [1, 1]} : vector<16x768xf32> to vector<16x128xf32>
    %18 = vector.shape_cast %17 : vector<16x128xf32> to vector<2x8x128xf32>
    %19 = arith.truncf %18 : vector<2x8x128xf32> to vector<2x8x128xbf16>
    %20 = vector.extract_strided_slice %11 {offsets = [0, 512], sizes = [16, 128], strides = [1, 1]} : vector<16x768xf32> to vector<16x128xf32>
    %21 = vector.shape_cast %20 : vector<16x128xf32> to vector<2x8x128xf32>
    %22 = arith.truncf %21 : vector<2x8x128xf32> to vector<2x8x128xbf16>
    "tpu.trace_start"() <{level = 10 : i32, message = "bqd,bkd->bqk"}> : () -> ()
    %cst_12 = arith.constant dense<0.000000e+00> : vector<2x8x8xf32>
    %23 = tpu.matmul %16, %19, %cst_12 {dimension_numbers = #tpu.dot_dimension_numbers<[2], [2], [1], [1], [0, 0, 0, 1, 1, 1], [0], [0]>} : vector<2x8x128xbf16>, vector<2x8x128xbf16>, vector<2x8x8xf32> -> vector<2x8x8xf32>
    "tpu.trace_stop"() : () -> ()
    %cst_13 = arith.constant 0.0883883461 : f32
    %24 = vector.broadcast %cst_13 : f32 to vector<2x8x8xf32>
    %25 = arith.mulf %23, %24 : vector<2x8x8xf32>
    %26 = vector.broadcast %12 : vector<2x1x8xf32> to vector<2x8x8xf32>
    %27 = arith.addf %25, %26 : vector<2x8x8xf32>
    %cst_14 = arith.constant dense<0xFF800000> : vector<2x8xf32>
    %28 = vector.multi_reduction <maximumf>, %27, %cst_14 [2] : vector<2x8x8xf32> to vector<2x8xf32>
    %29 = vector.shape_cast %28 : vector<2x8xf32> to vector<2x8x1xf32>
    %30 = vector.broadcast %29 : vector<2x8x1xf32> to vector<2x8x8xf32>
    %31 = arith.subf %27, %30 : vector<2x8x8xf32>
    %32 = math.exp %31 : vector<2x8x8xf32>
    %cst_15 = arith.constant dense<0.000000e+00> : vector<2x8xf32>
    %33 = vector.multi_reduction <add>, %32, %cst_15 [2] : vector<2x8x8xf32> to vector<2x8xf32>
    %34 = vector.shape_cast %33 : vector<2x8xf32> to vector<2x8x1xf32>
    %35 = tpu.reciprocal %34 {approx = true} : vector<2x8x1xf32> -> vector<2x8x1xf32>
    %36 = vector.broadcast %35 : vector<2x8x1xf32> to vector<2x8x8xf32>
    %37 = arith.mulf %32, %36 : vector<2x8x8xf32>
    %38 = arith.truncf %37 : vector<2x8x8xf32> to vector<2x8x8xbf16>
    "tpu.trace_start"() <{level = 10 : i32, message = "bqk,bkd->bqd"}> : () -> ()
    %cst_16 = arith.constant dense<0.000000e+00> : vector<2x8x128xf32>
    %39 = tpu.matmul %38, %22, %cst_16 {dimension_numbers = #tpu.dot_dimension_numbers<[2], [1], [1], [2], [0, 0, 0, 1, 1, 2], [0], [0]>} : vector<2x8x8xbf16>, vector<2x8x128xbf16>, vector<2x8x128xf32> -> vector<2x8x128xf32>
    "tpu.trace_stop"() : () -> ()
    %40 = vector.shape_cast %39 : vector<2x8x128xf32> to vector<16x128xf32>
    %41 = arith.truncf %40 : vector<16x128xf32> to vector<16x128xbf16>
    %c0_17 = arith.constant 0 : index
    %c0_18 = arith.constant 0 : index
    %c0_19 = arith.constant 0 : index
    %c0_20 = arith.constant 0 : index
    %42 = vector.load %arg7[%c0_17, %c0_18, %c0_19, %c0_20] : memref<1x2x128x256xbf16, #tpu.memory_space<vmem>>, vector<1x1x128x256xbf16>
    %43 = vector.shape_cast %42 : vector<1x1x128x256xbf16> to vector<128x256xbf16>
    %cst_21 = arith.constant dense<0.000000e+00> : vector<16x256xf32>
    %44 = tpu.matmul %41, %43, %cst_21 {dimension_numbers = #tpu.dot_dimension_numbers<[1], [0], [0], [1], [0, 0, 1, 1], [], []>} : vector<16x128xbf16>, vector<128x256xbf16>, vector<16x256xf32> -> vector<16x256xf32>
    %45 = arith.addf %13, %44 : vector<16x256xf32>
    %46 = vector.extract_strided_slice %11 {offsets = [0, 128], sizes = [16, 128], strides = [1, 1]} : vector<16x768xf32> to vector<16x128xf32>
    %47 = vector.shape_cast %46 : vector<16x128xf32> to vector<2x8x128xf32>
    %48 = arith.truncf %47 : vector<2x8x128xf32> to vector<2x8x128xbf16>
    %49 = vector.extract_strided_slice %11 {offsets = [0, 384], sizes = [16, 128], strides = [1, 1]} : vector<16x768xf32> to vector<16x128xf32>
    %50 = vector.shape_cast %49 : vector<16x128xf32> to vector<2x8x128xf32>
    %51 = arith.truncf %50 : vector<2x8x128xf32> to vector<2x8x128xbf16>
    %52 = vector.extract_strided_slice %11 {offsets = [0, 640], sizes = [16, 128], strides = [1, 1]} : vector<16x768xf32> to vector<16x128xf32>
    %53 = vector.shape_cast %52 : vector<16x128xf32> to vector<2x8x128xf32>
    %54 = arith.truncf %53 : vector<2x8x128xf32> to vector<2x8x128xbf16>
    "tpu.trace_start"() <{level = 10 : i32, message = "bqd,bkd->bqk"}> : () -> ()
    %cst_22 = arith.constant dense<0.000000e+00> : vector<2x8x8xf32>
    %55 = tpu.matmul %48, %51, %cst_22 {dimension_numbers = #tpu.dot_dimension_numbers<[2], [2], [1], [1], [0, 0, 0, 1, 1, 1], [0], [0]>} : vector<2x8x128xbf16>, vector<2x8x128xbf16>, vector<2x8x8xf32> -> vector<2x8x8xf32>
    "tpu.trace_stop"() : () -> ()
    %cst_23 = arith.constant 0.0883883461 : f32
    %56 = vector.broadcast %cst_23 : f32 to vector<2x8x8xf32>
    %57 = arith.mulf %55, %56 : vector<2x8x8xf32>
    %58 = vector.broadcast %12 : vector<2x1x8xf32> to vector<2x8x8xf32>
    %59 = arith.addf %57, %58 : vector<2x8x8xf32>
    %cst_24 = arith.constant dense<0xFF800000> : vector<2x8xf32>
    %60 = vector.multi_reduction <maximumf>, %59, %cst_24 [2] : vector<2x8x8xf32> to vector<2x8xf32>
    %61 = vector.shape_cast %60 : vector<2x8xf32> to vector<2x8x1xf32>
    %62 = vector.broadcast %61 : vector<2x8x1xf32> to vector<2x8x8xf32>
    %63 = arith.subf %59, %62 : vector<2x8x8xf32>
    %64 = math.exp %63 : vector<2x8x8xf32>
    %cst_25 = arith.constant dense<0.000000e+00> : vector<2x8xf32>
    %65 = vector.multi_reduction <add>, %64, %cst_25 [2] : vector<2x8x8xf32> to vector<2x8xf32>
    %66 = vector.shape_cast %65 : vector<2x8xf32> to vector<2x8x1xf32>
    %67 = tpu.reciprocal %66 {approx = true} : vector<2x8x1xf32> -> vector<2x8x1xf32>
    %68 = vector.broadcast %67 : vector<2x8x1xf32> to vector<2x8x8xf32>
    %69 = arith.mulf %64, %68 : vector<2x8x8xf32>
    %70 = arith.truncf %69 : vector<2x8x8xf32> to vector<2x8x8xbf16>
    "tpu.trace_start"() <{level = 10 : i32, message = "bqk,bkd->bqd"}> : () -> ()
    %cst_26 = arith.constant dense<0.000000e+00> : vector<2x8x128xf32>
    %71 = tpu.matmul %70, %54, %cst_26 {dimension_numbers = #tpu.dot_dimension_numbers<[2], [1], [1], [2], [0, 0, 0, 1, 1, 2], [0], [0]>} : vector<2x8x8xbf16>, vector<2x8x128xbf16>, vector<2x8x128xf32> -> vector<2x8x128xf32>
    "tpu.trace_stop"() : () -> ()
    %72 = vector.shape_cast %71 : vector<2x8x128xf32> to vector<16x128xf32>
    %73 = arith.truncf %72 : vector<16x128xf32> to vector<16x128xbf16>
    %c0_27 = arith.constant 0 : index
    %c1 = arith.constant 1 : index
    %c0_28 = arith.constant 0 : index
    %c0_29 = arith.constant 0 : index
    %74 = vector.load %arg7[%c0_27, %c1, %c0_28, %c0_29] : memref<1x2x128x256xbf16, #tpu.memory_space<vmem>>, vector<1x1x128x256xbf16>
    %75 = vector.shape_cast %74 : vector<1x1x128x256xbf16> to vector<128x256xbf16>
    %cst_30 = arith.constant dense<0.000000e+00> : vector<16x256xf32>
    %76 = tpu.matmul %73, %75, %cst_30 {dimension_numbers = #tpu.dot_dimension_numbers<[1], [0], [0], [1], [0, 0, 1, 1], [], []>} : vector<16x128xbf16>, vector<128x256xbf16>, vector<16x256xf32> -> vector<16x256xf32>
    %77 = arith.addf %45, %76 : vector<16x256xf32>
    %c0_31 = arith.constant 0 : index
    %c0_32 = arith.constant 0 : index
    %c0_33 = arith.constant 0 : index
    %78 = vector.load %arg8[%c0_31, %c0_32, %c0_33] : memref<1x1x256xf32, #tpu.memory_space<vmem>>, vector<1x1x256xf32>
    %79 = vector.shape_cast %78 : vector<1x1x256xf32> to vector<1x256xf32>
    %80 = vector.broadcast %79 : vector<1x256xf32> to vector<16x256xf32>
    %81 = arith.addf %77, %80 : vector<16x256xf32>
    %82 = arith.addf %3, %81 : vector<16x256xf32>
    %c0_34 = arith.constant 0 : index
    %c0_35 = arith.constant 0 : index
    %c0_36 = arith.constant 0 : index
    %83 = vector.load %arg9[%c0_34, %c0_35, %c0_36] : memref<1x1x256xf32, #tpu.memory_space<vmem>>, vector<1x1x256xf32>
    %84 = vector.shape_cast %83 : vector<1x1x256xf32> to vector<1x256xf32>
    %c0_37 = arith.constant 0 : index
    %c0_38 = arith.constant 0 : index
    %c0_39 = arith.constant 0 : index
    %85 = vector.load %arg10[%c0_37, %c0_38, %c0_39] : memref<1x1x256xf32, #tpu.memory_space<vmem>>, vector<1x1x256xf32>
    %86 = vector.shape_cast %85 : vector<1x1x256xf32> to vector<1x256xf32>
    %cst_40 = arith.constant dense<0.000000e+00> : vector<16xf32>
    %87 = vector.multi_reduction <add>, %82, %cst_40 [1] : vector<16x256xf32> to vector<16xf32>
    %88 = vector.shape_cast %87 : vector<16xf32> to vector<16x1xf32>
    %cst_41 = arith.constant 2.560000e+02 : f32
    %89 = vector.broadcast %cst_41 : f32 to vector<16x1xf32>
    %90 = arith.divf %88, %89 : vector<16x1xf32>
    %91 = vector.broadcast %90 : vector<16x1xf32> to vector<16x256xf32>
    %92 = arith.subf %82, %91 : vector<16x256xf32>
    %93 = arith.mulf %92, %92 : vector<16x256xf32>
    %cst_42 = arith.constant dense<0.000000e+00> : vector<16xf32>
    %94 = vector.multi_reduction <add>, %93, %cst_42 [1] : vector<16x256xf32> to vector<16xf32>
    %95 = vector.shape_cast %94 : vector<16xf32> to vector<16x1xf32>
    %cst_43 = arith.constant 2.560000e+02 : f32
    %96 = vector.broadcast %cst_43 : f32 to vector<16x1xf32>
    %97 = arith.divf %95, %96 : vector<16x1xf32>
    %98 = vector.broadcast %90 : vector<16x1xf32> to vector<16x256xf32>
    %99 = arith.subf %82, %98 : vector<16x256xf32>
    %cst_44 = arith.constant 9.99999996E-13 : f32
    %100 = vector.broadcast %cst_44 : f32 to vector<16x1xf32>
    %101 = arith.addf %97, %100 : vector<16x1xf32>
    %102 = math.rsqrt %101 : vector<16x1xf32>
    %103 = vector.broadcast %102 : vector<16x1xf32> to vector<16x256xf32>
    %104 = arith.mulf %99, %103 : vector<16x256xf32>
    %105 = vector.broadcast %84 : vector<1x256xf32> to vector<16x256xf32>
    %106 = arith.mulf %104, %105 : vector<16x256xf32>
    %107 = vector.broadcast %86 : vector<1x256xf32> to vector<16x256xf32>
    %108 = arith.addf %106, %107 : vector<16x256xf32>
    %109 = arith.truncf %108 : vector<16x256xf32> to vector<16x256xbf16>
    %c0_45 = arith.constant 0 : index
    %c0_46 = arith.constant 0 : index
    %c0_47 = arith.constant 0 : index
    %110 = vector.load %arg11[%c0_45, %c0_46, %c0_47] : memref<1x256x1024xbf16, #tpu.memory_space<vmem>>, vector<1x256x1024xbf16>
    %111 = vector.shape_cast %110 : vector<1x256x1024xbf16> to vector<256x1024xbf16>
    %cst_48 = arith.constant dense<0.000000e+00> : vector<16x1024xf32>
    %112 = tpu.matmul %109, %111, %cst_48 {dimension_numbers = #tpu.dot_dimension_numbers<[1], [0], [0], [1], [0, 0, 1, 1], [], []>} : vector<16x256xbf16>, vector<256x1024xbf16>, vector<16x1024xf32> -> vector<16x1024xf32>
    %c0_49 = arith.constant 0 : index
    %c0_50 = arith.constant 0 : index
    %c0_51 = arith.constant 0 : index
    %113 = vector.load %arg12[%c0_49, %c0_50, %c0_51] : memref<1x1x1024xf32, #tpu.memory_space<vmem>>, vector<1x1x1024xf32>
    %114 = vector.shape_cast %113 : vector<1x1x1024xf32> to vector<1x1024xf32>
    %115 = vector.broadcast %114 : vector<1x1024xf32> to vector<16x1024xf32>
    %116 = arith.addf %112, %115 : vector<16x1024xf32>
    %cst_52 = arith.constant 5.000000e-01 : f32
    %117 = vector.broadcast %cst_52 : f32 to vector<16x1024xf32>
    %118 = arith.mulf %117, %116 : vector<16x1024xf32>
    %cst_53 = arith.constant 0.707106769 : f32
    %119 = vector.broadcast %cst_53 : f32 to vector<16x1024xf32>
    %120 = arith.mulf %116, %119 : vector<16x1024xf32>
    %cst_54 = arith.constant 0.000000e+00 : f32
    %121 = vector.broadcast %cst_54 : f32 to vector<16x1024xf32>
    %122 = arith.cmpf oge, %120, %121 : vector<16x1024xf32>
    %cst_55 = arith.constant 1.000000e+00 : f32
    %cst_56 = arith.constant -1.000000e+00 : f32
    %123 = vector.broadcast %cst_55 : f32 to vector<16x1024xf32>
    %124 = vector.broadcast %cst_56 : f32 to vector<16x1024xf32>
    %125 = arith.select %122, %123, %124 : vector<16x1024xi1>, vector<16x1024xf32>
    %126 = math.absf %120 : vector<16x1024xf32>
    %cst_57 = arith.constant 0.327591091 : f32
    %127 = vector.broadcast %cst_57 : f32 to vector<16x1024xf32>
    %128 = arith.mulf %127, %126 : vector<16x1024xf32>
    %cst_58 = arith.constant 1.000000e+00 : f32
    %129 = vector.broadcast %cst_58 : f32 to vector<16x1024xf32>
    %130 = arith.addf %129, %128 : vector<16x1024xf32>
    %cst_59 = arith.constant 1.000000e+00 : f32
    %131 = vector.broadcast %cst_59 : f32 to vector<16x1024xf32>
    %132 = arith.divf %131, %130 : vector<16x1024xf32>
    %cst_60 = arith.constant 1.06140542 : f32
    %133 = vector.broadcast %cst_60 : f32 to vector<16x1024xf32>
    %134 = arith.mulf %133, %132 : vector<16x1024xf32>
    %cst_61 = arith.constant -1.45315206 : f32
    %135 = vector.broadcast %cst_61 : f32 to vector<16x1024xf32>
    %136 = arith.addf %134, %135 : vector<16x1024xf32>
    %137 = arith.mulf %136, %132 : vector<16x1024xf32>
    %cst_62 = arith.constant 1.42141378 : f32
    %138 = vector.broadcast %cst_62 : f32 to vector<16x1024xf32>
    %139 = arith.addf %137, %138 : vector<16x1024xf32>
    %140 = arith.mulf %139, %132 : vector<16x1024xf32>
    %cst_63 = arith.constant -0.284496725 : f32
    %141 = vector.broadcast %cst_63 : f32 to vector<16x1024xf32>
    %142 = arith.addf %140, %141 : vector<16x1024xf32>
    %143 = arith.mulf %142, %132 : vector<16x1024xf32>
    %cst_64 = arith.constant 0.254829586 : f32
    %144 = vector.broadcast %cst_64 : f32 to vector<16x1024xf32>
    %145 = arith.addf %143, %144 : vector<16x1024xf32>
    %146 = arith.mulf %145, %132 : vector<16x1024xf32>
    %cst_65 = arith.constant 0.000000e+00 : f32
    %147 = vector.broadcast %cst_65 : f32 to vector<16x1024xf32>
    %148 = arith.subf %147, %126 : vector<16x1024xf32>
    %149 = arith.mulf %148, %126 : vector<16x1024xf32>
    %150 = math.exp %149 : vector<16x1024xf32>
    %151 = arith.mulf %146, %150 : vector<16x1024xf32>
    %cst_66 = arith.constant 1.000000e+00 : f32
    %152 = vector.broadcast %cst_66 : f32 to vector<16x1024xf32>
    %153 = arith.subf %152, %151 : vector<16x1024xf32>
    %154 = arith.mulf %125, %153 : vector<16x1024xf32>
    %cst_67 = arith.constant 1.000000e+00 : f32
    %155 = vector.broadcast %cst_67 : f32 to vector<16x1024xf32>
    %156 = arith.addf %155, %154 : vector<16x1024xf32>
    %157 = arith.mulf %118, %156 : vector<16x1024xf32>
    %158 = arith.truncf %157 : vector<16x1024xf32> to vector<16x1024xbf16>
    %c0_68 = arith.constant 0 : index
    %c0_69 = arith.constant 0 : index
    %c0_70 = arith.constant 0 : index
    %159 = vector.load %arg13[%c0_68, %c0_69, %c0_70] : memref<1x1024x256xbf16, #tpu.memory_space<vmem>>, vector<1x1024x256xbf16>
    %160 = vector.shape_cast %159 : vector<1x1024x256xbf16> to vector<1024x256xbf16>
    %cst_71 = arith.constant dense<0.000000e+00> : vector<16x256xf32>
    %161 = tpu.matmul %158, %160, %cst_71 {dimension_numbers = #tpu.dot_dimension_numbers<[1], [0], [0], [1], [0, 0, 1, 1], [], []>} : vector<16x1024xbf16>, vector<1024x256xbf16>, vector<16x256xf32> -> vector<16x256xf32>
    %c0_72 = arith.constant 0 : index
    %c0_73 = arith.constant 0 : index
    %c0_74 = arith.constant 0 : index
    %162 = vector.load %arg14[%c0_72, %c0_73, %c0_74] : memref<1x1x256xf32, #tpu.memory_space<vmem>>, vector<1x1x256xf32>
    %163 = vector.shape_cast %162 : vector<1x1x256xf32> to vector<1x256xf32>
    %164 = vector.broadcast %163 : vector<1x256xf32> to vector<16x256xf32>
    %165 = arith.addf %161, %164 : vector<16x256xf32>
    %166 = arith.addf %108, %165 : vector<16x256xf32>
    %c0_75 = arith.constant 0 : index
    %c0_76 = arith.constant 0 : index
    %c0_77 = arith.constant 0 : index
    %167 = vector.load %arg15[%c0_75, %c0_76, %c0_77] : memref<1x1x256xf32, #tpu.memory_space<vmem>>, vector<1x1x256xf32>
    %168 = vector.shape_cast %167 : vector<1x1x256xf32> to vector<1x256xf32>
    %c0_78 = arith.constant 0 : index
    %c0_79 = arith.constant 0 : index
    %c0_80 = arith.constant 0 : index
    %169 = vector.load %arg16[%c0_78, %c0_79, %c0_80] : memref<1x1x256xf32, #tpu.memory_space<vmem>>, vector<1x1x256xf32>
    %170 = vector.shape_cast %169 : vector<1x1x256xf32> to vector<1x256xf32>
    %cst_81 = arith.constant dense<0.000000e+00> : vector<16xf32>
    %171 = vector.multi_reduction <add>, %166, %cst_81 [1] : vector<16x256xf32> to vector<16xf32>
    %172 = vector.shape_cast %171 : vector<16xf32> to vector<16x1xf32>
    %cst_82 = arith.constant 2.560000e+02 : f32
    %173 = vector.broadcast %cst_82 : f32 to vector<16x1xf32>
    %174 = arith.divf %172, %173 : vector<16x1xf32>
    %175 = vector.broadcast %174 : vector<16x1xf32> to vector<16x256xf32>
    %176 = arith.subf %166, %175 : vector<16x256xf32>
    %177 = arith.mulf %176, %176 : vector<16x256xf32>
    %cst_83 = arith.constant dense<0.000000e+00> : vector<16xf32>
    %178 = vector.multi_reduction <add>, %177, %cst_83 [1] : vector<16x256xf32> to vector<16xf32>
    %179 = vector.shape_cast %178 : vector<16xf32> to vector<16x1xf32>
    %cst_84 = arith.constant 2.560000e+02 : f32
    %180 = vector.broadcast %cst_84 : f32 to vector<16x1xf32>
    %181 = arith.divf %179, %180 : vector<16x1xf32>
    %182 = vector.broadcast %174 : vector<16x1xf32> to vector<16x256xf32>
    %183 = arith.subf %166, %182 : vector<16x256xf32>
    %cst_85 = arith.constant 9.99999996E-13 : f32
    %184 = vector.broadcast %cst_85 : f32 to vector<16x1xf32>
    %185 = arith.addf %181, %184 : vector<16x1xf32>
    %186 = math.rsqrt %185 : vector<16x1xf32>
    %187 = vector.broadcast %186 : vector<16x1xf32> to vector<16x256xf32>
    %188 = arith.mulf %183, %187 : vector<16x256xf32>
    %189 = vector.broadcast %168 : vector<1x256xf32> to vector<16x256xf32>
    %190 = arith.mulf %188, %189 : vector<16x256xf32>
    %191 = vector.broadcast %170 : vector<1x256xf32> to vector<16x256xf32>
    %192 = arith.addf %190, %191 : vector<16x256xf32>
    %c0_86 = arith.constant 0 : index
    %c0_87 = arith.constant 0 : index
    %193 = vector.load %arg18[%c0_86, %c0_87] : memref<16x256xf32, #tpu.memory_space<vmem>>, vector<16x256xf32>
    tpu.vector_store %arg18[%c0_86, %c0_87], %192 {strides = array<i32>} : memref<16x256xf32, #tpu.memory_space<vmem>>, vector<16x256xf32>,
    %c1_i32 = arith.constant 1 : i32
    %194 = arith.cmpi eq, %arg0, %c1_i32 : i32
    %195 = arith.extui %194 : i1 to i32
    %c0_i32_88 = arith.constant 0 : i32
    %196 = arith.cmpi ne, %195, %c0_i32_88 : i32
    scf.if %196 {
      %c0_89 = arith.constant 0 : index
      %c0_90 = arith.constant 0 : index
      %197 = vector.load %arg17[%c0_89, %c0_90] : memref<16x256xf32, #tpu.memory_space<vmem>>, vector<16x256xf32>
      tpu.vector_store %arg17[%c0_89, %c0_90], %192 {strides = array<i32>} : memref<16x256xf32, #tpu.memory_space<vmem>>, vector<16x256xf32>,
    } else {
    }
    return
  }
  func.func @transform_0(%arg0: i32) -> (i32, i32) {
    %c0_i32 = arith.constant 0 : i32
    %c0_i32_0 = arith.constant 0 : i32
    %c0_i32_1 = arith.constant 0 : i32
    return %c0_i32, %c0_i32_0 : i32, i32
  }
  func.func @transform_1(%arg0: i32) -> (i32, i32, i32) {
    %c0_i32 = arith.constant 0 : i32
    %c0_i32_0 = arith.constant 0 : i32
    %c0_i32_1 = arith.constant 0 : i32
    %c0_i32_2 = arith.constant 0 : i32
    return %c0_i32, %c0_i32_0, %c0_i32_1 : i32, i32, i32
  }
  func.func @transform_2(%arg0: i32) -> (i32, i32) {
    %c0_i32 = arith.constant 0 : i32
    %c0_i32_0 = arith.constant 0 : i32
    %c0_i32_1 = arith.constant 0 : i32
    return %c0_i32, %c0_i32_0 : i32, i32
  }
  func.func @transform_3(%arg0: i32) -> (i32, i32) {
    %c0_i32 = arith.constant 0 : i32
    %c0_i32_0 = arith.constant 0 : i32
    %c0_i32_1 = arith.constant 0 : i32
    return %c0_i32, %c0_i32_0 : i32, i32
  }
  func.func @transform_4(%arg0: i32) -> (i32, i32, i32) {
    %c0_i32 = arith.constant 0 : i32
    %c0_i32_0 = arith.constant 0 : i32
    %c0_i32_1 = arith.constant 0 : i32
    return %arg0, %c0_i32, %c0_i32_0 : i32, i32, i32
  }
  func.func @transform_5(%arg0: i32) -> (i32, i32, i32) {
    %c0_i32 = arith.constant 0 : i32
    %c0_i32_0 = arith.constant 0 : i32
    %c0_i32_1 = arith.constant 0 : i32
    return %arg0, %c0_i32, %c0_i32_0 : i32, i32, i32
  }
  func.func @transform_6(%arg0: i32) -> (i32, i32, i32, i32) {
    %c0_i32 = arith.constant 0 : i32
    %c0_i32_0 = arith.constant 0 : i32
    %c0_i32_1 = arith.constant 0 : i32
    %c0_i32_2 = arith.constant 0 : i32
    return %arg0, %c0_i32, %c0_i32_0, %c0_i32_1 : i32, i32, i32, i32
  }
  func.func @transform_7(%arg0: i32) -> (i32, i32, i32) {
    %c0_i32 = arith.constant 0 : i32
    %c0_i32_0 = arith.constant 0 : i32
    %c0_i32_1 = arith.constant 0 : i32
    return %arg0, %c0_i32, %c0_i32_0 : i32, i32, i32
  }
  func.func @transform_8(%arg0: i32) -> (i32, i32, i32) {
    %c0_i32 = arith.constant 0 : i32
    %c0_i32_0 = arith.constant 0 : i32
    %c0_i32_1 = arith.constant 0 : i32
    return %arg0, %c0_i32, %c0_i32_0 : i32, i32, i32
  }
  func.func @transform_9(%arg0: i32) -> (i32, i32, i32) {
    %c0_i32 = arith.constant 0 : i32
    %c0_i32_0 = arith.constant 0 : i32
    %c0_i32_1 = arith.constant 0 : i32
    return %arg0, %c0_i32, %c0_i32_0 : i32, i32, i32
  }
  func.func @transform_10(%arg0: i32) -> (i32, i32, i32) {
    %c0_i32 = arith.constant 0 : i32
    %c0_i32_0 = arith.constant 0 : i32
    %c0_i32_1 = arith.constant 0 : i32
    return %arg0, %c0_i32, %c0_i32_0 : i32, i32, i32
  }
  func.func @transform_11(%arg0: i32) -> (i32, i32, i32) {
    %c0_i32 = arith.constant 0 : i32
    %c0_i32_0 = arith.constant 0 : i32
    %c0_i32_1 = arith.constant 0 : i32
    return %arg0, %c0_i32, %c0_i32_0 : i32, i32, i32
  }
  func.func @transform_12(%arg0: i32) -> (i32, i32, i32) {
    %c0_i32 = arith.constant 0 : i32
    %c0_i32_0 = arith.constant 0 : i32
    %c0_i32_1 = arith.constant 0 : i32
    return %arg0, %c0_i32, %c0_i32_0 : i32, i32, i32
  }
  func.func @transform_13(%arg0: i32) -> (i32, i32, i32) {
    %c0_i32 = arith.constant 0 : i32
    %c0_i32_0 = arith.constant 0 : i32
    %c0_i32_1 = arith.constant 0 : i32
    return %arg0, %c0_i32, %c0_i32_0 : i32, i32, i32
  }
  func.func @transform_14(%arg0: i32) -> (i32, i32, i32) {
    %c0_i32 = arith.constant 0 : i32
    %c0_i32_0 = arith.constant 0 : i32
    %c0_i32_1 = arith.constant 0 : i32
    return %arg0, %c0_i32, %c0_i32_0 : i32, i32, i32
  }
  func.func @transform_15(%arg0: i32) -> (i32, i32, i32) {
    %c0_i32 = arith.constant 0 : i32
    %c0_i32_0 = arith.constant 0 : i32
    %c0_i32_1 = arith.constant 0 : i32
    return %arg0, %c0_i32, %c0_i32_0 : i32, i32, i32
  }
  func.func @transform_16(%arg0: i32) -> (i32, i32) {
    %c0_i32 = arith.constant 0 : i32
    %c0_i32_0 = arith.constant 0 : i32
    %c0_i32_1 = arith.constant 0 : i32
    return %c0_i32, %c0_i32_0 : i32, i32
  }
}

</mosaic_0001>

<bundles_post_ra>
// kernel: tpu_custom_call.1
= control target key start
LH: loop header
LB: loop body
LE: loop exit
PB: predicated region body
PF: predicated region fallthrough
CT: control target
= control target key end

     0   :  { %s8777_s0 = inlined_call_operand.hbm [shape: f32[16,256], index: 0, kind: input, shape index: {}]   ;;  %s8778_s1 = inlined_call_operand.hbm [shape: f32[2,1,8], index: 1, kind: input, shape index: {}]   ;;  %s8779_s2 = inlined_call_operand.hbm [shape: f32[1,256], index: 2, kind: input, shape index: {}]   ;;  %s8780_s3 = inlined_call_operand.hbm [shape: f32[1,256], index: 3, kind: input, shape index: {}]   ;;  %s8781_s4 = inlined_call_operand.hbm [shape: bf16[2,256,768], index: 4, kind: input, shape index: {}]   ;;  %s8782_s5 = inlined_call_operand.hbm [shape: f32[2,1,768], index: 5, kind: input, shape index: {}]   ;;  %s8783_s6 = inlined_call_operand.hbm [shape: bf16[2,2,128,256], index: 6, kind: input, shape index: {}]   ;;  %s8784_s7 = inlined_call_operand.hbm [shape: f32[2,1,256], index: 7, kind: input, shape index: {}]   ;;  %s8785_s8 = inlined_call_operand.hbm [shape: f32[2,1,256], index: 8, kind: input, shape index: {}]   ;;  %s8786_s9 = inlined_call_operand.hbm [shape: f32[2,1,256], index: 9, kind: input, shape index: {}]   ;;  %s8787_s10 = inlined_call_operand.hbm [shape: bf16[2,256,1024], index: 10, kind: input, shape index: {}]   ;;  %s8788_s11 = inlined_call_operand.hbm [shape: f32[2,1,1024], index: 11, kind: input, shape index: {}]   ;;  %s8789_s12 = inlined_call_operand.hbm [shape: bf16[2,1024,256], index: 12, kind: input, shape index: {}]   ;;  %s8790_s13 = inlined_call_operand.hbm [shape: f32[2,1,256], index: 13, kind: input, shape index: {}]   ;;  %s8791_s14 = inlined_call_operand.hbm [shape: f32[2,1,256], index: 14, kind: input, shape index: {}]   ;;  %s8792_s15 = inlined_call_operand.hbm [shape: f32[2,1,256], index: 15, kind: input, shape index: {}]   ;;  %s8793_s16 = inlined_call_operand.hbm [shape: f32[16,256], index: 16, kind: output, shape index: {}]  }
   0x1   :  { %8830 = sst [smem:[#allocation37_spill]] %s8777_s0 }
   0x2   :  { %8831 = sst [smem:[#allocation38_spill]] %s8778_s1 }
   0x3   :  { %8832 = sst [smem:[#allocation39_spill]] %s8779_s2 }
   0x4   :  { %8833 = sst [smem:[#allocation40_spill]] %s8780_s3 }
   0x5   :  { %8834 = sst [smem:[#allocation41_spill]] %s8781_s4 }
   0x6   :  { %8835 = sst [smem:[#allocation42_spill]] %s8782_s5 }
   0x7   :  { %8836 = sst [smem:[#allocation43_spill]] %s8783_s6 }
   0x8   :  { %8837 = sst [smem:[#allocation44_spill]] %s8784_s7 }
   0x9   :  { %8838 = sst [smem:[#allocation45_spill]] %s8785_s8 }
   0xa   :  { %8839 = sst [smem:[#allocation46_spill]] %s8791_s14 }
   0xb   :  { %8840 = sst [smem:[#allocation47_spill]] %s8792_s15 }
   0xc   :  { %8841 = sst [smem:[#allocation48_spill]] %s8793_s16 }
   0xd   :  { %21 = vsyncpa [#allocation4], 0 }
   0xe   :  { %22 = vsyncpa [#allocation7], 0 }
   0xf   :  { %23 = vsyncpa [#allocation10], 0 }
  0x10   :  { %24 = vsyncpa [#allocation5], 0  ;;  %s7229_s21 = smov 0   ;;  %s7231_s22 = smov 0  }
  0x11   :  { %s7233_s23 = smov 0   ;;  %s7235_s24 = smov 0  }
  0x12 LB: > { %8842 = sst [smem:[#allocation29_spill]] %s7102_s22  ;;  %s7248_s25 = sadd.s32 4294967295, %s7110_s24   ;;  %s7110_s24 = sphi %s7235_s24, %s8904_s24   ;;  %s7106_s23 = sphi %s7233_s23, %s8907_s23   ;;  %s7102_s22 = sphi %s7231_s22, %s8906_s22   ;;  %s7098_s21 = sphi %s7229_s21, %s8905_s21  }
  0x13   : > { %8843 = sst [smem:[#allocation30_spill]] %s7106_s23  ;;  %s7251_s26 = sadd.s32 1, %s7110_s24  }
  0x14   : > { %8844 = sst [smem:[#allocation31_spill]] %s7248_s25  ;;  %s118_s27 = ssub.s32 %s7110_s24, %s7251_s26 }
  0x15   : > { %8845 = sst [smem:[#allocation32_spill]] %s7251_s26  ;;  %s121_s28 = sadd.s32 1, %s7106_s23 }
  0x16   : > { %p119_p0 = scmp.eq.s32.totalorder %s118_s27, 0  ;;  %p128_p1 = scmp.ne.s32.totalorder %s7106_s23, %s7102_s22 }
  0x17   : > { %p129_p2 = scmp.eq.s32.totalorder %s7110_s24, 0  ;;  %p134_p3 = scmp.ne.s32.totalorder %s7102_s22, %s7098_s21 }
  0x18   : > { %s7261_s29 = scalar_select %p119_p0, %s7106_s23, %s121_s28  }
  0x19   : > { %p7263_p4 = por %p129_p2, %p128_p1  ;;  %p8804_p5 = scmp.eq.s32.totalorder %s7248_s25, 0 }
  0x1a   : > { %8846 = sst [smem:[#allocation33_spill]] %s7261_s29  ;;  %p5360_p6 = scmp.ge.s32.totalorder %s7110_s24, 1 }
  0x1b   : > { %p452_p7 = scmp.lt.s32.totalorder %s7110_s24, 3  ;;  %p7272_p8 = por %p8804_p5, %p134_p3 }
  0x1c   : > { %s7112_s18 = smov [#allocation3]   ;;  %p6023_p13 = scmp.lt.s32.totalorder %s7110_s24, 2 }
  0x1d   : > { %s8848_s0 = scalar_select %p7272_p8, 1, 0 }
  0x1e   : > { %p7277_p10 = pnand %p5360_p6, %p452_p7  ;;  %s464_s19 = sshll.u32 %s7112_s18, 4  ;;  %s465_s19 = int_to_ptr.vmem [resolvable:$true] %s464_s19 }
  0x1f   : > { %8849 = sst [smem:[#allocation34_spill]] %s8848_s0  ;;  %s7292_s27 = sand.u32 1, %s7106_s23  }
  0x20   : > { %s8850_s17 = scalar_select %p7277_p10, 1, 0 }
  0x21   : > { %p5969_p11 = pneg %p7277_p10  ;;  %p7296_p0 = pnand %p6023_p13, %p7263_p4 }
  0x22   : > { %8851 = sst [smem:[#allocation35_spill]] %s8850_s17  ;;  %s8855_s26 = sld [smem:[#allocation37_spill]] }
  0x23   : > { %p7285_p12 = pnand %p5969_p11, %p8804_p5 }
  0x24   : > { %s8854_s28 = scalar_select %p7296_p0, 1, 0 }
  0x25   : > { %s8852_s20 = scalar_select %p7285_p12, 1, 0 }
  0x26   : > { %p7308_p2 = pneg %p7285_p12 }
  0x27   : > { %8853 = sst [smem:[#allocation36_spill]] %s8852_s20 }
  0x28   : > { %s6562_s16 = scalar_lea.hbm %s8855_s26, 512 }
  0x29   : > { %p6563_p1 = scmp.ne.s32.totalorder %s8855_s26, %s6562_s16  ;;  %p6569_p6 = scmp.lt.u32.totalorder %s6562_s16, %s8855_s26 }
  0x2a   : > { %s8856_s25 = scalar_select %p7308_p2, 1, 0 }
  0x2b   : > { %p6565_p3 = pnand %p7308_p2, %p6563_p1 }
  0x2d   : > { %p6566_p4 = pneg %p6565_p3 }
  0x2f   : > { %p6571_p7 = pnand %p6569_p6, %p6566_p4 }
  0x31   : > { %6574 = shalt.err (!%p6571_p7)
}
  0x32   : > { %s6575_s29 = scalar_lea.vmem %s465_s19, 512  ;;  %p6583_p5 = scmp.lt.s32.totalorder %s465_s19, %s465_s19 }
  0x33   : > { %p6576_p11 = scmp.ne.s32.totalorder %s465_s19, %s6575_s29  ;;  %p6584_p8 = scmp.lt.s32.totalorder %s6575_s29, %s6575_s29 }
  0x35   : > { %p6578_p13 = pnand %p6576_p11, %p7308_p2  ;;  %p6585_p10 = por %p6584_p8, %p6583_p5 }
  0x37   : > { %p6579_p9 = pneg %p6578_p13 }
  0x39   : > { %p6586_p0 = pnand %p6585_p10, %p6579_p9 }
  0x3b   : > { %6589 = shalt.err (!%p6586_p0)
}
  0x3c   : > { %s7113_s22 = smov 256   ;;  %s8820_s16 = smov 16  }
  0x3d   : > { %5972 = dma.hbm_to_vmem [thread:$0]  (!%p7285_p12), %s8855_s26, 512, %s465_s19, [#allocation4], %s7113_s22, %s7113_s22, %s8820_s16  }
  0x3e   : > { %s5919_s18 = smul.u32 768, %s7292_s27  ;;  %s8857_s4 = sld [smem:[#allocation41_spill]] }
  0x3f   : > { %s5920_s30 = smul.u32 12288, %s7110_s24  ;;  %s8858_s14 = sand.u32 1, %s7110_s24  }
  0x40   : > { %s5921_s29 = smul.u32 6, %s7292_s27  ;;  %s517_s15 = scalar_lea.vmem [#allocation11], %s5919_s18 }
  0x41   : > { %s524_s2 = sshll.u32 %s517_s15, 4  ;;  %s7337_s20 = scalar_lea.sflag [#allocation4], %s8858_s14  ;;  %s7333_s2 = int_to_ptr.vmem [resolvable:$true] %s524_s2 }
  0x42   : > { %p8859_p8 = scmp.ne.s32.totalorder %s8854_s28, 0 }
  0x44   : > { %s7331_s3 = scalar_lea.hbm %s8857_s4, %s5920_s30  ;;  %p7343_p9 = pneg %p8859_p8 }
  0x45   : > { %s6590_s19 = scalar_lea.hbm %s7331_s3, 12288  ;;  %s6595_s15 = scalar_lea.hbm %s8857_s4, 24576 }
  0x46   : > { %p6591_p5 = scmp.ne.s32.totalorder %s7331_s3, %s6590_s19  ;;  %p6596_p1 = scmp.lt.u32.totalorder %s7331_s3, %s8857_s4 }
  0x47   : > { %s8860_s22 = scalar_select %p7343_p9, 1, 0 }
  0x48   : > { %p6593_p10 = pnand %p7343_p9, %p6591_p5  ;;  %p6597_p3 = scmp.lt.u32.totalorder %s6595_s15, %s6590_s19 }
  0x49   : > { %p6599_p6 = scmp.lt.u32.totalorder %s6590_s19, %s7331_s3 }
  0x4a   : > { %p6594_p0 = pneg %p6593_p10  ;;  %p6598_p4 = por %p6597_p3, %p6596_p1 }
  0x4c   : > { %p6600_p7 = por %p6599_p6, %p6598_p4 }
  0x4e   : > { %p6601_p11 = pnand %p6600_p7, %p6594_p0 }
  0x50   : > { %6604 = shalt.err (!%p6601_p11)
}
  0x51   : > { %s6605_s14 = scalar_lea.vmem %s7333_s2, 12288  ;;  %s7115_s18 = smov [#allocation11]  }
  0x52   : > { %p6606_p13 = scmp.ne.s32.totalorder %s7333_s2, %s6605_s14  ;;  %s6610_s30 = sshll.u32 %s7115_s18, 4  ;;  %s6611_s30 = int_to_ptr.vmem [resolvable:$false] %s6610_s30 }
  0x53   : > { %s6612_s23 = scalar_lea.vmem %s6611_s30, 24576  ;;  %p6613_p12 = scmp.lt.s32.totalorder %s7333_s2, %s6611_s30 }
  0x54   : > { %p6608_p5 = pnand %p6606_p13, %p7343_p9  ;;  %p6614_p2 = scmp.lt.s32.totalorder %s6612_s23, %s6605_s14 }
  0x56   : > { %p6609_p10 = pneg %p6608_p5  ;;  %p6615_p1 = por %p6614_p2, %p6613_p12 }
  0x58   : > { %p6616_p3 = pnand %p6615_p1, %p6609_p10 }
  0x5a   : > { %6619 = shalt.err (!%p6616_p3)
}
  0x5b   : > { %s7116_s19 = smov 384   ;;  %s7117_s17 = smov 24  }
  0x5c   : > { %5985 = dma.hbm_to_vmem [thread:$0]  (!%p8859_p8), %s7331_s3, 12288, %s7333_s2, %s7337_s20, %s7116_s19, %s7116_s19, %s7117_s17  }
  0x5d   : > { %s5922_s15 = smul.u32 96, %s7110_s24  ;;  %s538_s0 = scalar_lea.vmem [#allocation12], %s5921_s29 }
  0x5e   : > { %s546_s21 = sshll.u32 %s538_s0, 4  ;;  %s5368_s14 = sshll.u32 %s7292_s27, 8  ;;  %s7370_s21 = int_to_ptr.vmem [resolvable:$true] %s546_s21 }
  0x5f   : > { %s8861_s5 = sld [smem:[#allocation42_spill]] }
  0x65   : > { %s544_s23 = scalar_lea.hbm %s8861_s5, %s5922_s15  ;;  %s6625_s2 = scalar_lea.hbm %s8861_s5, 192 }
  0x66   : > { %s6620_s16 = scalar_lea.hbm %s544_s23, 96  ;;  %p6626_p4 = scmp.lt.u32.totalorder %s544_s23, %s8861_s5 }
  0x67   : > { %p6621_p12 = scmp.ne.s32.totalorder %s544_s23, %s6620_s16  ;;  %p6627_p6 = scmp.lt.u32.totalorder %s6625_s2, %s6620_s16 }
  0x68   : > { %p6629_p11 = scmp.lt.u32.totalorder %s6620_s16, %s544_s23 }
  0x69   : > { %p6623_p2 = pnand %p6621_p12, %p7343_p9  ;;  %p6628_p7 = por %p6627_p6, %p6626_p4 }
  0x6b   : > { %p6624_p0 = pneg %p6623_p2  ;;  %p6630_p13 = por %p6629_p11, %p6628_p7 }
  0x6d   : > { %p6631_p5 = pnand %p6630_p13, %p6624_p0 }
  0x6f   : > { %6634 = shalt.err (!%p6631_p5)
}
  0x70   : > { %s6635_s29 = scalar_lea.vmem %s7370_s21, 96  ;;  %s7118_s4 = smov [#allocation12]  }
  0x71   : > { %p6636_p10 = scmp.ne.s32.totalorder %s7370_s21, %s6635_s29  ;;  %s6640_s26 = sshll.u32 %s7118_s4, 4  ;;  %s6641_s26 = int_to_ptr.vmem [resolvable:$false] %s6640_s26 }
  0x72   : > { %s6642_s17 = scalar_lea.vmem %s6641_s26, 192  ;;  %p6643_p12 = scmp.lt.s32.totalorder %s7370_s21, %s6641_s26 }
  0x73   : > { %p6638_p1 = pnand %p6636_p10, %p7343_p9  ;;  %p6644_p2 = scmp.lt.s32.totalorder %s6642_s17, %s6635_s29 }
  0x75   : > { %p6639_p3 = pneg %p6638_p1  ;;  %p6645_p4 = por %p6644_p2, %p6643_p12 }
  0x77   : > { %p6646_p6 = pnand %p6645_p4, %p6639_p3 }
  0x79   : > { %6649 = shalt.err (!%p6646_p6)
}
  0x7a   : > { %5988 = dma.hbm_to_vmem [thread:$0]  (!%p8859_p8), %s544_s23, 96, %s7370_s21, %s7337_s20  }
  0x7b   : > { %s5825_s16 = sshll.u32 %s7110_s24, 12  ;;  %s557_s15 = scalar_lea.vmem [#allocation13], %s5368_s14 }
  0x7c   : > { %s564_s0 = sshll.u32 %s557_s15, 4  ;;  %s8862_s6 = sld [smem:[#allocation43_spill]]  ;;  %s7401_s0 = int_to_ptr.vmem [resolvable:$true] %s564_s0 }
  0x82   : > { %s7399_s2 = scalar_lea.hbm %s8862_s6, %s5825_s16  ;;  %s6655_s14 = scalar_lea.hbm %s8862_s6, 8192 }
  0x83   : > { %s6650_s3 = scalar_lea.hbm %s7399_s2, 4096  ;;  %p6656_p13 = scmp.lt.u32.totalorder %s7399_s2, %s8862_s6 }
  0x84   : > { %p6651_p0 = scmp.ne.s32.totalorder %s7399_s2, %s6650_s3  ;;  %p6657_p5 = scmp.lt.u32.totalorder %s6655_s14, %s6650_s3 }
  0x85   : > { %p6659_p1 = scmp.lt.u32.totalorder %s6650_s3, %s7399_s2 }
  0x86   : > { %p6653_p7 = pnand %p6651_p0, %p7343_p9  ;;  %p6658_p10 = por %p6657_p5, %p6656_p13 }
  0x88   : > { %p6654_p11 = pneg %p6653_p7  ;;  %p6660_p3 = por %p6659_p1, %p6658_p10 }
  0x8a   : > { %p6661_p12 = pnand %p6660_p3, %p6654_p11 }
  0x8c   : > { %6664 = shalt.err (!%p6661_p12)
}
  0x8d   : > { %s6665_s4 = scalar_lea.vmem %s7401_s0, 4096  ;;  %s7119_s26 = smov [#allocation13]  }
  0x8e   : > { %p6666_p2 = scmp.ne.s32.totalorder %s7401_s0, %s6665_s4  ;;  %s6670_s17 = sshll.u32 %s7119_s26, 4  ;;  %s6671_s17 = int_to_ptr.vmem [resolvable:$false] %s6670_s17 }
  0x8f   : > { %s6672_s16 = scalar_lea.vmem %s6671_s17, 8192  ;;  %p6673_p0 = scmp.lt.s32.totalorder %s7401_s0, %s6671_s17 }
  0x90   : > { %p6668_p4 = pnand %p6666_p2, %p7343_p9  ;;  %p6674_p7 = scmp.lt.s32.totalorder %s6672_s16, %s6665_s4 }
  0x92   : > { %p6669_p6 = pneg %p6668_p4  ;;  %p6675_p13 = por %p6674_p7, %p6673_p0 }
  0x94   : > { %p6676_p5 = pnand %p6675_p13, %p6669_p6 }
  0x96   : > { %6679 = shalt.err (!%p6676_p5)
}
  0x97   : > { %s8822_s15 = smov 128   ;;  %s8824_s18 = smov 8  }
  0x98   : > { %5991 = dma.hbm_to_vmem [thread:$0]  (!%p8859_p8), %s7399_s2, 4096, %s7401_s0, %s7337_s20, %s8822_s15, %s8822_s15, %s8824_s18  }
  0x99   : > { %s7429_s30 = sshll.u32 %s7292_s27, 1  ;;  %s7432_s3 = sshll.u32 %s7110_s24, 5 }
  0x9a   : > { %s8863_s7 = sld [smem:[#allocation44_spill]]  ;;  %s578_s19 = scalar_lea.vmem [#allocation14], %s7429_s30 }
  0x9b   : > { %s586_s29 = sshll.u32 %s578_s19, 4  ;;  %s8864_s8 = sld [smem:[#allocation45_spill]]  ;;  %s587_s29 = int_to_ptr.vmem [resolvable:$true] %s586_s29 }
  0xa0   : > { %s7438_s14 = scalar_lea.hbm %s8863_s7, %s7432_s3  ;;  %s6685_s21 = scalar_lea.hbm %s8863_s7, 64 }
  0xa1   : > { %s7445_s4 = scalar_lea.hbm %s8864_s8, %s7432_s3  ;;  %s6680_s26 = scalar_lea.hbm %s7438_s14, 32 }
  0xa2   : > { %p6681_p11 = scmp.ne.s32.totalorder %s7438_s14, %s6680_s26  ;;  %p6686_p3 = scmp.lt.u32.totalorder %s7438_s14, %s8863_s7 }
  0xa3   : > { %p6687_p12 = scmp.lt.u32.totalorder %s6685_s21, %s6680_s26  ;;  %p6689_p4 = scmp.lt.u32.totalorder %s6680_s26, %s7438_s14 }
  0xa4   : > { %p6683_p10 = pnand %p6681_p11, %p7343_p9 }
  0xa5   : > { %p6688_p2 = por %p6687_p12, %p6686_p3 }
  0xa6   : > { %p6684_p1 = pneg %p6683_p10 }
  0xa7   : > { %p6690_p6 = por %p6689_p4, %p6688_p2 }
  0xa9   : > { %p6691_p0 = pnand %p6690_p6, %p6684_p1 }
  0xab   : > { %6694 = shalt.err (!%p6691_p0)
}
  0xac   : > { %s6695_s19 = scalar_lea.vmem %s587_s29, 32  ;;  %s7122_s0 = smov [#allocation14]  }
  0xad   : > { %p6696_p7 = scmp.ne.s32.totalorder %s587_s29, %s6695_s19  ;;  %s6700_s2 = sshll.u32 %s7122_s0, 4  ;;  %s6701_s2 = int_to_ptr.vmem [resolvable:$false] %s6700_s2 }
  0xae   : > { %s6702_s17 = scalar_lea.vmem %s6701_s2, 64  ;;  %p6703_p11 = scmp.lt.s32.totalorder %s587_s29, %s6701_s2 }
  0xaf   : > { %p6698_p13 = pnand %p6696_p7, %p7343_p9  ;;  %p6704_p10 = scmp.lt.s32.totalorder %s6702_s17, %s6695_s19 }
  0xb1   : > { %p6699_p5 = pneg %p6698_p13  ;;  %p6705_p8 = por %p6704_p10, %p6703_p11 }
  0xb3   : > { %p6706_p3 = pnand %p6705_p8, %p6699_p5 }
  0xb5   : > { %6709 = shalt.err (!%p6706_p3)
}
  0xb6   : > { %p8865_p12 = scmp.ne.s32.totalorder %s8854_s28, 0  ;;  %s597_s15 = scalar_lea.vmem [#allocation15], %s7429_s30 }
  0xb7   : > { %s605_s26 = sshll.u32 %s597_s15, 4  ;;  %s7470_s23 = scalar_lea.hbm %s8786_s9, %s7432_s3  ;;  %s606_s26 = int_to_ptr.vmem [resolvable:$true] %s605_s26 }
  0xb8   : > { %5994 = dma.hbm_to_vmem [thread:$0]  (!%p8865_p12), %s7438_s14, 32, %s587_s29, %s7337_s20  }
  0xb9   : > { %s6710_s19 = scalar_lea.hbm %s7445_s4, 32  ;;  %s6715_s17 = scalar_lea.hbm %s8864_s8, 64 }
  0xba   : > { %p6711_p8 = scmp.ne.s32.totalorder %s7445_s4, %s6710_s19  ;;  %p6716_p4 = scmp.lt.u32.totalorder %s7445_s4, %s8864_s8 }
  0xbb   : > { %p6717_p6 = scmp.lt.u32.totalorder %s6715_s17, %s6710_s19  ;;  %p6719_p7 = scmp.lt.u32.totalorder %s6710_s19, %s7445_s4 }
  0xbc   : > { %p6713_p1 = pnand %p6711_p8, %p7343_p9 }
  0xbd   : > { %p6718_p0 = por %p6717_p6, %p6716_p4 }
  0xbe   : > { %p6714_p2 = pneg %p6713_p1 }
  0xbf   : > { %p6720_p13 = por %p6719_p7, %p6718_p0 }
  0xc1   : > { %p6721_p5 = pnand %p6720_p13, %p6714_p2 }
  0xc3   : > { %6724 = shalt.err (!%p6721_p5)
}
  0xc4   : > { %s6725_s14 = scalar_lea.vmem %s606_s26, 32  ;;  %s7123_s29 = smov [#allocation15]  }
  0xc5   : > { %p6726_p11 = scmp.ne.s32.totalorder %s606_s26, %s6725_s14  ;;  %s6730_s15 = sshll.u32 %s7123_s29, 4  ;;  %s6731_s15 = int_to_ptr.vmem [resolvable:$false] %s6730_s15 }
  0xc6   : > { %s6732_s16 = scalar_lea.vmem %s6731_s15, 64  ;;  %p6733_p8 = scmp.lt.s32.totalorder %s606_s26, %s6731_s15 }
  0xc7   : > { %p6728_p10 = pnand %p6726_p11, %p7343_p9  ;;  %p6734_p1 = scmp.lt.s32.totalorder %s6732_s16, %s6725_s14 }
  0xc9   : > { %p6729_p3 = pneg %p6728_p10  ;;  %p6735_p12 = por %p6734_p1, %p6733_p8 }
  0xcb   : > { %p6736_p4 = pnand %p6735_p12, %p6729_p3 }
  0xcd   : > { %6739 = shalt.err (!%p6736_p4)
}
  0xce   : > { %p8866_p6 = scmp.ne.s32.totalorder %s8854_s28, 0  ;;  %s616_s5 = scalar_lea.vmem [#allocation16], %s7429_s30 }
  0xcf   : > { %s624_s18 = sshll.u32 %s616_s5, 4  ;;  %s8825_s21 = sshll.u32 %s7292_s27, 10  ;;  %s625_s18 = int_to_ptr.vmem [resolvable:$true] %s624_s18 }
  0xd0   : > { %5997 = dma.hbm_to_vmem [thread:$0]  (!%p8866_p6), %s7445_s4, 32, %s606_s26, %s7337_s20  }
  0xd1   : > { %s6740_s19 = scalar_lea.hbm %s7470_s23, 32  ;;  %s6745_s17 = scalar_lea.hbm %s8786_s9, 64 }
  0xd2   : > { %p6741_p2 = scmp.ne.s32.totalorder %s7470_s23, %s6740_s19  ;;  %p6746_p7 = scmp.lt.u32.totalorder %s7470_s23, %s8786_s9 }
  0xd3   : > { %p6747_p13 = scmp.lt.u32.totalorder %s6745_s17, %s6740_s19  ;;  %p6749_p11 = scmp.lt.u32.totalorder %s6740_s19, %s7470_s23 }
  0xd4   : > { %p6743_p12 = pnand %p6741_p2, %p7343_p9 }
  0xd5   : > { %p6748_p5 = por %p6747_p13, %p6746_p7 }
  0xd6   : > { %p6744_p0 = pneg %p6743_p12 }
  0xd7   : > { %p6750_p10 = por %p6749_p11, %p6748_p5 }
  0xd9   : > { %p6751_p3 = pnand %p6750_p10, %p6744_p0 }
  0xdb   : > { %6754 = shalt.err (!%p6751_p3)
}
  0xdc   : > { %s6755_s4 = scalar_lea.vmem %s625_s18, 32  ;;  %s7124_s26 = smov [#allocation16]  }
  0xdd   : > { %p6756_p8 = scmp.ne.s32.totalorder %s625_s18, %s6755_s4  ;;  %s6760_s15 = sshll.u32 %s7124_s26, 4  ;;  %s6761_s15 = int_to_ptr.vmem [resolvable:$false] %s6760_s15 }
  0xde   : > { %s6762_s16 = scalar_lea.vmem %s6761_s15, 64  ;;  %p6763_p2 = scmp.lt.s32.totalorder %s625_s18, %s6761_s15 }
  0xdf   : > { %p6758_p1 = pnand %p6756_p8, %p7343_p9  ;;  %p6764_p12 = scmp.lt.s32.totalorder %s6762_s16, %s6755_s4 }
  0xe1   : > { %p6759_p4 = pneg %p6758_p1  ;;  %p6765_p6 = por %p6764_p12, %p6763_p2 }
  0xe3   : > { %p6766_p7 = pnand %p6765_p6, %p6759_p4 }
  0xe5   : > { %6769 = shalt.err (!%p6766_p7)
}
  0xe6   : > { %p8867_p13 = scmp.ne.s32.totalorder %s8854_s28, 0  ;;  %s5829_s5 = sshll.u32 %s7110_s24, 14 }
  0xe7   : > { %s635_s19 = scalar_lea.vmem [#allocation17], %s8825_s21  ;;  %s7518_s14 = scalar_lea.hbm %s8787_s10, %s5829_s5 }
  0xe8   : > { %6000 = dma.hbm_to_vmem [thread:$0]  (!%p8867_p13), %s7470_s23, 32, %s625_s18, %s7337_s20  }
  0xe9   : > { %s642_s0 = sshll.u32 %s635_s19, 4  ;;  %s6770_s29 = scalar_lea.hbm %s7518_s14, 16384  ;;  %s7520_s0 = int_to_ptr.vmem [resolvable:$true] %s642_s0 }
  0xea   : > { %p6771_p6 = scmp.ne.s32.totalorder %s7518_s14, %s6770_s29  ;;  %s6775_s4 = scalar_lea.hbm %s8787_s10, 32768 }
  0xeb   : > { %p6776_p11 = scmp.lt.u32.totalorder %s7518_s14, %s8787_s10  ;;  %p6777_p10 = scmp.lt.u32.totalorder %s6775_s4, %s6770_s29 }
  0xec   : > { %p6773_p0 = pnand %p6771_p6, %p7343_p9  ;;  %p6779_p8 = scmp.lt.u32.totalorder %s6770_s29, %s7518_s14 }
  0xed   : > { %p6778_p3 = por %p6777_p10, %p6776_p11 }
  0xee   : > { %p6774_p5 = pneg %p6773_p0 }
  0xef   : > { %p6780_p1 = por %p6779_p8, %p6778_p3 }
  0xf1   : > { %p6781_p4 = pnand %p6780_p1, %p6774_p5 }
  0xf3   : > { %6784 = shalt.err (!%p6781_p4)
}
  0xf4   : > { %s6785_s16 = scalar_lea.vmem %s7520_s0, 16384  ;;  %s7125_s19 = smov [#allocation17]  }
  0xf5   : > { %p6786_p2 = scmp.ne.s32.totalorder %s7520_s0, %s6785_s16  ;;  %s6790_s2 = sshll.u32 %s7125_s19, 4  ;;  %s6791_s2 = int_to_ptr.vmem [resolvable:$false] %s6790_s2 }
  0xf6   : > { %s6792_s17 = scalar_lea.vmem %s6791_s2, 32768  ;;  %p6793_p6 = scmp.lt.s32.totalorder %s7520_s0, %s6791_s2 }
  0xf7   : > { %p6788_p12 = pnand %p6786_p2, %p7343_p9  ;;  %p6794_p0 = scmp.lt.s32.totalorder %s6792_s17, %s6785_s16 }
  0xf9   : > { %p6789_p7 = pneg %p6788_p12  ;;  %p6795_p11 = por %p6794_p0, %p6793_p6 }
  0xfb   : > { %p6796_p10 = pnand %p6795_p11, %p6789_p7 }
  0xfd   : > { %6799 = shalt.err (!%p6796_p10)
}
  0xfe   : > { %s7126_s29 = smov 512   ;;  %s7127_s23 = smov 32  }
  0xff   : > { %6003 = dma.hbm_to_vmem [thread:$0]  (!%p8867_p13), %s7518_s14, 16384, %s7520_s0, %s7337_s20, %s7126_s29, %s7126_s29, %s7127_s23  }
 0x100   : > { %s5383_s18 = sshll.u32 %s7292_s27, 3  ;;  %s5830_s4 = sshll.u32 %s7110_s24, 7 }
 0x101   : > { %s7549_s16 = scalar_lea.hbm %s8788_s11, %s5830_s4  ;;  %s656_s19 = scalar_lea.vmem [#allocation18], %s5383_s18 }
 0x102   : > { %s664_s2 = sshll.u32 %s656_s19, 4  ;;  %s7556_s6 = scalar_lea.hbm %s8789_s12, %s5829_s5  ;;  %s665_s2 = int_to_ptr.vmem [resolvable:$true] %s664_s2 }
 0x103   : > { %s6800_s0 = scalar_lea.hbm %s7549_s16, 128  ;;  %s6805_s23 = scalar_lea.hbm %s8788_s11, 256 }
 0x104   : > { %p6801_p5 = scmp.ne.s32.totalorder %s7549_s16, %s6800_s0  ;;  %p6806_p1 = scmp.lt.u32.totalorder %s7549_s16, %s8788_s11 }
 0x105   : > { %p6807_p4 = scmp.lt.u32.totalorder %s6805_s23, %s6800_s0  ;;  %p6809_p12 = scmp.lt.u32.totalorder %s6800_s0, %s7549_s16 }
 0x106   : > { %p6803_p3 = pnand %p6801_p5, %p7343_p9 }
 0x107   : > { %p6808_p2 = por %p6807_p4, %p6806_p1 }
 0x108   : > { %p6804_p8 = pneg %p6803_p3 }
 0x109   : > { %p6810_p7 = por %p6809_p12, %p6808_p2 }
 0x10b   : > { %p6811_p6 = pnand %p6810_p7, %p6804_p8 }
 0x10d   : > { %6814 = shalt.err (!%p6811_p6)
}
 0x10e   : > { %s6815_s24 = scalar_lea.vmem %s665_s2, 128  ;;  %s7128_s21 = smov [#allocation18]  }
 0x10f   : > { %p6816_p0 = scmp.ne.s32.totalorder %s665_s2, %s6815_s24  ;;  %s6820_s5 = sshll.u32 %s7128_s21, 4  ;;  %s6821_s5 = int_to_ptr.vmem [resolvable:$false] %s6820_s5 }
 0x110   : > { %s6822_s18 = scalar_lea.vmem %s6821_s5, 256  ;;  %p6823_p5 = scmp.lt.s32.totalorder %s665_s2, %s6821_s5 }
 0x111   : > { %p6818_p11 = pnand %p6816_p0, %p7343_p9  ;;  %p6824_p3 = scmp.lt.s32.totalorder %s6822_s18, %s6815_s24 }
 0x113   : > { %p6819_p10 = pneg %p6818_p11  ;;  %p6825_p13 = por %p6824_p3, %p6823_p5 }
 0x115   : > { %p6826_p1 = pnand %p6825_p13, %p6819_p10 }
 0x117   : > { %6829 = shalt.err (!%p6826_p1)
}
 0x118   : > { %p8868_p4 = scmp.ne.s32.totalorder %s8854_s28, 0  ;;  %s8869_s15 = sshll.u32 %s7292_s27, 10 }
 0x119   : > { %s675_s19 = scalar_lea.vmem [#allocation19], %s8869_s15  ;;  %s7584_s29 = scalar_lea.hbm %s8790_s13, %s7432_s3 }
 0x11a   : > { %6006 = dma.hbm_to_vmem [thread:$0]  (!%p8868_p4), %s7549_s16, 128, %s665_s2, %s7337_s20  }
 0x11b   : > { %s682_s17 = sshll.u32 %s675_s19, 4  ;;  %s6830_s23 = scalar_lea.hbm %s7556_s6, 16384  ;;  %s7578_s17 = int_to_ptr.vmem [resolvable:$true] %s682_s17 }
 0x11c   : > { %p6831_p13 = scmp.ne.s32.totalorder %s7556_s6, %s6830_s23  ;;  %s6835_s24 = scalar_lea.hbm %s8789_s12, 32768 }
 0x11d   : > { %p6836_p12 = scmp.lt.u32.totalorder %s7556_s6, %s8789_s12  ;;  %p6837_p7 = scmp.lt.u32.totalorder %s6835_s24, %s6830_s23 }
 0x11e   : > { %p6833_p8 = pnand %p6831_p13, %p7343_p9  ;;  %p6839_p0 = scmp.lt.u32.totalorder %s6830_s23, %s7556_s6 }
 0x11f   : > { %p6838_p6 = por %p6837_p7, %p6836_p12 }
 0x120   : > { %p6834_p2 = pneg %p6833_p8 }
 0x121   : > { %p6840_p11 = por %p6839_p0, %p6838_p6 }
 0x123   : > { %p6841_p10 = pnand %p6840_p11, %p6834_p2 }
 0x125   : > { %6844 = shalt.err (!%p6841_p10)
}
 0x126   : > { %s6845_s2 = scalar_lea.vmem %s7578_s17, 16384  ;;  %s7129_s21 = smov [#allocation19]  }
 0x127   : > { %p6846_p5 = scmp.ne.s32.totalorder %s7578_s17, %s6845_s2  ;;  %s6850_s5 = sshll.u32 %s7129_s21, 4  ;;  %s6851_s5 = int_to_ptr.vmem [resolvable:$false] %s6850_s5 }
 0x128   : > { %s6852_s18 = scalar_lea.vmem %s6851_s5, 32768  ;;  %p6853_p13 = scmp.lt.s32.totalorder %s7578_s17, %s6851_s5 }
 0x129   : > { %p6848_p3 = pnand %p6846_p5, %p7343_p9  ;;  %p6854_p8 = scmp.lt.s32.totalorder %s6852_s18, %s6845_s2 }
 0x12b   : > { %p6849_p1 = pneg %p6848_p3  ;;  %p6855_p12 = por %p6854_p8, %p6853_p13 }
 0x12d   : > { %p6856_p7 = pnand %p6855_p12, %p6849_p1 }
 0x12f   : > { %6859 = shalt.err (!%p6856_p7)
}
 0x130   : > { %s8870_s15 = smov 8   ;;  %s8871_s19 = smov 128  }
 0x131   : > { %6009 = dma.hbm_to_vmem [thread:$0]  (!%p8868_p4), %s7556_s6, 16384, %s7578_s17, %s7337_s20, %s8871_s19, %s8871_s19, %s8870_s15  }
 0x132   : > { %s696_s0 = scalar_lea.vmem [#allocation20], %s7429_s30  ;;  %s7130_s23 = smov [#allocation6]  }
 0x133   : > { %s704_s14 = sshll.u32 %s696_s0, 4  ;;  %s477_s4 = sshll.u32 %s7130_s23, 4  ;;  %s7612_s14 = int_to_ptr.vmem [resolvable:$true] %s704_s14  ;;  %s478_s4 = int_to_ptr.vmem [resolvable:$true] %s477_s4 }
 0x134   : > { %s6860_s26 = scalar_lea.hbm %s7584_s29, 32  ;;  %s6865_s27 = scalar_lea.hbm %s8790_s13, 64 }
 0x135   : > { %p6861_p2 = scmp.ne.s32.totalorder %s7584_s29, %s6860_s26  ;;  %p6866_p11 = scmp.lt.u32.totalorder %s7584_s29, %s8790_s13 }
 0x136   : > { %p6867_p10 = scmp.lt.u32.totalorder %s6865_s27, %s6860_s26  ;;  %p6869_p3 = scmp.lt.u32.totalorder %s6860_s26, %s7584_s29 }
 0x137   : > { %p6863_p6 = pnand %p6861_p2, %p7343_p9 }
 0x138   : > { %p6868_p5 = por %p6867_p10, %p6866_p11 }
 0x139   : > { %p6864_p0 = pneg %p6863_p6 }
 0x13a   : > { %p6870_p1 = por %p6869_p3, %p6868_p5 }
 0x13c   : > { %p6871_p13 = pnand %p6870_p1, %p6864_p0 }
 0x13e   : > { %6874 = shalt.err (!%p6871_p13)
}
 0x13f   : > { %s6875_s6 = scalar_lea.vmem %s7612_s14, 32  ;;  %s7131_s17 = smov [#allocation20]  }
 0x140   : > { %p6876_p8 = scmp.ne.s32.totalorder %s7612_s14, %s6875_s6  ;;  %s6880_s5 = sshll.u32 %s7131_s17, 4  ;;  %s6881_s5 = int_to_ptr.vmem [resolvable:$false] %s6880_s5 }
 0x141   : > { %s6882_s18 = scalar_lea.vmem %s6881_s5, 64  ;;  %p6883_p2 = scmp.lt.s32.totalorder %s7612_s14, %s6881_s5 }
 0x142   : > { %p6878_p12 = pnand %p6876_p8, %p7343_p9  ;;  %p6884_p6 = scmp.lt.s32.totalorder %s6882_s18, %s6875_s6 }
 0x144   : > { %p6879_p7 = pneg %p6878_p12  ;;  %p6885_p11 = por %p6884_p6, %p6883_p2 }
 0x146   : > { %p6886_p10 = pnand %p6885_p11, %p6879_p7 }
 0x148   : > { %6889 = shalt.err (!%p6886_p10)
}
 0x149   : > { %6012 = dma.hbm_to_vmem [thread:$0]  (!%p8868_p4), %s7584_s29, 32, %s7612_s14, %s7337_s20  }
 0x14a   : > { %s8872_s1 = sld [smem:[#allocation38_spill]]  ;;  %p8873_p5 = scmp.ne.s32.totalorder %s8856_s25, 0 }
 0x150   : > { %s6890_s0 = scalar_lea.hbm %s8872_s1, 32 }
 0x151   : > { %p6891_p0 = scmp.ne.s32.totalorder %s8872_s1, %s6890_s0  ;;  %p6897_p13 = scmp.lt.u32.totalorder %s6890_s0, %s8872_s1 }
 0x153   : > { %p6893_p3 = pnand %p6891_p0, %p8873_p5 }
 0x155   : > { %p6894_p1 = pneg %p6893_p3 }
 0x157   : > { %p6899_p8 = pnand %p6897_p13, %p6894_p1 }
 0x159   : > { %6902 = shalt.err (!%p6899_p8)
}
 0x15a   : > { %s6903_s27 = scalar_lea.vmem %s478_s4, 32  ;;  %p6911_p6 = scmp.lt.s32.totalorder %s478_s4, %s478_s4 }
 0x15b   : > { %p6904_p12 = scmp.ne.s32.totalorder %s478_s4, %s6903_s27  ;;  %p6912_p11 = scmp.lt.s32.totalorder %s6903_s27, %s6903_s27 }
 0x15d   : > { %p6906_p7 = pnand %p6904_p12, %p8873_p5  ;;  %p6913_p10 = por %p6912_p11, %p6911_p6 }
 0x15f   : > { %p6907_p2 = pneg %p6906_p7 }
 0x161   : > { %p6914_p4 = pnand %p6913_p10, %p6907_p2 }
 0x163   : > { %6917 = shalt.err (!%p6914_p4)
}
 0x164   : > { %s7132_s29 = smov 1   ;;  %s8874_s14 = sld [smem:[#allocation36_spill]] }
 0x165   : > { %s8876_s2 = smov 16   ;;  %s8877_s18 = sld [smem:[#allocation46_spill]] }
 0x166   : > { %s715_s19 = scalar_lea.vmem [#allocation21], %s7429_s30  ;;  %s7133_s23 = smov [#allocation8]  }
 0x167   : > { %s723_s0 = sshll.u32 %s715_s19, 4  ;;  %s491_s26 = sshll.u32 %s7133_s23, 4  ;;  %s7663_s0 = int_to_ptr.vmem [resolvable:$true] %s723_s0  ;;  %s492_s26 = int_to_ptr.vmem [resolvable:$true] %s491_s26 }
 0x16a   : > { %p8875_p0 = scmp.ne.s32.totalorder %s8874_s14, 0 }
 0x16b   : > { %s7660_s15 = scalar_lea.hbm %s8877_s18, %s7432_s3  ;;  %s6923_s27 = scalar_lea.hbm %s8877_s18, 64 }
 0x16c   : > { %5975 = dma.hbm_to_vmem [thread:$0]  (!%p8875_p0), %s8872_s1, 32, %s478_s4, [#allocation7], %s8876_s2, %s8876_s2, %s7132_s29  }
 0x16d   : > { %s6918_s24 = scalar_lea.hbm %s7660_s15, 32  ;;  %p6924_p13 = scmp.lt.u32.totalorder %s7660_s15, %s8877_s18 }
 0x16e   : > { %p6919_p4 = scmp.ne.s32.totalorder %s7660_s15, %s6918_s24  ;;  %p6925_p8 = scmp.lt.u32.totalorder %s6923_s27, %s6918_s24 }
 0x16f   : > { %p6927_p7 = scmp.lt.u32.totalorder %s6918_s24, %s7660_s15 }
 0x170   : > { %p6921_p3 = pnand %p6919_p4, %p7343_p9  ;;  %p6926_p12 = por %p6925_p8, %p6924_p13 }
 0x172   : > { %p6922_p1 = pneg %p6921_p3  ;;  %p6928_p2 = por %p6927_p7, %p6926_p12 }
 0x174   : > { %p6929_p6 = pnand %p6928_p2, %p6922_p1 }
 0x176   : > { %6932 = shalt.err (!%p6929_p6)
}
 0x177   : > { %s6933_s21 = scalar_lea.vmem %s7663_s0, 32  ;;  %s7134_s6 = smov [#allocation21]  }
 0x178   : > { %p6934_p11 = scmp.ne.s32.totalorder %s7663_s0, %s6933_s21  ;;  %s6938_s17 = sshll.u32 %s7134_s6, 4  ;;  %s6939_s17 = int_to_ptr.vmem [resolvable:$false] %s6938_s17 }
 0x179   : > { %s6940_s5 = scalar_lea.vmem %s6939_s17, 64  ;;  %p6941_p3 = scmp.lt.s32.totalorder %s7663_s0, %s6939_s17 }
 0x17a   : > { %p6936_p10 = pnand %p6934_p11, %p7343_p9  ;;  %p6942_p0 = scmp.lt.s32.totalorder %s6940_s5, %s6933_s21 }
 0x17c   : > { %p6937_p4 = pneg %p6936_p10  ;;  %p6943_p13 = por %p6942_p0, %p6941_p3 }
 0x17e   : > { %p6944_p8 = pnand %p6943_p13, %p6937_p4 }
 0x180   : > { %6947 = shalt.err (!%p6944_p8)
}
 0x181   : > { %p8878_p1 = scmp.ne.s32.totalorder %s8854_s28, 0  ;;  %s8879_s24 = sld [smem:[#allocation39_spill]] }
 0x183   : > { %6015 = dma.hbm_to_vmem [thread:$0]  (!%p8878_p1), %s7660_s15, 32, %s7663_s0, %s7337_s20  }
 0x187   : > { %s8880_s4 = smov %s8879_s24  ;;  %s6948_s16 = scalar_lea.hbm %s8879_s24, 32 }
 0x188   : > { %p6949_p12 = scmp.ne.s32.totalorder %s8880_s4, %s6948_s16  ;;  %p6955_p2 = scmp.lt.u32.totalorder %s6948_s16, %s8880_s4 }
 0x18a   : > { %p6951_p0 = pnand %p6949_p12, %p8873_p5 }
 0x18c   : > { %p6952_p7 = pneg %p6951_p0 }
 0x18e   : > { %p6957_p6 = pnand %p6955_p2, %p6952_p7 }
 0x190   : > { %6960 = shalt.err (!%p6957_p6)
}
 0x191   : > { %s6961_s6 = scalar_lea.vmem %s492_s26, 32  ;;  %p6969_p3 = scmp.lt.s32.totalorder %s492_s26, %s492_s26 }
 0x192   : > { %p6962_p11 = scmp.ne.s32.totalorder %s492_s26, %s6961_s6  ;;  %p6970_p13 = scmp.lt.s32.totalorder %s6961_s6, %s6961_s6 }
 0x194   : > { %p6964_p10 = pnand %p6962_p11, %p8873_p5  ;;  %p6971_p8 = por %p6970_p13, %p6969_p3 }
 0x196   : > { %p6965_p4 = pneg %p6964_p10 }
 0x198   : > { %p6972_p1 = pnand %p6971_p8, %p6965_p4 }
 0x19a   : > { %6975 = shalt.err (!%p6972_p1)
}
 0x19b   : > { %p8881_p12 = scmp.ne.s32.totalorder %s8874_s14, 0  ;;  %s7135_s17 = smov [#allocation9]  }
 0x19c   : > { %s502_s5 = sshll.u32 %s7135_s17, 4  ;;  %s8882_s24 = sld [smem:[#allocation47_spill]]  ;;  %s503_s5 = int_to_ptr.vmem [resolvable:$true] %s502_s5 }
 0x19d   : > { %5978 = dma.hbm_to_vmem [thread:$0]  (!%p8881_p12), %s8880_s4, 32, %s492_s26, [#allocation7]  }
 0x19e   : > { %s8884_s21 = sld [smem:[#allocation40_spill]] }
 0x1a2   : > { %s8883_s16 = smov %s8882_s24  ;;  %s7709_s27 = scalar_lea.hbm %s8882_s24, %s7432_s3 }
 0x1a4   : > { %s8885_s6 = smov %s8884_s21  ;;  %s6976_s1 = scalar_lea.hbm %s8884_s21, 32 }
 0x1a5   : > { %p6977_p1 = scmp.ne.s32.totalorder %s8885_s6, %s6976_s1  ;;  %p6983_p2 = scmp.lt.u32.totalorder %s6976_s1, %s8885_s6 }
 0x1a7   : > { %p6979_p0 = pnand %p6977_p1, %p8873_p5 }
 0x1a9   : > { %p6980_p7 = pneg %p6979_p0 }
 0x1ab   : > { %p6985_p6 = pnand %p6983_p2, %p6980_p7 }
 0x1ad   : > { %6988 = shalt.err (!%p6985_p6)
}
 0x1ae   : > { %s6989_s0 = scalar_lea.vmem %s503_s5, 32  ;;  %p6997_p3 = scmp.lt.s32.totalorder %s503_s5, %s503_s5 }
 0x1af   : > { %p6990_p11 = scmp.ne.s32.totalorder %s503_s5, %s6989_s0  ;;  %p6998_p13 = scmp.lt.s32.totalorder %s6989_s0, %s6989_s0 }
 0x1b1   : > { %p6992_p10 = pnand %p6990_p11, %p8873_p5  ;;  %p6999_p8 = por %p6998_p13, %p6997_p3 }
 0x1b3   : > { %p6993_p4 = pneg %p6992_p10 }
 0x1b5   : > { %p7000_p9 = pnand %p6999_p8, %p6993_p4 }
 0x1b7   : > { %7003 = shalt.err (!%p7000_p9)
}
 0x1b8   : > { %5981 = dma.hbm_to_vmem [thread:$0]  (!%p8881_p12), %s8885_s6, 32, %s503_s5, [#allocation10]  }
 0x1b9   : > { %s734_s1 = scalar_lea.vmem [#allocation22], %s7429_s30  ;;  %s7004_s3 = scalar_lea.hbm %s7709_s27, 32 }
 0x1ba   : > { %s742_s25 = sshll.u32 %s734_s1, 4  ;;  %p7005_p5 = scmp.ne.s32.totalorder %s7709_s27, %s7004_s3  ;;  %s743_s25 = int_to_ptr.vmem [resolvable:$true] %s742_s25 }
 0x1bb   : > { %p8886_p1 = scmp.ne.s32.totalorder %s8860_s22, 0  ;;  %s7009_s19 = scalar_lea.hbm %s8883_s16, 64 }
 0x1bc   : > { %p7010_p7 = scmp.lt.u32.totalorder %s7709_s27, %s8883_s16  ;;  %p7011_p2 = scmp.lt.u32.totalorder %s7009_s19, %s7004_s3 }
 0x1bd   : > { %p7007_p0 = pnand %p7005_p5, %p8886_p1  ;;  %p7013_p11 = scmp.lt.u32.totalorder %s7004_s3, %s7709_s27 }
 0x1be   : > { %p7012_p6 = por %p7011_p2, %p7010_p7 }
 0x1bf   : > { %p7008_p9 = pneg %p7007_p0 }
 0x1c0   : > { %p7014_p12 = por %p7013_p11, %p7012_p6 }
 0x1c2   : > { %p7015_p10 = pnand %p7014_p12, %p7008_p9 }
 0x1c4   : > { %7018 = shalt.err (!%p7015_p10)
}
 0x1c5   : > { %s7019_s30 = scalar_lea.vmem %s743_s25, 32  ;;  %s7136_s5 = smov [#allocation22]  }
 0x1c6   : > { %p7020_p4 = scmp.ne.s32.totalorder %s743_s25, %s7019_s30  ;;  %s7024_s29 = sshll.u32 %s7136_s5, 4  ;;  %s7025_s29 = int_to_ptr.vmem [resolvable:$false] %s7024_s29 }
 0x1c7   : > { %s7026_s2 = scalar_lea.vmem %s7025_s29, 64  ;;  %p7027_p8 = scmp.lt.s32.totalorder %s743_s25, %s7025_s29 }
 0x1c8   : > { %p7022_p3 = pnand %p7020_p4, %p8886_p1  ;;  %p7028_p5 = scmp.lt.s32.totalorder %s7026_s2, %s7019_s30 }
 0x1ca   : > { %p7023_p13 = pneg %p7022_p3  ;;  %p7029_p0 = por %p7028_p5, %p7027_p8 }
 0x1cc   : > { %p7030_p2 = pnand %p7029_p0, %p7023_p13 }
 0x1ce   : > { %7033 = shalt.err (!%p7030_p2)
}
 0x1cf   : > { %p8887_p7 = scmp.ne.s32.totalorder %s8854_s28, 0  ;;  %s8888_s21 = sld [smem:[#allocation35_spill]] }
 0x1d1   : > { %6018 = dma.hbm_to_vmem [thread:$0]  (!%p8887_p7), %s7709_s27, 32, %s743_s25, %s7337_s20  }
 0x1d5   : > { %p8889_p9 = scmp.ne.s32.totalorder %s8888_s21, 0 }
 0x1d6   : > { %s8890_s22 = sld [smem:[#allocation31_spill]] (!%p8889_p9) }
 0x1d7   : > { %751 = sbr.rel (%p8889_p9) target bundleno = 3542 (0xdd6), region = 84 }
 0x1dc   : > { %p8891_p1 = scmp.eq.s32.totalorder (!%p8889_p9), %s8890_s22, 0 }
 0x1de   : > { %7077 = dma.done.wait (%p8891_p1), [#allocation4], 512   ;;  %p8892_p6 = pmov %p8891_p1 }
 0x1df   : > { %p8893_p11 = pmov %p8891_p1 }
 0x1e0   : > { %7079 = vsyncadd (%p8892_p6), [#allocation4], 4294966784 }
 0x1e1   : > { %7081 = dma.done.wait (%p8893_p11), [#allocation7], 64   ;;  %p8894_p12 = pmov %p8891_p1 }
 0x1e2   : > { %p8895_p10 = pmov %p8891_p1 }
 0x1e3   : > { %7083 = vsyncadd (%p8894_p12), [#allocation7], 4294967232 }
 0x1e4   : > { %7085 = dma.done.wait (%p8895_p10), [#allocation10], 32   ;;  %p8896_p4 = pmov %p8891_p1 }
 0x1e5   : > { %s8897_s20 = sld [smem:[#allocation29_spill]]  ;;  %s8898_s28 = sld [smem:[#allocation34_spill]] }
 0x1e6   : > { %7087 = vsyncadd (%p8896_p4), [#allocation10], 4294967264  ;;  %s769_s27 = sand.u32 1, %s8890_s22  }
 0x1e7   : > { %s770_s0 = scalar_lea.sflag [#allocation4], %s769_s27 }
 0x1eb   : > { %s771_s26 = sand.u32 1, %s8897_s20   ;;  %p8899_p3 = scmp.ne.s32.totalorder %s8898_s28, 0 }
 0x1ec   : > { %s5923_s15 = smul.u32 768, %s771_s26 }
 0x1ee   : > { %s7764_s7 = scalar_lea.vmem [#allocation11], %s5923_s15 }
 0x1ef   : > { %7089 = dma.done.wait (%p8899_p3), %s770_s0, 49568  }
 0x1f0   : > { %7091 = vsyncadd (%p8899_p3), %s770_s0, 4294917728  ;;  %s5924_s8 = smul.u32 6, %s771_s26  ;;  %s5403_s1 = sshll.u32 %s771_s26, 8 }
 0x1f1   : > { %s7770_s25 = sshll.u32 %s771_s26, 1  ;;  %s5407_s3 = sshll.u32 %s771_s26, 10 }
 0x1f2   : > { %s5408_s17 = sshll.u32 %s771_s26, 3  ;;  %s7772_s14 = scalar_lea.vmem [#allocation12], %s5924_s8 }
 0x1f3   : > { %s7774_s19 = scalar_lea.vmem [#allocation13], %s5403_s1  ;;  %s800_s23 = scalar_lea.vmem [#allocation14], %s7770_s25 }
 0x1f4   : > { %s809_s24 = scalar_lea.vmem [#allocation15], %s7770_s25  ;;  %s818_s30 = scalar_lea.vmem [#allocation16], %s7770_s25 }
 0x1f5   : > { %s7779_s5 = scalar_lea.vmem [#allocation17], %s5407_s3  ;;  %s7781_s29 = scalar_lea.vmem [#allocation18], %s5408_s17 }
 0x1f6   : > { %s7783_s2 = scalar_lea.vmem [#allocation19], %s5407_s3  ;;  %s854_s21 = scalar_lea.vmem [#allocation20], %s7770_s25 }
 0x1f7   : > { %s863_s20 = scalar_lea.vmem [#allocation21], %s7770_s25  ;;  %s872_s28 = scalar_lea.vmem [#allocation22], %s7770_s25 }
 0x1f8   : > { %p8900_p13 = scmp.ne.s32.totalorder %s8890_s22, 0 }
 0x1f9   : > { %v976_v0 = vld [vmem:[#allocation3] sm:$0xff] (!%p8900_p13)  ;;  %v977_v1 = vld [vmem:[#allocation3 + $0x8] sm:$0xff] (!%p8900_p13)  ;;  %v978_v2 = vld [vmem:[#allocation3 + $0x10] sm:$0xff] (!%p8900_p13)  ;;  %v1016_v22 = vlaneseq (!%p8900_p13) }
 0x1fa   : > { %975 = sbr.rel (%p8900_p13) target bundleno = 826 (0x33a), region = 152  ;;  %v982_v3 = vadd.f32 (!%p8900_p13), %v977_v1, %v976_v0  ;;  %v979_v4 = vld [vmem:[#allocation3 + $0x18] sm:$0xff] (!%p8900_p13)  ;;  %v980_v30 = vld [vmem:[#allocation8] sm:$0x3] (!%p8900_p13)  ;;  %v981_v31 = vld [vmem:[#allocation9] sm:$0x3] (!%p8900_p13) }
 0x1fb   : > { %v985_v5 = vadd.f32 (!%p8900_p13), %v979_v4, %v978_v2  ;;  %v1017_v26 = vshrl.u32 (!%p8900_p13), %v1016_v22, 7 }
 0x1fc   : > { %983 = vadd.xlane.f32.xlu0 (!%p8900_p13), %v982_v3 }
 0x1fd   : > { %v1018_v28 = vsub.s32 (!%p8900_p13), 0, %v1017_v26  ;;  %v1022_v29 = vsub.s32 (!%p8900_p13), 1, %v1017_v26 }
 0x1ff   : > { %v1019_v32 = vrot.slane (!%p8900_p13), %v980_v30, %v1018_v28  ;;  %v1023_v33 = vrot.slane (!%p8900_p13), %v980_v30, %v1022_v29  ;;  %v1034_v35 = vrot.slane (!%p8900_p13), %v981_v31, %v1018_v28  ;;  %v1038_v36 = vrot.slane (!%p8900_p13), %v981_v31, %v1022_v29 }
 0x200   : > { %986 = vadd.xlane.f32.xlu0 (!%p8900_p13), %v985_v5 }
 0x289   : > { %v984_v6 = vpop.xlane.xlu0 %983 }
 0x28a   : > { %v989_v7 = vmul.f32 0.00390625, %v984_v6 }
 0x28c   : > { %v991_v8 = vsub.f32 %v976_v0, %v989_v7  ;;  %v992_v9 = vsub.f32 %v977_v1, %v989_v7 }
 0x28d   : > { %v987_v10 = vpop.xlane.xlu0 %986 }
 0x28e   : > { %v990_v11 = vmul.f32 0.00390625, %v987_v10  ;;  %v995_v12 = vmul.f32 %v991_v8, %v991_v8  ;;  %v996_v13 = vmul.f32 %v992_v9, %v992_v9 }
 0x290   : > { %v993_v14 = vsub.f32 %v978_v2, %v990_v11  ;;  %v994_v15 = vsub.f32 %v979_v4, %v990_v11  ;;  %v999_v16 = vadd.f32 %v996_v13, %v995_v12 }
 0x292   : > { %1000 = vadd.xlane.f32.xlu1 %v999_v16  ;;  %v997_v17 = vmul.f32 %v993_v14, %v993_v14  ;;  %v998_v18 = vmul.f32 %v994_v15, %v994_v15 }
 0x294   : > { %v1002_v19 = vadd.f32 %v998_v18, %v997_v17 }
 0x296   : > { %1003 = vadd.xlane.f32.xlu1 %v1002_v19 }
 0x31f   : > { %v1001_v20 = vpop.xlane.xlu1 %1000 }
 0x320   : > { %v1005_v21 = vmul.f32 0.00390625, %v1001_v20 }
 0x322   : > { %v1007_v23 = vadd.f32 1e-12, %v1005_v21 }
 0x323   : > { %v1004_v24 = vpop.xlane.xlu1 %1003 }
 0x324   : > { %6082 = vrsqrt.f32 %v1007_v23  ;;  %v1006_v25 = vmul.f32 0.00390625, %v1004_v24 }
 0x326   : > { %v1008_v27 = vadd.f32 1e-12, %v1006_v25 }
 0x328   : > { %6084 = vrsqrt.f32 %v1008_v27 }
 0x32e   : > { %v6083_v34 = vpop.eup %6082 }
 0x32f   : > { %v1011_v37 = vmul.f32 %v6083_v34, %v991_v8  ;;  %v1012_v38 = vmul.f32 %v6083_v34, %v992_v9 }
 0x331   : > { %v1026_v39 = vmul.f32 %v1019_v32, %v1011_v37  ;;  %v1027_v40 = vmul.f32 %v1023_v33, %v1012_v38 }
 0x332   : > { %v6085_v41 = vpop.eup %6084 }
 0x333   : > { %v1041_v42 = vadd.f32 %v1034_v35, %v1026_v39  ;;  %v1042_v43 = vadd.f32 %v1038_v36, %v1027_v40  ;;  %v1013_v44 = vmul.f32 %v6085_v41, %v993_v14  ;;  %v1014_v45 = vmul.f32 %v6085_v41, %v994_v15 }
 0x335   : > { %1045 = vst [vmem:[#allocation2] sm:$0xff] %v1041_v42  ;;  %1046 = vst [vmem:[#allocation2 + $0x8] sm:$0xff] %v1042_v43  ;;  %v1028_v46 = vmul.f32 %v1019_v32, %v1013_v44  ;;  %v1029_v47 = vmul.f32 %v1023_v33, %v1014_v45 }
 0x337   : > { %v1043_v48 = vadd.f32 %v1034_v35, %v1028_v46  ;;  %v1044_v49 = vadd.f32 %v1038_v36, %v1029_v47 }
 0x339   : > { %1047 = vst [vmem:[#allocation2 + $0x10] sm:$0xff] %v1043_v48  ;;  %1048 = vst [vmem:[#allocation2 + $0x18] sm:$0xff] %v1044_v49 }
 0x33a PF: > { %v6086_v50 = vld [vmem:[%s7764_s7 + $0x4] ss:$24 sps:$4 sm:$0xff]   ;;  %v6088_v51 = vld [vmem:[%s7764_s7] ss:$24 sps:$4 sm:$0xff]   ;;  %v6089_v52 = vld [vmem:[%s7764_s7 + $0x34] ss:$24 sps:$4 sm:$0xff]  }
 0x33b   : > { %1663 = vmatprep.subr.bf16.mxu0 %v6086_v50  ;;  %v6091_v53 = vld [vmem:[%s7764_s7 + $0x30] ss:$24 sps:$4 sm:$0xff]   ;;  %v6092_v54 = vld [vmem:[%s7764_s7 + $0x64] ss:$24 sps:$4 sm:$0xff]   ;;  %v6094_v55 = vld [vmem:[%s7764_s7 + $0x60] ss:$24 sps:$4 sm:$0xff]  }
 0x33c   : > { %1664 = vmatpush1.bf16.msra.mxu0 %v6088_v51  ;;  %v6095_v56 = vld [vmem:[%s7764_s7 + $0x94] ss:$24 sps:$4 sm:$0xff]   ;;  %v6097_v57 = vld [vmem:[%s7764_s7 + $0x90] ss:$24 sps:$4 sm:$0xff]   ;;  %v6098_v58 = vld [vmem:[%s7764_s7 + $0xc4] ss:$24 sps:$4 sm:$0xff]  }
 0x33d   : > { %1665 = vmatprep.subr.bf16.mxu0 %v6089_v52  ;;  %v6100_v59 = vld [vmem:[%s7764_s7 + $0xc0] ss:$24 sps:$4 sm:$0xff]   ;;  %v6101_v60 = vld [vmem:[%s7764_s7 + $0xf4] ss:$24 sps:$4 sm:$0xff]   ;;  %v6103_v61 = vld [vmem:[%s7764_s7 + $0xf0] ss:$24 sps:$4 sm:$0xff]  }
 0x33e   : > { %v6104_v62 = vld [vmem:[%s7764_s7 + $0x124] ss:$24 sps:$4 sm:$0xff]   ;;  %v6106_v2 = vld [vmem:[%s7764_s7 + $0x120] ss:$24 sps:$4 sm:$0xff]   ;;  %v6107_v3 = vld [vmem:[%s7764_s7 + $0x154] ss:$24 sps:$4 sm:$0xff]  }
 0x33f   : > { %v1050_v63 = vld [vmem:[#allocation2 + $0x8] sm:$0xff]  ;;  %v6113_v7 = vld [vmem:[%s7764_s7 + $0x1b4] ss:$24 sps:$4 sm:$0xff]   ;;  %v1049_v21 = vld [vmem:[#allocation2] sm:$0xff]  ;;  %vm7138_vm0 = vmmov 0   ;;  %vm1924_vm1 = vcmask 1043456  }
 0x340   : > { %1666 = vmatpush1.bf16.msra.mxu0 %v6091_v53  ;;  %v1052_v0 = vld [vmem:[#allocation2 + $0x18] sm:$0xff]  ;;  %v6110_v5 = vld [vmem:[%s7764_s7 + $0x184] ss:$24 sps:$4 sm:$0xff]   ;;  %v1051_v22 = vld [vmem:[#allocation2 + $0x10] sm:$0xff]  ;;  %vm1896_vm2 = vcmask 64512   ;;  %s8901_s22 = sld [smem:[#allocation31_spill]] }
 0x341   : > { %1667 = vmatprep.subr.bf16.mxu0 %v6092_v54  ;;  %v7803_v1 = vpack.c.bf16 %v1052_v0, %v1050_v63  ;;  %v6109_v4 = vld [vmem:[%s7764_s7 + $0x150] ss:$24 sps:$4 sm:$0xff]   ;;  %v6112_v6 = vld [vmem:[%s7764_s7 + $0x180] ss:$24 sps:$4 sm:$0xff]   ;;  %v6116_v9 = vld [vmem:[%s7764_s7 + $0x1e4] ss:$24 sps:$4 sm:$0xff]   ;;  %v7827_v25 = vpack.c.bf16 %v1051_v22, %v1049_v21 }
 0x342   : > { %v6115_v8 = vld [vmem:[%s7764_s7 + $0x1b0] ss:$24 sps:$4 sm:$0xff]   ;;  %v6118_v10 = vld [vmem:[%s7764_s7 + $0x1e0] ss:$24 sps:$4 sm:$0xff]   ;;  %v6119_v11 = vld [vmem:[%s7764_s7 + $0x214] ss:$24 sps:$4 sm:$0xff]  }
 0x343   : > { %1695 = vmatprep.mubr.bf16.mxu0 %v7803_v1  ;;  %v6121_v12 = vld [vmem:[%s7764_s7 + $0x210] ss:$24 sps:$4 sm:$0xff]   ;;  %v6122_v13 = vld [vmem:[%s7764_s7 + $0x244] ss:$24 sps:$4 sm:$0xff]   ;;  %v6124_v14 = vld [vmem:[%s7764_s7 + $0x240] ss:$24 sps:$4 sm:$0xff]  }
 0x344   : > { %1668 = vmatpush1.bf16.msra.mxu0 %v6094_v55  ;;  %v6125_v15 = vld [vmem:[%s7764_s7 + $0x274] ss:$24 sps:$4 sm:$0xff]   ;;  %v6127_v16 = vld [vmem:[%s7764_s7 + $0x270] ss:$24 sps:$4 sm:$0xff]   ;;  %v6128_v17 = vld [vmem:[%s7764_s7 + $0x2a4] ss:$24 sps:$4 sm:$0xff]  }
 0x345   : > { %1669 = vmatprep.subr.bf16.mxu0 %v6095_v56  ;;  %v6130_v18 = vld [vmem:[%s7764_s7 + $0x2a0] ss:$24 sps:$4 sm:$0xff]   ;;  %v6131_v19 = vld [vmem:[%s7764_s7 + $0x2d4] ss:$24 sps:$4 sm:$0xff]   ;;  %v6133_v20 = vld [vmem:[%s7764_s7 + $0x2d0] ss:$24 sps:$4 sm:$0xff]  }
 0x346   : > { %v6136_v23 = vld [vmem:[%s7764_s7 + $0xc] ss:$24 sps:$4 sm:$0xff]   ;;  %v6134_v24 = vld [vmem:[%s7764_s7 + $0x8] ss:$24 sps:$4 sm:$0xff]   ;;  %v6139_v26 = vld [vmem:[%s7764_s7 + $0x3c] ss:$24 sps:$4 sm:$0xff]  }
 0x347   : > { %v6137_v27 = vld [vmem:[%s7764_s7 + $0x38] ss:$24 sps:$4 sm:$0xff]   ;;  %v6142_v28 = vld [vmem:[%s7764_s7 + $0x6c] ss:$24 sps:$4 sm:$0xff]   ;;  %v6140_v29 = vld [vmem:[%s7764_s7 + $0x68] ss:$24 sps:$4 sm:$0xff]  }
 0x348   : > { %1670 = vmatpush1.bf16.msra.mxu0 %v6097_v57  ;;  %v6145_v30 = vld [vmem:[%s7764_s7 + $0x9c] ss:$24 sps:$4 sm:$0xff]   ;;  %v6143_v31 = vld [vmem:[%s7764_s7 + $0x98] ss:$24 sps:$4 sm:$0xff]   ;;  %v6148_v32 = vld [vmem:[%s7764_s7 + $0xcc] ss:$24 sps:$4 sm:$0xff]  }
 0x349   : > { %1671 = vmatprep.subr.bf16.mxu0 %v6098_v58  ;;  %v6146_v33 = vld [vmem:[%s7764_s7 + $0xc8] ss:$24 sps:$4 sm:$0xff]   ;;  %v6151_v34 = vld [vmem:[%s7764_s7 + $0xfc] ss:$24 sps:$4 sm:$0xff]   ;;  %v6149_v35 = vld [vmem:[%s7764_s7 + $0xf8] ss:$24 sps:$4 sm:$0xff]  }
 0x34a   : > { %v6154_v36 = vld [vmem:[%s7764_s7 + $0x12c] ss:$24 sps:$4 sm:$0xff]   ;;  %v6152_v37 = vld [vmem:[%s7764_s7 + $0x128] ss:$24 sps:$4 sm:$0xff]   ;;  %v6157_v38 = vld [vmem:[%s7764_s7 + $0x15c] ss:$24 sps:$4 sm:$0xff]  }
 0x34b   : > { %v6155_v39 = vld [vmem:[%s7764_s7 + $0x158] ss:$24 sps:$4 sm:$0xff]   ;;  %v6160_v40 = vld [vmem:[%s7764_s7 + $0x18c] ss:$24 sps:$4 sm:$0xff]   ;;  %v6158_v41 = vld [vmem:[%s7764_s7 + $0x188] ss:$24 sps:$4 sm:$0xff]  }
 0x34c   : > { %1672 = vmatpush1.bf16.msra.mxu0 %v6100_v59  ;;  %v6163_v42 = vld [vmem:[%s7764_s7 + $0x1bc] ss:$24 sps:$4 sm:$0xff]   ;;  %v6161_v43 = vld [vmem:[%s7764_s7 + $0x1b8] ss:$24 sps:$4 sm:$0xff]   ;;  %v6166_v44 = vld [vmem:[%s7764_s7 + $0x1ec] ss:$24 sps:$4 sm:$0xff]  }
 0x34d   : > { %1673 = vmatprep.subr.bf16.mxu0 %v6101_v60  ;;  %v6164_v45 = vld [vmem:[%s7764_s7 + $0x1e8] ss:$24 sps:$4 sm:$0xff]   ;;  %v6169_v46 = vld [vmem:[%s7764_s7 + $0x21c] ss:$24 sps:$4 sm:$0xff]   ;;  %v6167_v47 = vld [vmem:[%s7764_s7 + $0x218] ss:$24 sps:$4 sm:$0xff]  }
 0x34e   : > { %v6172_v48 = vld [vmem:[%s7764_s7 + $0x24c] ss:$24 sps:$4 sm:$0xff]   ;;  %v6170_v49 = vld [vmem:[%s7764_s7 + $0x248] ss:$24 sps:$4 sm:$0xff]   ;;  %v6175_v50 = vld [vmem:[%s7764_s7 + $0x27c] ss:$24 sps:$4 sm:$0xff]  }
 0x34f   : > { %v6173_v51 = vld [vmem:[%s7764_s7 + $0x278] ss:$24 sps:$4 sm:$0xff]   ;;  %v6178_v52 = vld [vmem:[%s7764_s7 + $0x2ac] ss:$24 sps:$4 sm:$0xff]   ;;  %v6176_v53 = vld [vmem:[%s7764_s7 + $0x2a8] ss:$24 sps:$4 sm:$0xff]  }
 0x350   : > { %1674 = vmatpush1.bf16.msra.mxu0 %v6103_v61  ;;  %v6181_v54 = vld [vmem:[%s7764_s7 + $0x2dc] ss:$24 sps:$4 sm:$0xff]   ;;  %v6179_v55 = vld [vmem:[%s7764_s7 + $0x2d8] ss:$24 sps:$4 sm:$0xff]   ;;  %p5820_p8 = scmp.ne.s32.totalorder %s8901_s22, 1 }
 0x351   : > { %1675 = vmatprep.subr.bf16.mxu0 %v6104_v62  ;;  %v6184_v56 = vld [vmem:[%s7764_s7 + $0x14] ss:$24 sps:$4 sm:$0xff]   ;;  %v6182_v57 = vld [vmem:[%s7764_s7 + $0x10] ss:$24 sps:$4 sm:$0xff]   ;;  %v6187_v58 = vld [vmem:[%s7764_s7 + $0x44] ss:$24 sps:$4 sm:$0xff]  }
 0x352   : > { %v6185_v59 = vld [vmem:[%s7764_s7 + $0x40] ss:$24 sps:$4 sm:$0xff]   ;;  %v6190_v60 = vld [vmem:[%s7764_s7 + $0x74] ss:$24 sps:$4 sm:$0xff]   ;;  %v6188_v61 = vld [vmem:[%s7764_s7 + $0x70] ss:$24 sps:$4 sm:$0xff]  }
 0x353   : > { %v6193_v62 = vld [vmem:[%s7764_s7 + $0xa4] ss:$24 sps:$4 sm:$0xff]   ;;  %v6191_v63 = vld [vmem:[%s7764_s7 + $0xa0] ss:$24 sps:$4 sm:$0xff]   ;;  %v6196_v0 = vld [vmem:[%s7764_s7 + $0xd4] ss:$24 sps:$4 sm:$0xff]  }
 0x354   : > { %1676 = vmatpush1.bf16.msra.mxu0 %v6106_v2  ;;  %v6199_v2 = vld [vmem:[%s7764_s7 + $0x104] ss:$24 sps:$4 sm:$0xff]   ;;  %v6224_v21 = vld [vmem:[%s7764_s7 + $0x2b0] ss:$24 sps:$4 sm:$0xff]  }
 0x355   : > { %1677 = vmatprep.subr.bf16.mxu0 %v6107_v3  ;;  %v6197_v3 = vld [vmem:[%s7764_s7 + $0x100] ss:$24 sps:$4 sm:$0xff]   ;;  %v6229_v22 = vld [vmem:[%s7764_s7 + $0x2e4] ss:$24 sps:$4 sm:$0xff]  }
 0x358   : > { %1678 = vmatpush1.bf16.msra.mxu0 %v6109_v4  ;;  %v6202_v4 = vld [vmem:[%s7764_s7 + $0x134] ss:$24 sps:$4 sm:$0xff]  }
 0x359   : > { %1679 = vmatprep.subr.bf16.mxu0 %v6110_v5  ;;  %v6200_v5 = vld [vmem:[%s7764_s7 + $0x130] ss:$24 sps:$4 sm:$0xff]  }
 0x35c   : > { %1680 = vmatpush1.bf16.msra.mxu0 %v6112_v6  ;;  %v6205_v6 = vld [vmem:[%s7764_s7 + $0x164] ss:$24 sps:$4 sm:$0xff]  }
 0x35d   : > { %1681 = vmatprep.subr.bf16.mxu0 %v6113_v7  ;;  %v6203_v7 = vld [vmem:[%s7764_s7 + $0x160] ss:$24 sps:$4 sm:$0xff]  }
 0x360   : > { %1682 = vmatpush1.bf16.msra.mxu0 %v6115_v8  ;;  %v6208_v8 = vld [vmem:[%s7764_s7 + $0x194] ss:$24 sps:$4 sm:$0xff]  }
 0x361   : > { %1683 = vmatprep.subr.bf16.mxu0 %v6116_v9  ;;  %v6206_v9 = vld [vmem:[%s7764_s7 + $0x190] ss:$24 sps:$4 sm:$0xff]  }
 0x364   : > { %1684 = vmatpush1.bf16.msra.mxu0 %v6118_v10  ;;  %v6211_v10 = vld [vmem:[%s7764_s7 + $0x1c4] ss:$24 sps:$4 sm:$0xff]  }
 0x365   : > { %1685 = vmatprep.subr.bf16.mxu0 %v6119_v11  ;;  %v6209_v11 = vld [vmem:[%s7764_s7 + $0x1c0] ss:$24 sps:$4 sm:$0xff]  }
 0x368   : > { %1686 = vmatpush1.bf16.msra.mxu0 %v6121_v12  ;;  %v6214_v12 = vld [vmem:[%s7764_s7 + $0x1f4] ss:$24 sps:$4 sm:$0xff]  }
 0x369   : > { %1687 = vmatprep.subr.bf16.mxu0 %v6122_v13  ;;  %v6212_v13 = vld [vmem:[%s7764_s7 + $0x1f0] ss:$24 sps:$4 sm:$0xff]  }
 0x36c   : > { %1688 = vmatpush1.bf16.msra.mxu0 %v6124_v14  ;;  %v6217_v14 = vld [vmem:[%s7764_s7 + $0x224] ss:$24 sps:$4 sm:$0xff]  }
 0x36d   : > { %1689 = vmatprep.subr.bf16.mxu0 %v6125_v15  ;;  %v6215_v15 = vld [vmem:[%s7764_s7 + $0x220] ss:$24 sps:$4 sm:$0xff]  }
 0x370   : > { %1690 = vmatpush1.bf16.msra.mxu0 %v6127_v16  ;;  %v6220_v16 = vld [vmem:[%s7764_s7 + $0x254] ss:$24 sps:$4 sm:$0xff]  }
 0x371   : > { %1691 = vmatprep.subr.bf16.mxu0 %v6128_v17  ;;  %v6218_v17 = vld [vmem:[%s7764_s7 + $0x250] ss:$24 sps:$4 sm:$0xff]  }
 0x374   : > { %1692 = vmatpush1.bf16.msra.mxu0 %v6130_v18  ;;  %v6223_v18 = vld [vmem:[%s7764_s7 + $0x284] ss:$24 sps:$4 sm:$0xff]  }
 0x375   : > { %1693 = vmatprep.subr.bf16.mxu0 %v6131_v19  ;;  %v6221_v19 = vld [vmem:[%s7764_s7 + $0x280] ss:$24 sps:$4 sm:$0xff]  }
 0x378   : > { %1694 = vmatpush1.bf16.msra.mxu0 %v6133_v20  ;;  %v6226_v20 = vld [vmem:[%s7764_s7 + $0x2b4] ss:$24 sps:$4 sm:$0xff]  }
 0x379   : > { %1706 = vmatprep.subr.bf16.mxu0 %v6136_v23  ;;  %v6227_v23 = vld [vmem:[%s7764_s7 + $0x2e0] ss:$24 sps:$4 sm:$0xff]  }
 0x37b   : > { %1696 = vmatmul.mubr.bf16.vlgmr.msra.gmra.mrb[0].mxu0 %v7827_v25 }
 0x37c   : > { %1707 = vmatpush1.bf16.msra.mxu0 %v6134_v24  ;;  %1738 = vmatprep.mubr.bf16.mxu0 %v7803_v1  ;;  %v7137_v24 = vmov 0.0  }
 0x37d   : > { %1708 = vmatprep.subr.bf16.mxu0 %v6139_v26  ;;  %5875 = vmatprep.subr.bf16.mxu1 %v7137_v24 }
 0x37e   : > { %5877 = vmatprep.mubr.msk.bf16.mxu1 %vm7138_vm0, %v7137_v24 }
 0x380   : > { %1709 = vmatpush1.bf16.msra.mxu0 %v6137_v27 }
 0x381   : > { %1710 = vmatprep.subr.bf16.mxu0 %v6142_v28 }
 0x384   : > { %1711 = vmatpush1.bf16.msra.mxu0 %v6140_v29 }
 0x385   : > { %1712 = vmatprep.subr.bf16.mxu0 %v6145_v30  ;;  %v1153_v30 = vlaneseq }
 0x388   : > { %1713 = vmatpush1.bf16.msra.mxu0 %v6143_v31  ;;  %v7902_v31 = vshrl.u32 %v1153_v30, 7 }
 0x389   : > { %1714 = vmatprep.subr.bf16.mxu0 %v6148_v32 }
 0x38a   : > { %v1167_v32 = vsub.s32 3, %v7902_v31 }
 0x38c   : > { %1715 = vmatpush1.bf16.msra.mxu0 %v6146_v33  ;;  %v1151_v33 = vld [vmem:[%s7772_s14] sm:$0x3f] }
 0x38d   : > { %1716 = vmatprep.subr.bf16.mxu0 %v6151_v34 }
 0x390   : > { %1717 = vmatpush1.bf16.msra.mxu0 %v6149_v35  ;;  %v7910_v35 = vsub.s32 0, %v7902_v31 }
 0x391   : > { %1718 = vmatprep.subr.bf16.mxu0 %v6154_v36  ;;  %v1168_v36 = vrot.slane %v1151_v33, %v1167_v32 }
 0x394   : > { %1719 = vmatpush1.bf16.msra.mxu0 %v6152_v37  ;;  %v7915_v37 = vsub.s32 1, %v7902_v31 }
 0x395   : > { %1720 = vmatprep.subr.bf16.mxu0 %v6157_v38 }
 0x398   : > { %1721 = vmatpush1.bf16.msra.mxu0 %v6155_v39 }
 0x399   : > { %1722 = vmatprep.subr.bf16.mxu0 %v6160_v40 }
 0x39c   : > { %1723 = vmatpush1.bf16.msra.mxu0 %v6158_v41  ;;  %v1156_v41 = vrot.slane %v1151_v33, %v7910_v35 }
 0x39d   : > { %1724 = vmatprep.subr.bf16.mxu0 %v6163_v42 }
 0x3a0   : > { %1725 = vmatpush1.bf16.msra.mxu0 %v6161_v43 }
 0x3a1   : > { %1726 = vmatprep.subr.bf16.mxu0 %v6166_v44  ;;  %v1160_v44 = vrot.slane %v1151_v33, %v7915_v37 }
 0x3a4   : > { %1727 = vmatpush1.bf16.msra.mxu0 %v6164_v45 }
 0x3a5   : > { %1728 = vmatprep.subr.bf16.mxu0 %v6169_v46 }
 0x3a8   : > { %1729 = vmatpush1.bf16.msra.mxu0 %v6167_v47 }
 0x3a9   : > { %1730 = vmatprep.subr.bf16.mxu0 %v6172_v48 }
 0x3ac   : > { %1731 = vmatpush1.bf16.msra.mxu0 %v6170_v49 }
 0x3ad   : > { %1732 = vmatprep.subr.bf16.mxu0 %v6175_v50 }
 0x3b0   : > { %1733 = vmatpush1.bf16.msra.mxu0 %v6173_v51 }
 0x3b1   : > { %1734 = vmatprep.subr.bf16.mxu0 %v6178_v52 }
 0x3b4   : > { %1735 = vmatpush1.bf16.msra.mxu0 %v6176_v53 }
 0x3b5   : > { %1736 = vmatprep.subr.bf16.mxu0 %v6181_v54 }
 0x3b8   : > { %1737 = vmatpush1.bf16.msra.mxu0 %v6179_v55 }
 0x3b9   : > { %1749 = vmatprep.subr.bf16.mxu0 %v6184_v56 }
 0x3bb   : > { %1739 = vmatmul.mubr.bf16.vlgmr.msra.gmra.mrb[4].mxu0 %v7827_v25 }
 0x3bc   : > { %1750 = vmatpush1.bf16.msra.mxu0 %v6182_v57  ;;  %1781 = vmatprep.mubr.bf16.mxu0 %v7803_v1  ;;  %v6194_v1 = vld [vmem:[%s7764_s7 + $0xd0] ss:$24 sps:$4 sm:$0xff]  }
 0x3bd   : > { %1751 = vmatprep.subr.bf16.mxu0 %v6187_v58 }
 0x3c0   : > { %1752 = vmatpush1.bf16.msra.mxu0 %v6185_v59 }
 0x3c1   : > { %1753 = vmatprep.subr.bf16.mxu0 %v6190_v60  ;;  %v1171_v60 = vsub.s32 4, %v7902_v31 }
 0x3c4   : > { %1754 = vmatpush1.bf16.msra.mxu0 %v6188_v61  ;;  %v1175_v61 = vsub.s32 5, %v7902_v31 }
 0x3c5   : > { %1755 = vmatprep.subr.bf16.mxu0 %v6193_v62  ;;  %v1172_v62 = vrot.slane %v1151_v33, %v1171_v60 }
 0x3c8   : > { %1756 = vmatpush1.bf16.msra.mxu0 %v6191_v63  ;;  %v1176_v63 = vrot.slane %v1151_v33, %v1175_v61 }
 0x3c9   : > { %1757 = vmatprep.subr.bf16.mxu0 %v6196_v0 }
 0x3cc   : > { %1758 = vmatpush1.bf16.msra.mxu0 %v6194_v1 }
 0x3cd   : > { %1759 = vmatprep.subr.bf16.mxu0 %v6199_v2 }
 0x3d0   : > { %1760 = vmatpush1.bf16.msra.mxu0 %v6197_v3 }
 0x3d1   : > { %1761 = vmatprep.subr.bf16.mxu0 %v6202_v4 }
 0x3d4   : > { %1762 = vmatpush1.bf16.msra.mxu0 %v6200_v5 }
 0x3d5   : > { %1763 = vmatprep.subr.bf16.mxu0 %v6205_v6 }
 0x3d8   : > { %1764 = vmatpush1.bf16.msra.mxu0 %v6203_v7 }
 0x3d9   : > { %1765 = vmatprep.subr.bf16.mxu0 %v6208_v8 }
 0x3dc   : > { %1766 = vmatpush1.bf16.msra.mxu0 %v6206_v9 }
 0x3dd   : > { %1767 = vmatprep.subr.bf16.mxu0 %v6211_v10 }
 0x3e0   : > { %1768 = vmatpush1.bf16.msra.mxu0 %v6209_v11 }
 0x3e1   : > { %1769 = vmatprep.subr.bf16.mxu0 %v6214_v12 }
 0x3e4   : > { %1770 = vmatpush1.bf16.msra.mxu0 %v6212_v13 }
 0x3e5   : > { %1771 = vmatprep.subr.bf16.mxu0 %v6217_v14 }
 0x3e8   : > { %1772 = vmatpush1.bf16.msra.mxu0 %v6215_v15 }
 0x3e9   : > { %1773 = vmatprep.subr.bf16.mxu0 %v6220_v16 }
 0x3ec   : > { %1774 = vmatpush1.bf16.msra.mxu0 %v6218_v17  ;;  %v5510_v17 = vld [vmem:[#allocation6] ss:$0 sm:$0xff] }
 0x3ed   : > { %1775 = vmatprep.subr.bf16.mxu0 %v6223_v18 }
 0x3f0   : > { %1776 = vmatpush1.bf16.msra.mxu0 %v6221_v19 }
 0x3f1   : > { %1777 = vmatprep.subr.bf16.mxu0 %v6226_v20 }
 0x3f4   : > { %1778 = vmatpush1.bf16.msra.mxu0 %v6224_v21 }
 0x3f5   : > { %1779 = vmatprep.subr.bf16.mxu0 %v6229_v22 }
 0x3f8   : > { %1780 = vmatpush1.bf16.msra.mxu0 %v6227_v23 }
 0x3f9   : > { %5851 = vmatprep.subr.bf16.mxu0 %v7137_v24 }
 0x3fb   : > { %1782 = vmatmul.mubr.bf16.vlgmr.msra.gmra.mrb[8].mxu0 %v7827_v25  ;;  %v1163_v25 = vsub.s32 2, %v7902_v31 }
 0x3fc   : > { %5853 = vmatprep.mubr.msk.bf16.mxu0 %vm7138_vm0, %v7137_v24 }
 0x3fd   : > { %v1164_v34 = vrot.slane %v1151_v33, %v1163_v25 }
 0x44e   : > { %v1697_v26 = vpop.f32.mrb[0].mxu0 }
 0x44f   : > { %v1699_v27 = vpop.f32.mrb[1].mxu0  ;;  %v1698_v48 = vadd.f32 %v1697_v26, %v1156_v41 }
 0x450   : > { %v1701_v28 = vpop.f32.mrb[2].mxu0  ;;  %v1700_v49 = vadd.f32 %v1699_v27, %v1160_v44 }
 0x451   : > { %v1703_v29 = vpop.f32.mrb[3].mxu0  ;;  %v1794_v52 = vpack.c.bf16 %v1698_v48, %v1698_v48  ;;  %v1702_v56 = vadd.f32 %v1701_v28, %v1156_v41 }
 0x452   : > { %v2031_v53 = vpack.c.bf16 %v1700_v49, %v1700_v49  ;;  %v1704_v57 = vadd.f32 %v1703_v29, %v1160_v44 }
 0x453   : > { %v1795_v58 = vpack.c.bf16 %v1702_v56, %v1702_v56 }
 0x454   : > { %v2032_v59 = vpack.c.bf16 %v1704_v57, %v1704_v57 }
 0x48e   : > { %v1740_v38 = vpop.f32.mrb[4].mxu0 }
 0x48f   : > { %v1741_v39 = vadd.f32 %v1740_v38, %v1164_v34  ;;  %v1742_v40 = vpop.f32.mrb[5].mxu0  ;;  %v5511_v38 = vld [vmem:[#allocation6 + $0x1] ss:$0 sm:$0xff] }
 0x490   : > { %v1743_v42 = vadd.f32 %v1742_v40, %v1168_v36  ;;  %v1744_v43 = vpop.f32.mrb[6].mxu0 }
 0x491   : > { %v1796_v45 = vpack.c.bf16 %v1741_v39, %v1741_v39  ;;  %v1746_v46 = vpop.f32.mrb[7].mxu0  ;;  %v1745_v50 = vadd.f32 %v1744_v43, %v1164_v34 }
 0x492   : > { %v2033_v47 = vpack.c.bf16 %v1743_v42, %v1743_v42  ;;  %v1747_v51 = vadd.f32 %v1746_v46, %v1168_v36 }
 0x493   : > { %5852 = vmatpush3.bf16.xpose.msra.mxu0 %v1796_v45  ;;  %v1797_v54 = vpack.c.bf16 %v1745_v50, %v1745_v50 }
 0x494   : > { %5876 = vmatpush3.bf16.xpose.msra.mxu1 %v2033_v47  ;;  %5857 = vmatprep.subr.bf16.mxu0 %v7137_v24  ;;  %v2034_v55 = vpack.c.bf16 %v1747_v51, %v1747_v51 }
 0x495   : > { %5881 = vmatprep.subr.bf16.mxu1 %v7137_v24 }
 0x49a   : > { %5854 = vmatmul.mubr.bf16.vlgmr.msra.gmra.mrb[12].mxu0 %v1794_v52 }
 0x49b   : > { %5858 = vmatpush3.bf16.xpose.msra.mxu0 %v1797_v54  ;;  %5878 = vmatmul.mubr.bf16.vlgmr.msra.gmra.mrb[0].mxu1 %v2031_v53 }
 0x49c   : > { %5882 = vmatpush3.bf16.xpose.msra.mxu1 %v2034_v55  ;;  %5859 = vmatprep.mubr.msk.bf16.mxu0 %vm7138_vm0, %v7137_v24 }
 0x49d   : > { %5883 = vmatprep.mubr.msk.bf16.mxu1 %vm7138_vm0, %v7137_v24  ;;  %5863 = vmatprep.subr.bf16.mxu0 %v7137_v24 }
 0x49e   : > { %5887 = vmatprep.subr.bf16.mxu1 %v7137_v24 }
 0x4a2   : > { %5860 = vmatmul.mubr.bf16.vlgmr.msra.gmra.mrb[16].mxu0 %v1795_v58 }
 0x4a3   : > { %5884 = vmatmul.mubr.bf16.vlgmr.msra.gmra.mrb[4].mxu1 %v2032_v59  ;;  %5865 = vmatprep.mubr.msk.bf16.mxu0 %vm7138_vm0, %v7137_v24 }
 0x4a4   : > { %5889 = vmatprep.mubr.msk.bf16.mxu1 %vm7138_vm0, %v7137_v24 }
 0x4ce   : > { %v1783_v0 = vpop.f32.mrb[8].mxu0 }
 0x4cf   : > { %v1784_v1 = vadd.f32 %v1783_v0, %v1172_v62  ;;  %v1785_v2 = vpop.f32.mrb[9].mxu0 }
 0x4d0   : > { %v1786_v3 = vadd.f32 %v1785_v2, %v1176_v63  ;;  %v1787_v4 = vpop.f32.mrb[10].mxu0 }
 0x4d1   : > { %v1798_v5 = vpack.c.bf16 %v1784_v1, %v1784_v1  ;;  %v1788_v6 = vadd.f32 %v1787_v4, %v1172_v62  ;;  %v1789_v7 = vpop.f32.mrb[11].mxu0 }
 0x4d2   : > { %v2035_v8 = vpack.c.bf16 %v1786_v3, %v1786_v3  ;;  %v1790_v9 = vadd.f32 %v1789_v7, %v1176_v63 }
 0x4d3   : > { %v1926_v10 = vsel %vm1924_vm1, %v1798_v5, 0  ;;  %v1799_v11 = vpack.c.bf16 %v1788_v6, %v1788_v6 }
 0x4d4   : > { %v2149_v12 = vsel %vm1924_vm1, %v2035_v8, 0  ;;  %v2036_v13 = vpack.c.bf16 %v1790_v9, %v1790_v9  ;;  %5864 = vmatpush3.bf16.msra.mxu0 %v1926_v10 }
 0x4d5   : > { %v7940_v14 = vsel %vm1924_vm1, %v1799_v11, 0  ;;  %5888 = vmatpush3.bf16.msra.mxu1 %v2149_v12  ;;  %5869 = vmatprep.subr.bf16.mxu0 %v7137_v24 }
 0x4d6   : > { %v7944_v15 = vsel %vm1924_vm1, %v2036_v13, 0  ;;  %5893 = vmatprep.subr.bf16.mxu1 %v7137_v24 }
 0x56d   : > { %v1834_v16 = vpop.f32.mrb[12].mxu0 }
 0x56e   : > { %v1880_v18 = vmul.f32 0.088388346, %v1834_v16  ;;  %v5855_v19 = vpop.f32.mrb[13].mxu0  ;;  %v2071_v20 = vpop.f32.mrb[0].mxu1 }
 0x56f   : > { %v2117_v21 = vmul.f32 0.088388346, %v2071_v20  ;;  %v1837_v22 = vpop.f32.mrb[14].mxu0  ;;  %v5879_v23 = vpop.f32.mrb[1].mxu1 }
 0x570   : > { %v5856_v26 = vpop.f32.mrb[15].mxu0  ;;  %v2074_v27 = vpop.f32.mrb[2].mxu1  ;;  %v1894_v28 = vadd.f32 %v5510_v17, %v1880_v18  ;;  %v6232_v22 = vld [vmem:[%s7774_s19 + $0x84] ss:$8 sps:$4 sm:$0xff]  }
 0x571   : > { %v5880_v29 = vpop.f32.mrb[3].mxu1  ;;  %v2119_v30 = vadd.f32 %v5510_v17, %v2117_v21 }
 0x572   : > { %v1897_v33 = vsel %vm1896_vm2, %v1894_v28, -inf  ;;  %v6230_v29 = vld [vmem:[%s7774_s19 + $0x80] ss:$8 sps:$4 sm:$0xff]  }
 0x573   : > { %1898 = vmax.xlane.f32.xlu1 %v1897_v33  ;;  %v2121_v34 = vsel %vm1896_vm2, %v2119_v30, -inf  ;;  %v6235_v33 = vld [vmem:[%s7774_s19 + $0x94] ss:$8 sps:$4 sm:$0xff]  }
 0x574   : > { %2122 = vmax.xlane.f32.xlu0 %v2121_v34  ;;  %v6236_v34 = vld [vmem:[%s7774_s19 + $0xa0] ss:$8 sps:$4 sm:$0xff]  }
 0x575   : > { %v1874_v36 = vpop.f32.mrb[16].mxu0 }
 0x576   : > { %v1881_v39 = vmul.f32 0.088388346, %v1874_v36  ;;  %v5861_v40 = vpop.f32.mrb[17].mxu0  ;;  %v2111_v41 = vpop.f32.mrb[4].mxu1  ;;  %v6241_v36 = vld [vmem:[%s7774_s19 + $0xb4] ss:$8 sps:$4 sm:$0xff]  }
 0x577   : > { %v2118_v42 = vmul.f32 0.088388346, %v2111_v41  ;;  %v1877_v43 = vpop.f32.mrb[18].mxu0  ;;  %v5885_v44 = vpop.f32.mrb[5].mxu1  ;;  %v6242_v40 = vld [vmem:[%s7774_s19 + $0xc0] ss:$8 sps:$4 sm:$0xff]  }
 0x578   : > { %v5862_v45 = vpop.f32.mrb[19].mxu0  ;;  %v2114_v46 = vpop.f32.mrb[6].mxu1  ;;  %v1895_v47 = vadd.f32 %v5511_v38, %v1881_v39  ;;  %v6244_v39 = vld [vmem:[%s7774_s19 + $0xc4] ss:$8 sps:$4 sm:$0xff]   ;;  %v6247_v41 = vld [vmem:[%s7774_s19 + $0xd4] ss:$8 sps:$4 sm:$0xff]  }
 0x579   : > { %v5886_v48 = vpop.f32.mrb[7].mxu1  ;;  %v2120_v49 = vadd.f32 %v5511_v38, %v2118_v42  ;;  %v6239_v38 = vld [vmem:[%s7774_s19 + $0xb0] ss:$8 sps:$4 sm:$0xff]   ;;  %v6250_v43 = vld [vmem:[%s7774_s19 + $0xe4] ss:$8 sps:$4 sm:$0xff]  }
 0x57a   : > { %v1900_v50 = vsel %vm1896_vm2, %v1895_v47, -inf  ;;  %v6245_v42 = vld [vmem:[%s7774_s19 + $0xd0] ss:$8 sps:$4 sm:$0xff]   ;;  %v6248_v44 = vld [vmem:[%s7774_s19 + $0xe0] ss:$8 sps:$4 sm:$0xff]   ;;  %v7139_v48 = vmov 0  }
 0x57b   : > { %1901 = vmax.xlane.f32.xlu1 %v1900_v50  ;;  %v2124_v51 = vsel %vm1896_vm2, %v2120_v49, -inf  ;;  %v6253_v45 = vld [vmem:[%s7774_s19 + $0xf4] ss:$8 sps:$4 sm:$0xff]   ;;  %v6251_v46 = vld [vmem:[%s7774_s19 + $0xf0] ss:$8 sps:$4 sm:$0xff]  }
 0x57c   : > { %2125 = vmax.xlane.f32.xlu0 %v2124_v51 }
 0x600   : > { %v1899_v52 = vpop.xlane.xlu1 %1898 }
 0x601   : > { %v1903_v53 = vsub.f32 %v1894_v28, %v1899_v52  ;;  %v2123_v54 = vpop.xlane.xlu0 %2122 }
 0x602   : > { %v2127_v55 = vsub.f32 %v2119_v30, %v2123_v54 }
 0x603   : > { %v1905_v56 = vmul.f32 1.442695, %v1903_v53 }
 0x604   : > { %v2129_v57 = vmul.f32 1.442695, %v2127_v55 }
 0x606   : > { %6470 = vpow2.f32 %v2129_v57 }
 0x607   : > { %6472 = vpow2.f32 %v1905_v56 }
 0x608   : > { %v1902_v58 = vpop.xlane.xlu1 %1901 }
 0x609   : > { %v1904_v59 = vsub.f32 %v1895_v47, %v1902_v58  ;;  %v2126_v62 = vpop.xlane.xlu0 %2125  ;;  %v6256_v47 = vld [vmem:[%s7774_s19 + $0x4] ss:$8 sps:$4 sm:$0xff]   ;;  %v6254_v58 = vld [vmem:[%s7774_s19] ss:$8 sps:$4 sm:$0xff]  }
 0x60a   : > { %v2128_v63 = vsub.f32 %v2120_v49, %v2126_v62 }
 0x60b   : > { %v1907_v0 = vmul.f32 1.442695, %v1904_v59 }
 0x60c   : > { %v2131_v1 = vmul.f32 1.442695, %v2128_v63  ;;  %v6259_v63 = vld [vmem:[%s7774_s19 + $0x14] ss:$8 sps:$4 sm:$0xff]  }
 0x60e   : > { %6474 = vpow2.f32 %v2131_v1 }
 0x60f   : > { %6476 = vpow2.f32 %v1907_v0 }
 0x610   : > { %v6471_v2 = vpop.eup %6470 }
 0x611   : > { %v2133_v3 = vsel %vm1896_vm2, %v6471_v2, 0.0  ;;  %v6473_v4 = vpop.eup %6472 }
 0x612   : > { %2134 = vadd.xlane.f32.xlu0 %v2133_v3  ;;  %v1909_v5 = vsel %vm1896_vm2, %v6473_v4, 0.0  ;;  %v6257_v3 = vld [vmem:[%s7774_s19 + $0x10] ss:$8 sps:$4 sm:$0xff]  }
 0x616   : > { %1910 = vadd.xlane.f32.xlu0 %v1909_v5 }
 0x618   : > { %v6475_v6 = vpop.eup %6474 }
 0x619   : > { %v2136_v7 = vsel %vm1896_vm2, %v6475_v6, 0.0  ;;  %v6477_v8 = vpop.eup %6476 }
 0x61a   : > { %2137 = vadd.xlane.f32.xlu1 %v2136_v7  ;;  %v1912_v9 = vsel %vm1896_vm2, %v6477_v8, 0.0 }
 0x61e   : > { %1913 = vadd.xlane.f32.xlu1 %v1912_v9  ;;  %v6260_v9 = vld [vmem:[%s7774_s19 + $0x20] ss:$8 sps:$4 sm:$0xff]  }
 0x69f   : > { %v2135_v10 = vpop.xlane.xlu0 %2134 }
 0x6a0   : > { %6478 = vrcp.f32 %v2135_v10  ;;  %v6265_v10 = vld [vmem:[%s7774_s19 + $0x34] ss:$8 sps:$4 sm:$0xff]  }
 0x6a3   : > { %v1911_v11 = vpop.xlane.xlu0 %1910 }
 0x6a4   : > { %6480 = vrcp.f32 %v1911_v11  ;;  %v6263_v11 = vld [vmem:[%s7774_s19 + $0x30] ss:$8 sps:$4 sm:$0xff]  }
 0x6a7   : > { %v2138_v12 = vpop.xlane.xlu1 %2137 }
 0x6a8   : > { %6482 = vrcp.f32 %v2138_v12  ;;  %v6268_v12 = vld [vmem:[%s7774_s19 + $0x44] ss:$8 sps:$4 sm:$0xff]  }
 0x6aa   : > { %v6479_v13 = vpop.eup %6478 }
 0x6ab   : > { %v2141_v16 = vmul.f32 %v6479_v13, %v6471_v2  ;;  %v1914_v17 = vpop.xlane.xlu1 %1913  ;;  %v6266_v13 = vld [vmem:[%s7774_s19 + $0x40] ss:$8 sps:$4 sm:$0xff]  }
 0x6ac   : > { %6484 = vrcp.f32 %v1914_v17  ;;  %v6269_v17 = vld [vmem:[%s7774_s19 + $0x50] ss:$8 sps:$4 sm:$0xff]  }
 0x6ad   : > { %v2143_v18 = vpack.c.bf16 %v2141_v16, %v2141_v16  ;;  %v6271_v16 = vld [vmem:[%s7774_s19 + $0x54] ss:$8 sps:$4 sm:$0xff]  }
 0x6ae   : > { %v6481_v19 = vpop.eup %6480 }
 0x6af   : > { %v1917_v20 = vmul.f32 %v6481_v19, %v6473_v4  ;;  %5890 = vmatmul.mubr.msk.bf16.vlgmr.msra.gmra.mrb[8].mxu1 %vm1896_vm2, %v2143_v18  ;;  %v6274_v18 = vld [vmem:[%s7774_s19 + $0x64] ss:$8 sps:$4 sm:$0xff]   ;;  %v6272_v19 = vld [vmem:[%s7774_s19 + $0x60] ss:$8 sps:$4 sm:$0xff]  }
 0x6b0   : > { %5894 = vmatpush3.bf16.msra.mxu1 %v7944_v15  ;;  %5895 = vmatprep.mubr.msk.bf16.mxu1 %vm7138_vm0, %v7137_v24 }
 0x6b1   : > { %v1919_v21 = vpack.c.bf16 %v1917_v20, %v1917_v20  ;;  %v6277_v20 = vld [vmem:[%s7774_s19 + $0x74] ss:$8 sps:$4 sm:$0xff]  }
 0x6b2   : > { %v6483_v23 = vpop.eup %6482 }
 0x6b3   : > { %v2142_v26 = vmul.f32 %v6483_v23, %v6475_v6  ;;  %5866 = vmatmul.mubr.msk.bf16.vlgmr.msra.gmra.mrb[20].mxu0 %vm1896_vm2, %v1919_v21  ;;  %v6262_v6 = vld [vmem:[%s7774_s19 + $0x24] ss:$8 sps:$4 sm:$0xff]   ;;  %v6275_v21 = vld [vmem:[%s7774_s19 + $0x70] ss:$8 sps:$4 sm:$0xff]  }
 0x6b4   : > { %5870 = vmatpush3.bf16.msra.mxu0 %v7940_v14  ;;  %5871 = vmatprep.mubr.msk.bf16.mxu0 %vm7138_vm0, %v7137_v24  ;;  %v6233_v14 = vld [vmem:[%s7774_s19 + $0x90] ss:$8 sps:$4 sm:$0xff]   ;;  %v6238_v24 = vld [vmem:[%s7774_s19 + $0xa4] ss:$8 sps:$4 sm:$0xff]  }
 0x6b5   : > { %v2144_v27 = vpack.c.bf16 %v2142_v26, %v2142_v26  ;;  %2335 = vmatprep.subr.bf16.mxu0 %v6232_v22  ;;  %v2501_v22 = vld [vmem:[%s800_s23] sm:$0x3] }
 0x6b6   : > { %v6485_v15 = vpop.eup %6484  ;;  %v2506_v23 = vrot.slane %v2501_v22, %v7910_v35  ;;  %v2510_v26 = vrot.slane %v2501_v22, %v7915_v37 }
 0x6b7   : > { %v1918_v28 = vmul.f32 %v6485_v15, %v6477_v8  ;;  %5896 = vmatmul.mubr.msk.bf16.vlgmr.msra.gmra.mrb[12].mxu1 %vm1896_vm2, %v2144_v27 }
 0x6b9   : > { %v1920_v30 = vpack.c.bf16 %v1918_v28, %v1918_v28 }
 0x6bb   : > { %5872 = vmatmul.mubr.msk.bf16.vlgmr.msra.gmra.mrb[24].mxu0 %vm1896_vm2, %v1920_v30 }
 0x6bc   : > { %2336 = vmatpush1.bf16.msra.mxu0 %v6230_v29  ;;  %2367 = vmatprep.mubr.bf16.mxu0 %v7139_v48 }
 0x6bd   : > { %2337 = vmatprep.subr.bf16.mxu0 %v6235_v33  ;;  %v6558_v33 = vld [vmem:[#allocation2] sm:$0xff] }
 0x6c0   : > { %2338 = vmatpush1.bf16.msra.mxu0 %v6233_v14 }
 0x6c1   : > { %2339 = vmatprep.subr.bf16.mxu0 %v6238_v24 }
 0x6c4   : > { %2340 = vmatpush1.bf16.msra.mxu0 %v6236_v34 }
 0x6c5   : > { %2341 = vmatprep.subr.bf16.mxu0 %v6241_v36  ;;  %v6559_v36 = vld [vmem:[#allocation2 + $0x8] sm:$0xff] }
 0x6c8   : > { %2342 = vmatpush1.bf16.msra.mxu0 %v6239_v38 }
 0x6c9   : > { %2343 = vmatprep.subr.bf16.mxu0 %v6244_v39 }
 0x6cc   : > { %2344 = vmatpush1.bf16.msra.mxu0 %v6242_v40  ;;  %v6560_v40 = vld [vmem:[#allocation2 + $0x10] sm:$0xff] }
 0x6cd   : > { %2345 = vmatprep.subr.bf16.mxu0 %v6247_v41 }
 0x6d0   : > { %2346 = vmatpush1.bf16.msra.mxu0 %v6245_v42  ;;  %v6561_v42 = vld [vmem:[#allocation2 + $0x18] sm:$0xff] }
 0x6d1   : > { %2347 = vmatprep.subr.bf16.mxu0 %v6250_v43 }
 0x6d4   : > { %2348 = vmatpush1.bf16.msra.mxu0 %v6248_v44 }
 0x6d5   : > { %2349 = vmatprep.subr.bf16.mxu0 %v6253_v45 }
 0x6d8   : > { %2350 = vmatpush1.bf16.msra.mxu0 %v6251_v46  ;;  %v2588_v46 = vld [vmem:[%s7779_s5] sm:$0xff] }
 0x6d9   : > { %2458 = vmatprep.subr.bf16.mxu0 %v6256_v47  ;;  %v2592_v47 = vld [vmem:[%s7779_s5 + $0x20] sm:$0xff] }
 0x782   : > { %v2185_v49 = vpop.f32.mrb[8].mxu1 }
 0x783   : > { %v5891_v50 = vpop.f32.mrb[9].mxu1 }
 0x784   : > { %v2188_v51 = vpop.f32.mrb[10].mxu1  ;;  %v5565_v50 = vcombine.high %v2588_v46, %v2592_v47 }
 0x785   : > { %v5892_v52 = vpop.f32.mrb[11].mxu1  ;;  %v2593_v51 = vld [vmem:[%s7779_s5 + $0x28] sm:$0xff] }
 0x786   : > { %v1962_v53 = vpop.f32.mrb[20].mxu0  ;;  %v2596_v52 = vld [vmem:[%s7779_s5 + $0x40] sm:$0xff]  ;;  %3398 = vmatprep.subr.bf16.mxu1 %v5565_v50  ;;  %v2649_v50 = vld [vmem:[%s7779_s5 + $0x1e8] sm:$0xff] }
 0x787   : > { %v5867_v54 = vpop.f32.mrb[21].mxu0 }
 0x788   : > { %v1965_v55 = vpop.f32.mrb[22].mxu0 }
 0x789   : > { %v5868_v56 = vpop.f32.mrb[23].mxu0 }
 0x78a   : > { %v2231_v57 = vpop.f32.mrb[12].mxu1 }
 0x78b   : > { %v2237_v59 = vpack.c.bf16 %v2231_v57, %v2185_v49  ;;  %v5897_v62 = vpop.f32.mrb[13].mxu1  ;;  %v5564_v49 = vcombine.low %v2588_v46, %v2592_v47  ;;  %v2597_v57 = vld [vmem:[%s7779_s5 + $0x48] sm:$0xff]  ;;  %v2644_v47 = vld [vmem:[%s7779_s5 + $0x1c0] sm:$0xff] }
 0x78c   : > { %v2234_v0 = vpop.f32.mrb[14].mxu1 }
 0x78d   : > { %v5898_v1 = vpop.f32.mrb[15].mxu1  ;;  %2368 = vmatmul.mubr.bf16.vlgmr.msra.gmra.mrb[28].mxu0 %v2237_v59  ;;  %v2604_v59 = vld [vmem:[%s7779_s5 + $0x80] sm:$0xff]  ;;  %v2605_v0 = vld [vmem:[%s7779_s5 + $0x88] sm:$0xff]  ;;  %3399 = vmatpush1.bf16.msra.mxu1 %v5564_v49 }
 0x78e   : > { %2459 = vmatpush1.bf16.msra.mxu0 %v6254_v58  ;;  %v2008_v2 = vpop.f32.mrb[24].mxu0  ;;  %2490 = vmatprep.mubr.bf16.mxu0 %v7139_v48  ;;  %v2589_v48 = vld [vmem:[%s7779_s5 + $0x8] sm:$0xff] }
 0x78f   : > { %v2014_v4 = vpack.c.bf16 %v2008_v2, %v1962_v53  ;;  %v5873_v5 = vpop.f32.mrb[25].mxu0  ;;  %2460 = vmatprep.subr.bf16.mxu0 %v6259_v63  ;;  %v2600_v53 = vld [vmem:[%s7779_s5 + $0x60] sm:$0xff]  ;;  %v5566_v54 = vcombine.low %v2589_v48, %v2593_v51  ;;  %v5567_v55 = vcombine.high %v2589_v48, %v2593_v51  ;;  %v2601_v58 = vld [vmem:[%s7779_s5 + $0x68] sm:$0xff] }
 0x790   : > { %v2011_v7 = vpop.f32.mrb[26].mxu0  ;;  %v5573_v56 = vcombine.high %v2596_v52, %v2600_v53  ;;  %v5575_v62 = vcombine.high %v2597_v57, %v2601_v58  ;;  %v2608_v63 = vld [vmem:[%s7779_s5 + $0xa0] sm:$0xff]  ;;  %v2609_v1 = vld [vmem:[%s7779_s5 + $0xa8] sm:$0xff]  ;;  %v5572_v2 = vcombine.low %v2596_v52, %v2600_v53 }
 0x791   : > { %v5874_v8 = vpop.f32.mrb[27].mxu0  ;;  %v5583_v5 = vcombine.high %v2605_v0, %v2609_v1  ;;  %v2616_v7 = vld [vmem:[%s7779_s5 + $0xe0] sm:$0xff]  ;;  %v2645_v49 = vld [vmem:[%s7779_s5 + $0x1c8] sm:$0xff] }
 0x792   : > { %2461 = vmatpush1.bf16.msra.mxu0 %v6257_v3  ;;  %3400 = vmatprep.subr.bf16.mxu1 %v5573_v56  ;;  %v5574_v3 = vcombine.low %v2597_v57, %v2601_v58  ;;  %v2613_v8 = vld [vmem:[%s7779_s5 + $0xc8] sm:$0xff]  ;;  %v2648_v48 = vld [vmem:[%s7779_s5 + $0x1e0] sm:$0xff] }
 0x793   : > { %2462 = vmatprep.subr.bf16.mxu0 %v6262_v6  ;;  %v2612_v6 = vld [vmem:[%s7779_s5 + $0xc0] sm:$0xff]  ;;  %3401 = vmatpush1.bf16.msra.mxu1 %v5572_v2  ;;  %v5621_v53 = vcombine.high %v2644_v47, %v2648_v48  ;;  %v2653_v57 = vld [vmem:[%s7779_s5 + $0x208] sm:$0xff] }
 0x794   : > { %v2656_v56 = vld [vmem:[%s7779_s5 + $0x220] sm:$0xff]  ;;  %v2657_v58 = vld [vmem:[%s7779_s5 + $0x228] sm:$0xff] }
 0x795   : > { %v2664_v2 = vld [vmem:[%s7779_s5 + $0x260] sm:$0xff] }
 0x796   : > { %2463 = vmatpush1.bf16.msra.mxu0 %v6260_v9  ;;  %v2617_v9 = vld [vmem:[%s7779_s5 + $0xe8] sm:$0xff] }
 0x797   : > { %2464 = vmatprep.subr.bf16.mxu0 %v6265_v10  ;;  %v5580_v10 = vcombine.low %v2604_v59, %v2608_v63 }
 0x79a   : > { %2465 = vmatpush1.bf16.msra.mxu0 %v6263_v11  ;;  %v5582_v11 = vcombine.low %v2605_v0, %v2609_v1  ;;  %v5631_v0 = vcombine.high %v2653_v57, %v2657_v58  ;;  %v2660_v1 = vld [vmem:[%s7779_s5 + $0x240] sm:$0xff] }
 0x79b   : > { %2466 = vmatprep.subr.bf16.mxu0 %v6268_v12  ;;  %v5589_v12 = vcombine.high %v2612_v6, %v2616_v7 }
 0x79e   : > { %2467 = vmatpush1.bf16.msra.mxu0 %v6266_v13  ;;  %v5591_v13 = vcombine.high %v2613_v8, %v2617_v9 }
 0x79f   : > { %2468 = vmatprep.subr.bf16.mxu0 %v6271_v16  ;;  %v2620_v16 = vld [vmem:[%s7779_s5 + $0x100] sm:$0xff] }
 0x7a2   : > { %2469 = vmatpush1.bf16.msra.mxu0 %v6269_v17  ;;  %v2624_v17 = vld [vmem:[%s7779_s5 + $0x120] sm:$0xff] }
 0x7a3   : > { %2470 = vmatprep.subr.bf16.mxu0 %v6274_v18  ;;  %v2621_v18 = vld [vmem:[%s7779_s5 + $0x108] sm:$0xff]  ;;  %v5597_v22 = vcombine.high %v2620_v16, %v2624_v17 }
 0x7a6   : > { %2471 = vmatpush1.bf16.msra.mxu0 %v6272_v19  ;;  %v2625_v19 = vld [vmem:[%s7779_s5 + $0x128] sm:$0xff] }
 0x7a7   : > { %2472 = vmatprep.subr.bf16.mxu0 %v6277_v20  ;;  %v5588_v20 = vcombine.low %v2612_v6, %v2616_v7  ;;  %v5630_v6 = vcombine.low %v2653_v57, %v2657_v58  ;;  %v5637_v7 = vcombine.high %v2660_v1, %v2664_v2  ;;  %v2697_v58 = vld [vmem:[%s7779_s5 + $0x368] sm:$0xff] }
 0x7aa   : > { %2473 = vmatpush1.bf16.msra.mxu0 %v6275_v21  ;;  %v5590_v21 = vcombine.low %v2613_v8, %v2617_v9  ;;  %v5636_v9 = vcombine.low %v2660_v1, %v2664_v2  ;;  %v2704_v1 = vld [vmem:[%s7779_s5 + $0x3a0] sm:$0xff]  ;;  %v2701_v2 = vld [vmem:[%s7779_s5 + $0x388] sm:$0xff] }
 0x7ab   : > { %3441 = vmatprep.subr.bf16.mxu0 %v5567_v55  ;;  %v2652_v55 = vld [vmem:[%s7779_s5 + $0x200] sm:$0xff] }
 0x7ad   : > { %2491 = vmatmul.mubr.bf16.vlgmr.msra.gmra.mrb[28].mxu0 %v2014_v4  ;;  %v5581_v4 = vcombine.high %v2604_v59, %v2608_v63  ;;  %v5620_v59 = vcombine.low %v2644_v47, %v2648_v48  ;;  %v5629_v63 = vcombine.high %v2652_v55, %v2656_v56  ;;  %v2688_v47 = vld [vmem:[%s7779_s5 + $0x320] sm:$0xff]  ;;  %v2685_v48 = vld [vmem:[%s7779_s5 + $0x308] sm:$0xff] }
 0x7ae   : > { %3442 = vmatpush1.bf16.msra.mxu0 %v5566_v54  ;;  %v5623_v54 = vcombine.high %v2645_v49, %v2649_v50 }
 0x7af   : > { %3443 = vmatprep.subr.bf16.mxu0 %v5575_v62  ;;  %3402 = vmatprep.subr.bf16.mxu1 %v5581_v4  ;;  %v5622_v62 = vcombine.low %v2645_v49, %v2649_v50  ;;  %v2665_v4 = vld [vmem:[%s7779_s5 + $0x268] sm:$0xff] }
 0x7b0   : > { %3403 = vmatpush1.bf16.msra.mxu1 %v5580_v10  ;;  %v2689_v50 = vld [vmem:[%s7779_s5 + $0x328] sm:$0xff] }
 0x7b1   : > { %3404 = vmatprep.subr.bf16.mxu1 %v5589_v12 }
 0x7b2   : > { %3444 = vmatpush1.bf16.msra.mxu0 %v5574_v3  ;;  %v2661_v3 = vld [vmem:[%s7779_s5 + $0x248] sm:$0xff] }
 0x7b3   : > { %3445 = vmatprep.subr.bf16.mxu0 %v5583_v5  ;;  %v5628_v5 = vcombine.low %v2652_v55, %v2656_v56  ;;  %v5639_v8 = vcombine.high %v2661_v3, %v2665_v4  ;;  %v5638_v10 = vcombine.low %v2661_v3, %v2665_v4  ;;  %v2696_v55 = vld [vmem:[%s7779_s5 + $0x360] sm:$0xff]  ;;  %v2693_v56 = vld [vmem:[%s7779_s5 + $0x348] sm:$0xff] }
 0x7b4   : > { %3405 = vmatpush1.bf16.msra.mxu1 %v5588_v20  ;;  %v2705_v4 = vld [vmem:[%s7779_s5 + $0x3a8] sm:$0xff] }
 0x7b5   : > { %3406 = vmatprep.subr.bf16.mxu1 %v5597_v22 }
 0x7b6   : > { %3446 = vmatpush1.bf16.msra.mxu0 %v5582_v11 }
 0x7b7   : > { %3447 = vmatprep.subr.bf16.mxu0 %v5591_v13 }
 0x7ba   : > { %3448 = vmatpush1.bf16.msra.mxu0 %v5590_v21 }
 0x880   : > { %v2492_v27 = vpop.f32.mrb[28].mxu0 }
 0x881   : > { %v2513_v15 = vadd.f32 %v2506_v23, %v2492_v27  ;;  %v2494_v28 = vpop.f32.mrb[29].mxu0  ;;  %v2632_v27 = vld [vmem:[%s7779_s5 + $0x160] sm:$0xff] }
 0x882   : > { %v2514_v29 = vadd.f32 %v2510_v26, %v2494_v28  ;;  %v2496_v30 = vpop.f32.mrb[30].mxu0  ;;  %v2633_v28 = vld [vmem:[%s7779_s5 + $0x168] sm:$0xff] }
 0x883   : > { %v8001_v14 = vadd.f32 %v6558_v33, %v2513_v15  ;;  %v2515_v24 = vadd.f32 %v2506_v23, %v2496_v30  ;;  %v2498_v34 = vpop.f32.mrb[31].mxu0  ;;  %v5599_v23 = vcombine.high %v2621_v18, %v2625_v19  ;;  %v2629_v15 = vld [vmem:[%s7779_s5 + $0x148] sm:$0xff]  ;;  %v5598_v30 = vcombine.low %v2621_v18, %v2625_v19 }
 0x884   : > { %v8003_v38 = vadd.f32 %v6559_v36, %v2514_v29  ;;  %v2516_v39 = vadd.f32 %v2510_v26, %v2498_v34  ;;  %v2628_v26 = vld [vmem:[%s7779_s5 + $0x140] sm:$0xff]  ;;  %v5596_v29 = vcombine.low %v2620_v16, %v2624_v17 }
 0x885   : > { %v8005_v41 = vadd.f32 %v6560_v40, %v2515_v24  ;;  %v5605_v33 = vcombine.high %v2628_v26, %v2632_v27  ;;  %3449 = vmatprep.subr.bf16.mxu0 %v5599_v23  ;;  %v5607_v24 = vcombine.high %v2629_v15, %v2633_v28  ;;  %v2636_v34 = vld [vmem:[%s7779_s5 + $0x180] sm:$0xff]  ;;  %v2641_v40 = vld [vmem:[%s7779_s5 + $0x1a8] sm:$0xff] }
 0x886   : > { %v8007_v43 = vadd.f32 %v6561_v42, %v2516_v39  ;;  %v2523_v44 = vadd.f32 %v8003_v38, %v8001_v14  ;;  %v2640_v36 = vld [vmem:[%s7779_s5 + $0x1a0] sm:$0xff]  ;;  %v2637_v39 = vld [vmem:[%s7779_s5 + $0x188] sm:$0xff]  ;;  %3407 = vmatpush1.bf16.msra.mxu1 %v5596_v29  ;;  %v5604_v42 = vcombine.low %v2628_v26, %v2632_v27  ;;  %3450 = vmatpush1.bf16.msra.mxu0 %v5598_v30 }
 0x887   : > { %3408 = vmatprep.subr.bf16.mxu1 %v5605_v33  ;;  %3451 = vmatprep.subr.bf16.mxu0 %v5607_v24  ;;  %v5615_v46 = vcombine.high %v2637_v39, %v2641_v40  ;;  %v5612_v51 = vcombine.low %v2636_v34, %v2640_v36  ;;  %v5614_v52 = vcombine.low %v2637_v39, %v2641_v40  ;;  %v2672_v26 = vld [vmem:[%s7779_s5 + $0x2a0] sm:$0xff]  ;;  %v2669_v27 = vld [vmem:[%s7779_s5 + $0x288] sm:$0xff] }
 0x888   : > { %2524 = vadd.xlane.f32.xlu0 %v2523_v44  ;;  %v2526_v45 = vadd.f32 %v8007_v43, %v8005_v41  ;;  %v5606_v44 = vcombine.low %v2629_v15, %v2633_v28  ;;  %v2673_v28 = vld [vmem:[%s7779_s5 + $0x2a8] sm:$0xff]  ;;  %v2676_v24 = vld [vmem:[%s7779_s5 + $0x2c0] sm:$0xff] }
 0x889   : > { %v5646_v30 = vcombine.low %v2669_v27, %v2673_v28  ;;  %v5647_v33 = vcombine.high %v2669_v27, %v2673_v28  ;;  %v2681_v40 = vld [vmem:[%s7779_s5 + $0x2e8] sm:$0xff] }
 0x88a   : > { %2527 = vadd.xlane.f32.xlu1 %v2526_v45  ;;  %v5613_v45 = vcombine.high %v2636_v34, %v2640_v36  ;;  %3409 = vmatpush1.bf16.msra.mxu1 %v5604_v42  ;;  %v2680_v34 = vld [vmem:[%s7779_s5 + $0x2e0] sm:$0xff]  ;;  %v2677_v36 = vld [vmem:[%s7779_s5 + $0x2c8] sm:$0xff] }
 0x88b   : > { %3452 = vmatpush1.bf16.msra.mxu0 %v5606_v44  ;;  %v5653_v39 = vcombine.high %v2676_v24, %v2680_v34  ;;  %v5652_v42 = vcombine.low %v2676_v24, %v2680_v34  ;;  %v5654_v44 = vcombine.low %v2677_v36, %v2681_v40  ;;  %v2521_v34 = vld [vmem:[%s809_s24] sm:$0x3] }
 0x88c   : > { %3410 = vmatprep.subr.bf16.mxu1 %v5613_v45  ;;  %3453 = vmatprep.subr.bf16.mxu0 %v5615_v46  ;;  %v5655_v45 = vcombine.high %v2677_v36, %v2681_v40  ;;  %v2684_v46 = vld [vmem:[%s7779_s5 + $0x300] sm:$0xff]  ;;  %v2522_v36 = vld [vmem:[%s818_s30] sm:$0x3]  ;;  %v2560_v40 = vrot.slane %v2521_v34, %v7910_v35 }
 0x88d   : > { %v5661_v49 = vcombine.high %v2684_v46, %v2688_v47 }
 0x88e   : > { %3411 = vmatpush1.bf16.msra.mxu1 %v5612_v51  ;;  %v5660_v51 = vcombine.low %v2684_v46, %v2688_v47  ;;  %v2579_v47 = vrot.slane %v2522_v36, %v7915_v37 }
 0x88f   : > { %3454 = vmatpush1.bf16.msra.mxu0 %v5614_v52  ;;  %3412 = vmatprep.subr.bf16.mxu1 %v5621_v53  ;;  %v5662_v52 = vcombine.low %v2685_v48, %v2689_v50  ;;  %v5663_v53 = vcombine.high %v2685_v48, %v2689_v50  ;;  %v2575_v48 = vrot.slane %v2522_v36, %v7910_v35 }
 0x890   : > { %3455 = vmatprep.subr.bf16.mxu0 %v5623_v54  ;;  %v2692_v54 = vld [vmem:[%s7779_s5 + $0x340] sm:$0xff] }
 0x891   : > { %v5669_v57 = vcombine.high %v2692_v54, %v2696_v55 }
 0x892   : > { %3413 = vmatpush1.bf16.msra.mxu1 %v5620_v59  ;;  %v5668_v59 = vcombine.low %v2692_v54, %v2696_v55 }
 0x893   : > { %3456 = vmatpush1.bf16.msra.mxu0 %v5622_v62  ;;  %3414 = vmatprep.subr.bf16.mxu1 %v5629_v63  ;;  %v5670_v62 = vcombine.low %v2693_v56, %v2697_v58  ;;  %v5671_v63 = vcombine.high %v2693_v56, %v2697_v58  ;;  %v2599_v58 = vld [vmem:[%s7779_s5 + $0x58] sm:$0xff] }
 0x894   : > { %3457 = vmatprep.subr.bf16.mxu0 %v5631_v0  ;;  %v2700_v0 = vld [vmem:[%s7779_s5 + $0x380] sm:$0xff] }
 0x895   : > { %v5677_v3 = vcombine.high %v2700_v0, %v2704_v1 }
 0x896   : > { %3415 = vmatpush1.bf16.msra.mxu1 %v5628_v5  ;;  %v5676_v5 = vcombine.low %v2700_v0, %v2704_v1 }
 0x897   : > { %3458 = vmatpush1.bf16.msra.mxu0 %v5630_v6  ;;  %3416 = vmatprep.subr.bf16.mxu1 %v5637_v7  ;;  %v5678_v6 = vcombine.low %v2701_v2, %v2705_v4  ;;  %v5679_v7 = vcombine.high %v2701_v2, %v2705_v4  ;;  %v2610_v2 = vld [vmem:[%s7779_s5 + $0xb0] sm:$0xff]  ;;  %v2611_v4 = vld [vmem:[%s7779_s5 + $0xb8] sm:$0xff] }
 0x898   : > { %3459 = vmatprep.subr.bf16.mxu0 %v5639_v8  ;;  %v2708_v8 = vld [vmem:[%s7779_s5 + $0x3c0] sm:$0xff] }
 0x89a   : > { %3417 = vmatpush1.bf16.msra.mxu1 %v5636_v9  ;;  %v2712_v9 = vld [vmem:[%s7779_s5 + $0x3e0] sm:$0xff] }
 0x89b   : > { %3460 = vmatpush1.bf16.msra.mxu0 %v5638_v10  ;;  %v2709_v10 = vld [vmem:[%s7779_s5 + $0x3c8] sm:$0xff] }
 0x89c   : > { %3461 = vmatprep.subr.bf16.mxu0 %v5647_v33 }
 0x89f   : > { %3462 = vmatpush1.bf16.msra.mxu0 %v5646_v30 }
 0x8a0   : > { %3463 = vmatprep.subr.bf16.mxu0 %v5655_v45 }
 0x8a3   : > { %3464 = vmatpush1.bf16.msra.mxu0 %v5654_v44 }
 0x8a4   : > { %3465 = vmatprep.subr.bf16.mxu0 %v5663_v53 }
 0x8a7   : > { %3466 = vmatpush1.bf16.msra.mxu0 %v5662_v52 }
 0x8a8   : > { %3467 = vmatprep.subr.bf16.mxu0 %v5671_v63  ;;  %v2606_v63 = vld [vmem:[%s7779_s5 + $0x90] sm:$0xff] }
 0x8ab   : > { %3468 = vmatpush1.bf16.msra.mxu0 %v5670_v62 }
 0x8ac   : > { %3469 = vmatprep.subr.bf16.mxu0 %v5679_v7  ;;  %v5585_v7 = vcombine.high %v2606_v63, %v2610_v2 }
 0x8af   : > { %3470 = vmatpush1.bf16.msra.mxu0 %v5678_v6 }
 0x915   : > { %v2525_v11 = vpop.xlane.xlu0 %2524 }
 0x916   : > { %v2530_v12 = vmul.f32 0.00390625, %v2525_v11  ;;  %v5684_v11 = vcombine.low %v2708_v8, %v2712_v9 }
 0x917   : > { %v2528_v13 = vpop.xlane.xlu1 %2527 }
 0x918   : > { %v8054_v16 = vsub.f32 %v8001_v14, %v2530_v12  ;;  %v8057_v17 = vsub.f32 %v8003_v38, %v2530_v12  ;;  %v2531_v18 = vmul.f32 0.00390625, %v2528_v13  ;;  %v5685_v12 = vcombine.high %v2708_v8, %v2712_v9  ;;  %v2713_v13 = vld [vmem:[%s7779_s5 + $0x3e8] sm:$0xff]  ;;  %v2614_v9 = vld [vmem:[%s7779_s5 + $0xd0] sm:$0xff] }
 0x91a   : > { %v8060_v19 = vsub.f32 %v8005_v41, %v2531_v18  ;;  %v8063_v20 = vsub.f32 %v8007_v43, %v2531_v18  ;;  %v2536_v21 = vmul.f32 %v8054_v16, %v8054_v16  ;;  %v2537_v22 = vmul.f32 %v8057_v17, %v8057_v17  ;;  %v2668_v43 = vld [vmem:[%s7779_s5 + $0x280] sm:$0xff] }
 0x91b   : > { %v5645_v15 = vcombine.high %v2668_v43, %v2672_v26  ;;  %v5644_v29 = vcombine.low %v2668_v43, %v2672_v26  ;;  %v5686_v18 = vcombine.low %v2709_v10, %v2713_v13 }
 0x91c   : > { %v2540_v23 = vadd.f32 %v2537_v22, %v2536_v21  ;;  %v2538_v14 = vmul.f32 %v8060_v19, %v8060_v19  ;;  %v2539_v38 = vmul.f32 %v8063_v20, %v8063_v20  ;;  %v5687_v21 = vcombine.high %v2709_v10, %v2713_v13  ;;  %v2590_v22 = vld [vmem:[%s7779_s5 + $0x10] sm:$0xff] }
 0x91d   : > { %3418 = vmatprep.subr.bf16.mxu1 %v5645_v15  ;;  %v2618_v10 = vld [vmem:[%s7779_s5 + $0xf0] sm:$0xff]  ;;  %v5584_v13 = vcombine.low %v2606_v63, %v2610_v2  ;;  %v2655_v63 = vld [vmem:[%s7779_s5 + $0x218] sm:$0xff] }
 0x91e   : > { %2541 = vadd.xlane.f32.xlu0 %v2540_v23  ;;  %v2543_v41 = vadd.f32 %v2539_v38, %v2538_v14  ;;  %3419 = vmatpush1.bf16.msra.mxu1 %v5644_v29  ;;  %v2594_v23 = vld [vmem:[%s7779_s5 + $0x30] sm:$0xff]  ;;  %v2591_v14 = vld [vmem:[%s7779_s5 + $0x18] sm:$0xff] }
 0x91f   : > { %3420 = vmatprep.subr.bf16.mxu1 %v5653_v39  ;;  %3471 = vmatprep.subr.bf16.mxu0 %v5687_v21  ;;  %v5569_v38 = vcombine.high %v2590_v22, %v2594_v23  ;;  %v5568_v43 = vcombine.low %v2590_v22, %v2594_v23  ;;  %v2564_v39 = vrot.slane %v2521_v34, %v7915_v37  ;;  %v2622_v23 = vld [vmem:[%s7779_s5 + $0x110] sm:$0xff] }
 0x920   : > { %2544 = vadd.xlane.f32.xlu1 %v2543_v41  ;;  %3472 = vmatpush1.bf16.msra.mxu0 %v5686_v18  ;;  %v2595_v41 = vld [vmem:[%s7779_s5 + $0x38] sm:$0xff]  ;;  %v5593_v21 = vcombine.high %v2614_v9, %v2618_v10 }
 0x921   : > { %v5570_v26 = vcombine.low %v2591_v14, %v2595_v41  ;;  %v5571_v27 = vcombine.high %v2591_v14, %v2595_v41  ;;  %v2626_v14 = vld [vmem:[%s7779_s5 + $0x130] sm:$0xff]  ;;  %v2627_v41 = vld [vmem:[%s7779_s5 + $0x138] sm:$0xff] }
 0x922   : > { %3421 = vmatpush1.bf16.msra.mxu1 %v5652_v42 }
 0x923   : > { %3422 = vmatprep.subr.bf16.mxu1 %v5661_v49  ;;  %3527 = vmatprep.subr.bf16.mxu0 %v5571_v27  ;;  %v5601_v27 = vcombine.high %v2622_v23, %v2626_v14 }
 0x926   : > { %3423 = vmatpush1.bf16.msra.mxu1 %v5660_v51 }
 0x927   : > { %3424 = vmatprep.subr.bf16.mxu1 %v5669_v57  ;;  %v2598_v57 = vld [vmem:[%s7779_s5 + $0x50] sm:$0xff] }
 0x92a   : > { %3425 = vmatpush1.bf16.msra.mxu1 %v5668_v59  ;;  %v2603_v59 = vld [vmem:[%s7779_s5 + $0x78] sm:$0xff] }
 0x92b   : > { %3426 = vmatprep.subr.bf16.mxu1 %v5677_v3  ;;  %v5579_v1 = vcombine.high %v2599_v58, %v2603_v59  ;;  %v2607_v3 = vld [vmem:[%s7779_s5 + $0x98] sm:$0xff]  ;;  %v5578_v6 = vcombine.low %v2599_v58, %v2603_v59  ;;  %v2654_v59 = vld [vmem:[%s7779_s5 + $0x210] sm:$0xff] }
 0x92c   : > { %v5587_v8 = vcombine.high %v2607_v3, %v2611_v4  ;;  %v5586_v18 = vcombine.low %v2607_v3, %v2611_v4 }
 0x92e   : > { %3427 = vmatpush1.bf16.msra.mxu1 %v5676_v5 }
 0x92f   : > { %3428 = vmatprep.subr.bf16.mxu1 %v5685_v12  ;;  %v2619_v12 = vld [vmem:[%s7779_s5 + $0xf8] sm:$0xff] }
 0x932   : > { %3429 = vmatpush1.bf16.msra.mxu1 %v5684_v11  ;;  %v2615_v11 = vld [vmem:[%s7779_s5 + $0xd8] sm:$0xff] }
 0x933   : > { %3484 = vmatprep.subr.bf16.mxu1 %v5569_v38  ;;  %v5595_v22 = vcombine.high %v2615_v11, %v2619_v12  ;;  %v2623_v38 = vld [vmem:[%s7779_s5 + $0x118] sm:$0xff] }
 0x934   : > { %v5602_v34 = vcombine.low %v2623_v38, %v2627_v41 }
 0x9ab   : > { %v2542_v15 = vpop.xlane.xlu0 %2541 }
 0x9ac   : > { %v2546_v28 = vmul.f32 0.00390625, %v2542_v15  ;;  %v5603_v15 = vcombine.high %v2623_v38, %v2627_v41 }
 0x9ad   : > { %v2545_v29 = vpop.xlane.xlu1 %2544 }
 0x9ae   : > { %v2548_v30 = vadd.f32 1e-12, %v2546_v28  ;;  %v2547_v33 = vmul.f32 0.00390625, %v2545_v29  ;;  %v2630_v28 = vld [vmem:[%s7779_s5 + $0x150] sm:$0xff] }
 0x9af   : > { %v2634_v29 = vld [vmem:[%s7779_s5 + $0x170] sm:$0xff] }
 0x9b0   : > { %6486 = vrsqrt.f32 %v2548_v30  ;;  %v2549_v24 = vadd.f32 1e-12, %v2547_v33  ;;  %v2631_v30 = vld [vmem:[%s7779_s5 + $0x158] sm:$0xff]  ;;  %v5609_v36 = vcombine.high %v2630_v28, %v2634_v29 }
 0x9b1   : > { %v2635_v33 = vld [vmem:[%s7779_s5 + $0x178] sm:$0xff] }
 0x9b2   : > { %6488 = vrsqrt.f32 %v2549_v24  ;;  %v5600_v24 = vcombine.low %v2622_v23, %v2626_v14 }
 0x9ba   : > { %v6487_v42 = vpop.eup %6486 }
 0x9bb   : > { %v2552_v44 = vmul.f32 %v6487_v42, %v8054_v16  ;;  %v2553_v45 = vmul.f32 %v6487_v42, %v8057_v17  ;;  %v2642_v42 = vld [vmem:[%s7779_s5 + $0x1b0] sm:$0xff] }
 0x9bc   : > { %v6489_v46 = vpop.eup %6488 }
 0x9bd   : > { %v2554_v49 = vmul.f32 %v6489_v46, %v8060_v19  ;;  %v2555_v50 = vmul.f32 %v6489_v46, %v8063_v20  ;;  %v2568_v51 = vmul.f32 %v2564_v39, %v2553_v45  ;;  %v2567_v52 = vmul.f32 %v2560_v40, %v2552_v44  ;;  %v2602_v19 = vld [vmem:[%s7779_s5 + $0x70] sm:$0xff]  ;;  %v2639_v44 = vld [vmem:[%s7779_s5 + $0x198] sm:$0xff] }
 0x9be   : > { %v5577_v0 = vcombine.high %v2598_v57, %v2602_v19  ;;  %v5576_v5 = vcombine.low %v2598_v57, %v2602_v19  ;;  %v2643_v45 = vld [vmem:[%s7779_s5 + $0x1b8] sm:$0xff]  ;;  %v5608_v46 = vcombine.low %v2630_v28, %v2634_v29 }
 0x9bf   : > { %v2570_v53 = vmul.f32 %v2564_v39, %v2555_v50  ;;  %v2569_v54 = vmul.f32 %v2560_v40, %v2554_v49  ;;  %v8113_v16 = vadd.f32 %v2579_v47, %v2568_v51  ;;  %v8117_v55 = vadd.f32 %v2575_v48, %v2567_v52  ;;  %v2638_v40 = vld [vmem:[%s7779_s5 + $0x190] sm:$0xff]  ;;  %v2647_v52 = vld [vmem:[%s7779_s5 + $0x1d8] sm:$0xff] }
 0x9c0   : > { %v5611_v39 = vcombine.high %v2631_v30, %v2635_v33  ;;  %v5619_v49 = vcombine.high %v2639_v44, %v2643_v45  ;;  %v2646_v50 = vld [vmem:[%s7779_s5 + $0x1d0] sm:$0xff]  ;;  %v5618_v57 = vcombine.low %v2639_v44, %v2643_v45 }
 0x9c1   : > { %v8115_v17 = vadd.f32 %v2579_v47, %v2570_v53  ;;  %v8119_v56 = vadd.f32 %v2575_v48, %v2569_v54  ;;  %v5610_v47 = vcombine.low %v2631_v30, %v2635_v33  ;;  %v5617_v48 = vcombine.high %v2638_v40, %v2642_v42  ;;  %v2650_v51 = vld [vmem:[%s7779_s5 + $0x1f0] sm:$0xff]  ;;  %v2651_v53 = vld [vmem:[%s7779_s5 + $0x1f8] sm:$0xff] }
 0x9c2   : > { %v5616_v54 = vcombine.low %v2638_v40, %v2642_v42  ;;  %v5625_v19 = vcombine.high %v2646_v50, %v2650_v51  ;;  %v5627_v58 = vcombine.high %v2647_v52, %v2651_v53  ;;  %v5626_v2 = vcombine.low %v2647_v52, %v2651_v53 }
 0x9c3   : > { %v2587_v20 = vpack.c.bf16 %v8115_v17, %v8113_v16  ;;  %v8129_v62 = vpack.c.bf16 %v8119_v56, %v8117_v55 }
 0x9c5   : > { %3430 = vmatprep.mubr.bf16.mxu1 %v2587_v20  ;;  %3473 = vmatprep.mubr.bf16.mxu0 %v2587_v20 }
 0x9c6   : > { %3431 = vmatmul.mubr.bf16.vlgmr.msra.gmra.mrb[16].mxu1 %v8129_v62  ;;  %3474 = vmatmul.mubr.bf16.vlgmr.msra.gmra.mrb[32].mxu0 %v8129_v62 }
 0x9c7   : > { %3485 = vmatpush1.bf16.msra.mxu1 %v5568_v43  ;;  %3528 = vmatpush1.bf16.msra.mxu0 %v5570_v26  ;;  %v5592_v43 = vcombine.low %v2614_v9, %v2618_v10  ;;  %v5594_v26 = vcombine.low %v2615_v11, %v2619_v12 }
 0x9c8   : > { %3516 = vmatprep.mubr.bf16.mxu1 %v2587_v20  ;;  %3559 = vmatprep.mubr.bf16.mxu0 %v2587_v20  ;;  %v2658_v20 = vld [vmem:[%s7779_s5 + $0x230] sm:$0xff] }
 0x9c9   : > { %3486 = vmatprep.subr.bf16.mxu1 %v5577_v0  ;;  %3529 = vmatprep.subr.bf16.mxu0 %v5579_v1  ;;  %v2659_v0 = vld [vmem:[%s7779_s5 + $0x238] sm:$0xff]  ;;  %v5624_v1 = vcombine.low %v2646_v50, %v2650_v51  ;;  %v5633_v3 = vcombine.high %v2654_v59, %v2658_v20  ;;  %v5632_v9 = vcombine.low %v2654_v59, %v2658_v20 }
 0x9ca   : > { %v5635_v4 = vcombine.high %v2655_v63, %v2659_v0  ;;  %v5634_v10 = vcombine.low %v2655_v63, %v2659_v0 }
 0x9cb   : > { %3487 = vmatpush1.bf16.msra.mxu1 %v5576_v5  ;;  %3530 = vmatpush1.bf16.msra.mxu0 %v5578_v6  ;;  %v2662_v5 = vld [vmem:[%s7779_s5 + $0x250] sm:$0xff] }
 0x9cc   : > { %3488 = vmatprep.subr.bf16.mxu1 %v5585_v7  ;;  %3531 = vmatprep.subr.bf16.mxu0 %v5587_v8  ;;  %v2666_v6 = vld [vmem:[%s7779_s5 + $0x270] sm:$0xff]  ;;  %v2663_v7 = vld [vmem:[%s7779_s5 + $0x258] sm:$0xff] }
 0x9cd   : > { %v2667_v8 = vld [vmem:[%s7779_s5 + $0x278] sm:$0xff]  ;;  %v5641_v11 = vcombine.high %v2662_v5, %v2666_v6  ;;  %v5640_v23 = vcombine.low %v2662_v5, %v2666_v6 }
 0x9ce   : > { %v5643_v12 = vcombine.high %v2663_v7, %v2667_v8  ;;  %v5642_v14 = vcombine.low %v2663_v7, %v2667_v8 }
 0x9cf   : > { %3489 = vmatpush1.bf16.msra.mxu1 %v5584_v13  ;;  %3532 = vmatpush1.bf16.msra.mxu0 %v5586_v18  ;;  %v2670_v13 = vld [vmem:[%s7779_s5 + $0x290] sm:$0xff] }
 0x9d0   : > { %3490 = vmatprep.subr.bf16.mxu1 %v5593_v21  ;;  %3533 = vmatprep.subr.bf16.mxu0 %v5595_v22  ;;  %v2674_v18 = vld [vmem:[%s7779_s5 + $0x2b0] sm:$0xff]  ;;  %v2671_v21 = vld [vmem:[%s7779_s5 + $0x298] sm:$0xff] }
 0x9d1   : > { %v2675_v22 = vld [vmem:[%s7779_s5 + $0x2b8] sm:$0xff]  ;;  %v5649_v38 = vcombine.high %v2670_v13, %v2674_v18  ;;  %v5648_v28 = vcombine.low %v2670_v13, %v2674_v18  ;;  %v6283_v13 = vld [vmem:[%s7783_s2 + $0x14] ss:$8 sps:$4 sm:$0xff]   ;;  %v6281_v18 = vld [vmem:[%s7783_s2 + $0x10] ss:$8 sps:$4 sm:$0xff]  }
 0x9d2   : > { %v5651_v41 = vcombine.high %v2671_v21, %v2675_v22  ;;  %v5650_v29 = vcombine.low %v2671_v21, %v2675_v22  ;;  %v6286_v21 = vld [vmem:[%s7783_s2 + $0x24] ss:$8 sps:$4 sm:$0xff]   ;;  %v6284_v22 = vld [vmem:[%s7783_s2 + $0x20] ss:$8 sps:$4 sm:$0xff]  }
 0x9d3   : > { %3491 = vmatpush1.bf16.msra.mxu1 %v5592_v43  ;;  %3534 = vmatpush1.bf16.msra.mxu0 %v5594_v26  ;;  %v2678_v43 = vld [vmem:[%s7779_s5 + $0x2d0] sm:$0xff] }
 0x9d4   : > { %3492 = vmatprep.subr.bf16.mxu1 %v5601_v27  ;;  %3535 = vmatprep.subr.bf16.mxu0 %v5603_v15  ;;  %v2682_v26 = vld [vmem:[%s7779_s5 + $0x2f0] sm:$0xff]  ;;  %v2679_v27 = vld [vmem:[%s7779_s5 + $0x2d8] sm:$0xff] }
 0x9d5   : > { %v2683_v15 = vld [vmem:[%s7779_s5 + $0x2f8] sm:$0xff]  ;;  %v5657_v30 = vcombine.high %v2678_v43, %v2682_v26  ;;  %v5656_v40 = vcombine.low %v2678_v43, %v2682_v26  ;;  %v6293_v43 = vld [vmem:[%s7783_s2 + $0x50] ss:$8 sps:$4 sm:$0xff]  }
 0x9d6   : > { %v5659_v33 = vcombine.high %v2679_v27, %v2683_v15  ;;  %v5658_v42 = vcombine.low %v2679_v27, %v2683_v15  ;;  %v6298_v26 = vld [vmem:[%s7783_s2 + $0x64] ss:$8 sps:$4 sm:$0xff]   ;;  %v6296_v27 = vld [vmem:[%s7783_s2 + $0x60] ss:$8 sps:$4 sm:$0xff]   ;;  %v6301_v15 = vld [vmem:[%s7783_s2 + $0x74] ss:$8 sps:$4 sm:$0xff]  }
 0x9d7   : > { %3493 = vmatpush1.bf16.msra.mxu1 %v5600_v24  ;;  %3536 = vmatpush1.bf16.msra.mxu0 %v5602_v34  ;;  %v2686_v24 = vld [vmem:[%s7779_s5 + $0x310] sm:$0xff] }
 0x9d8   : > { %3494 = vmatprep.subr.bf16.mxu1 %v5609_v36  ;;  %3537 = vmatprep.subr.bf16.mxu0 %v5611_v39  ;;  %v2690_v34 = vld [vmem:[%s7779_s5 + $0x330] sm:$0xff]  ;;  %v2687_v36 = vld [vmem:[%s7779_s5 + $0x318] sm:$0xff] }
 0x9d9   : > { %v2691_v39 = vld [vmem:[%s7779_s5 + $0x338] sm:$0xff]  ;;  %v5665_v44 = vcombine.high %v2686_v24, %v2690_v34  ;;  %v5664_v50 = vcombine.low %v2686_v24, %v2690_v34  ;;  %v6305_v24 = vld [vmem:[%s7783_s2 + $0x90] ss:$8 sps:$4 sm:$0xff]  }
 0x9da   : > { %v5667_v45 = vcombine.high %v2687_v36, %v2691_v39  ;;  %v5666_v51 = vcombine.low %v2687_v36, %v2691_v39  ;;  %v6310_v34 = vld [vmem:[%s7783_s2 + $0xa4] ss:$8 sps:$4 sm:$0xff]   ;;  %v6308_v36 = vld [vmem:[%s7783_s2 + $0xa0] ss:$8 sps:$4 sm:$0xff]   ;;  %v6313_v39 = vld [vmem:[%s7783_s2 + $0xb4] ss:$8 sps:$4 sm:$0xff]  }
 0x9db   : > { %3495 = vmatpush1.bf16.msra.mxu1 %v5608_v46  ;;  %3538 = vmatpush1.bf16.msra.mxu0 %v5610_v47  ;;  %v2694_v46 = vld [vmem:[%s7779_s5 + $0x350] sm:$0xff] }
 0x9dc   : > { %3496 = vmatprep.subr.bf16.mxu1 %v5617_v48  ;;  %3539 = vmatprep.subr.bf16.mxu0 %v5619_v49  ;;  %v2698_v47 = vld [vmem:[%s7779_s5 + $0x370] sm:$0xff]  ;;  %v2695_v48 = vld [vmem:[%s7779_s5 + $0x358] sm:$0xff] }
 0x9dd   : > { %v2699_v49 = vld [vmem:[%s7779_s5 + $0x378] sm:$0xff]  ;;  %v5673_v52 = vcombine.high %v2694_v46, %v2698_v47  ;;  %v5672_v59 = vcombine.low %v2694_v46, %v2698_v47  ;;  %v6317_v46 = vld [vmem:[%s7783_s2 + $0xd0] ss:$8 sps:$4 sm:$0xff]  }
 0x9de   : > { %v5675_v53 = vcombine.high %v2695_v48, %v2699_v49  ;;  %v5674_v20 = vcombine.low %v2695_v48, %v2699_v49  ;;  %v6322_v47 = vld [vmem:[%s7783_s2 + $0xe4] ss:$8 sps:$4 sm:$0xff]   ;;  %v6320_v48 = vld [vmem:[%s7783_s2 + $0xe0] ss:$8 sps:$4 sm:$0xff]   ;;  %v6325_v49 = vld [vmem:[%s7783_s2 + $0xf4] ss:$8 sps:$4 sm:$0xff]  }
 0x9df   : > { %3497 = vmatpush1.bf16.msra.mxu1 %v5616_v54  ;;  %3540 = vmatpush1.bf16.msra.mxu0 %v5618_v57  ;;  %v2702_v54 = vld [vmem:[%s7779_s5 + $0x390] sm:$0xff] }
 0x9e0   : > { %3498 = vmatprep.subr.bf16.mxu1 %v5625_v19  ;;  %3541 = vmatprep.subr.bf16.mxu0 %v5627_v58  ;;  %v2706_v57 = vld [vmem:[%s7779_s5 + $0x3b0] sm:$0xff]  ;;  %v2703_v19 = vld [vmem:[%s7779_s5 + $0x398] sm:$0xff] }
 0x9e1   : > { %v2707_v58 = vld [vmem:[%s7779_s5 + $0x3b8] sm:$0xff]  ;;  %v5681_v63 = vcombine.high %v2702_v54, %v2706_v57  ;;  %v5680_v5 = vcombine.low %v2702_v54, %v2706_v57 }
 0x9e2   : > { %v5683_v0 = vcombine.high %v2703_v19, %v2707_v58  ;;  %v5682_v6 = vcombine.low %v2703_v19, %v2707_v58 }
 0x9e3   : > { %3499 = vmatpush1.bf16.msra.mxu1 %v5624_v1  ;;  %3542 = vmatpush1.bf16.msra.mxu0 %v5626_v2  ;;  %v2710_v1 = vld [vmem:[%s7779_s5 + $0x3d0] sm:$0xff] }
 0x9e4   : > { %3500 = vmatprep.subr.bf16.mxu1 %v5633_v3  ;;  %3543 = vmatprep.subr.bf16.mxu0 %v5635_v4  ;;  %v2714_v2 = vld [vmem:[%s7779_s5 + $0x3f0] sm:$0xff]  ;;  %v2711_v3 = vld [vmem:[%s7779_s5 + $0x3d8] sm:$0xff] }
 0x9e5   : > { %v2715_v4 = vld [vmem:[%s7779_s5 + $0x3f8] sm:$0xff]  ;;  %v5689_v7 = vcombine.high %v2710_v1, %v2714_v2 }
 0x9e6   : > { %v5691_v8 = vcombine.high %v2711_v3, %v2715_v4 }
 0x9e7   : > { %3501 = vmatpush1.bf16.msra.mxu1 %v5632_v9  ;;  %3544 = vmatpush1.bf16.msra.mxu0 %v5634_v10  ;;  %v5688_v9 = vcombine.low %v2710_v1, %v2714_v2  ;;  %v5690_v10 = vcombine.low %v2711_v3, %v2715_v4 }
 0x9e8   : > { %3502 = vmatprep.subr.bf16.mxu1 %v5641_v11  ;;  %3545 = vmatprep.subr.bf16.mxu0 %v5643_v12  ;;  %v6280_v11 = vld [vmem:[%s7783_s2 + $0x4] ss:$8 sps:$4 sm:$0xff]   ;;  %v6278_v12 = vld [vmem:[%s7783_s2] ss:$8 sps:$4 sm:$0xff]  }
 0x9eb   : > { %3503 = vmatpush1.bf16.msra.mxu1 %v5640_v23  ;;  %3546 = vmatpush1.bf16.msra.mxu0 %v5642_v14  ;;  %v6289_v23 = vld [vmem:[%s7783_s2 + $0x34] ss:$8 sps:$4 sm:$0xff]   ;;  %v6287_v14 = vld [vmem:[%s7783_s2 + $0x30] ss:$8 sps:$4 sm:$0xff]  }
 0x9ec   : > { %3504 = vmatprep.subr.bf16.mxu1 %v5649_v38  ;;  %3547 = vmatprep.subr.bf16.mxu0 %v5651_v41  ;;  %v6292_v38 = vld [vmem:[%s7783_s2 + $0x44] ss:$8 sps:$4 sm:$0xff]   ;;  %v6295_v41 = vld [vmem:[%s7783_s2 + $0x54] ss:$8 sps:$4 sm:$0xff]  }
 0x9ef   : > { %3505 = vmatpush1.bf16.msra.mxu1 %v5648_v28  ;;  %3548 = vmatpush1.bf16.msra.mxu0 %v5650_v29  ;;  %v6299_v28 = vld [vmem:[%s7783_s2 + $0x70] ss:$8 sps:$4 sm:$0xff]   ;;  %v6304_v29 = vld [vmem:[%s7783_s2 + $0x84] ss:$8 sps:$4 sm:$0xff]  }
 0x9f0   : > { %3506 = vmatprep.subr.bf16.mxu1 %v5657_v30  ;;  %3549 = vmatprep.subr.bf16.mxu0 %v5659_v33  ;;  %v6302_v30 = vld [vmem:[%s7783_s2 + $0x80] ss:$8 sps:$4 sm:$0xff]   ;;  %v6307_v33 = vld [vmem:[%s7783_s2 + $0x94] ss:$8 sps:$4 sm:$0xff]  }
 0x9f3   : > { %3507 = vmatpush1.bf16.msra.mxu1 %v5656_v40  ;;  %3550 = vmatpush1.bf16.msra.mxu0 %v5658_v42  ;;  %v6311_v40 = vld [vmem:[%s7783_s2 + $0xb0] ss:$8 sps:$4 sm:$0xff]   ;;  %v6316_v42 = vld [vmem:[%s7783_s2 + $0xc4] ss:$8 sps:$4 sm:$0xff]  }
 0x9f4   : > { %3508 = vmatprep.subr.bf16.mxu1 %v5665_v44  ;;  %3551 = vmatprep.subr.bf16.mxu0 %v5667_v45  ;;  %v6314_v44 = vld [vmem:[%s7783_s2 + $0xc0] ss:$8 sps:$4 sm:$0xff]   ;;  %v6319_v45 = vld [vmem:[%s7783_s2 + $0xd4] ss:$8 sps:$4 sm:$0xff]  }
 0x9f7   : > { %3509 = vmatpush1.bf16.msra.mxu1 %v5664_v50  ;;  %3552 = vmatpush1.bf16.msra.mxu0 %v5666_v51  ;;  %v6323_v50 = vld [vmem:[%s7783_s2 + $0xf0] ss:$8 sps:$4 sm:$0xff]   ;;  %v6328_v51 = vld [vmem:[%s7783_s2 + $0x104] ss:$8 sps:$4 sm:$0xff]  }
 0x9f8   : > { %3510 = vmatprep.subr.bf16.mxu1 %v5673_v52  ;;  %3553 = vmatprep.subr.bf16.mxu0 %v5675_v53  ;;  %v8225_v52 = vld [vmem:[%s7781_s29] sm:$0xff] }
 0x9f9   : > { %v2721_v53 = vrot.slane %v8225_v52, %v7910_v35  ;;  %v2729_v54 = vrot.slane %v8225_v52, %v1163_v25  ;;  %v2725_v57 = vrot.slane %v8225_v52, %v7915_v37  ;;  %v2733_v19 = vrot.slane %v8225_v52, %v1167_v32 }
 0x9fb   : > { %3511 = vmatpush1.bf16.msra.mxu1 %v5672_v59  ;;  %3554 = vmatpush1.bf16.msra.mxu0 %v5674_v20 }
 0x9fc   : > { %3512 = vmatprep.subr.bf16.mxu1 %v5681_v63  ;;  %3555 = vmatprep.subr.bf16.mxu0 %v5683_v0 }
 0x9ff   : > { %3513 = vmatpush1.bf16.msra.mxu1 %v5680_v5  ;;  %3556 = vmatpush1.bf16.msra.mxu0 %v5682_v6 }
 0xa00   : > { %3514 = vmatprep.subr.bf16.mxu1 %v5689_v7  ;;  %3557 = vmatprep.subr.bf16.mxu0 %v5691_v8 }
 0xa03   : > { %3515 = vmatpush1.bf16.msra.mxu1 %v5688_v9  ;;  %3558 = vmatpush1.bf16.msra.mxu0 %v5690_v10 }
 0xa04   : > { %4790 = vmatprep.subr.bf16.mxu1 %v6280_v11 }
 0xa06   : > { %3517 = vmatmul.mubr.bf16.vlgmr.msra.gmra.mrb[20].mxu1 %v8129_v62  ;;  %3560 = vmatmul.mubr.bf16.vlgmr.msra.gmra.mrb[36].mxu0 %v8129_v62  ;;  %v6290_v62 = vld [vmem:[%s7783_s2 + $0x40] ss:$8 sps:$4 sm:$0xff]  }
 0xa07   : > { %4791 = vmatpush1.bf16.msra.mxu1 %v6278_v12 }
 0xa08   : > { %4792 = vmatprep.subr.bf16.mxu1 %v6283_v13 }
 0xa0b   : > { %4793 = vmatpush1.bf16.msra.mxu1 %v6281_v18 }
 0xa0c   : > { %4794 = vmatprep.subr.bf16.mxu1 %v6286_v21 }
 0xa0f   : > { %4795 = vmatpush1.bf16.msra.mxu1 %v6284_v22 }
 0xa10   : > { %4796 = vmatprep.subr.bf16.mxu1 %v6289_v23 }
 0xa13   : > { %4797 = vmatpush1.bf16.msra.mxu1 %v6287_v14 }
 0xa14   : > { %4798 = vmatprep.subr.bf16.mxu1 %v6292_v38 }
 0xa17   : > { %4799 = vmatpush1.bf16.msra.mxu1 %v6290_v62 }
 0xa18   : > { %4800 = vmatprep.subr.bf16.mxu1 %v6295_v41 }
 0xa1b   : > { %4801 = vmatpush1.bf16.msra.mxu1 %v6293_v43 }
 0xa1c   : > { %4802 = vmatprep.subr.bf16.mxu1 %v6298_v26 }
 0xa1f   : > { %4803 = vmatpush1.bf16.msra.mxu1 %v6296_v27 }
 0xa20   : > { %4804 = vmatprep.subr.bf16.mxu1 %v6301_v15 }
 0xa23   : > { %4805 = vmatpush1.bf16.msra.mxu1 %v6299_v28 }
 0xa24   : > { %4806 = vmatprep.subr.bf16.mxu1 %v6304_v29 }
 0xa27   : > { %4807 = vmatpush1.bf16.msra.mxu1 %v6302_v30 }
 0xa28   : > { %4808 = vmatprep.subr.bf16.mxu1 %v6307_v33 }
 0xa2b   : > { %4809 = vmatpush1.bf16.msra.mxu1 %v6305_v24 }
 0xa2c   : > { %4810 = vmatprep.subr.bf16.mxu1 %v6310_v34 }
 0xa2f   : > { %4811 = vmatpush1.bf16.msra.mxu1 %v6308_v36 }
 0xa30   : > { %4812 = vmatprep.subr.bf16.mxu1 %v6313_v39 }
 0xa33   : > { %4813 = vmatpush1.bf16.msra.mxu1 %v6311_v40 }
 0xa34   : > { %4814 = vmatprep.subr.bf16.mxu1 %v6316_v42 }
 0xa37   : > { %4815 = vmatpush1.bf16.msra.mxu1 %v6314_v44 }
 0xa38   : > { %4816 = vmatprep.subr.bf16.mxu1 %v6319_v45 }
 0xa3b   : > { %4817 = vmatpush1.bf16.msra.mxu1 %v6317_v46 }
 0xa3c   : > { %4818 = vmatprep.subr.bf16.mxu1 %v6322_v47  ;;  %v2744_v47 = vsub.s32 6, %v7902_v31 }
 0xa3f   : > { %4819 = vmatpush1.bf16.msra.mxu1 %v6320_v48 }
 0xa40   : > { %4820 = vmatprep.subr.bf16.mxu1 %v6325_v49 }
 0xa43   : > { %4821 = vmatpush1.bf16.msra.mxu1 %v6323_v50 }
 0xa44   : > { %4833 = vmatprep.subr.bf16.mxu1 %v6328_v51  ;;  %v2748_v51 = vsub.s32 7, %v7902_v31 }
 0xa99   : > { %v3432_v58 = vpop.f32.mrb[16].mxu1  ;;  %v3475_v59 = vpop.f32.mrb[32].mxu0 }
 0xa9a   : > { %v3433_v20 = vadd.f32 %v3432_v58, %v2721_v53  ;;  %v3476_v63 = vadd.f32 %v3475_v59, %v2729_v54  ;;  %v3434_v0 = vpop.f32.mrb[17].mxu1  ;;  %v3477_v1 = vpop.f32.mrb[33].mxu0 }
 0xa9b   : > { %v8237_v2 = vadd.f32 %v3434_v0, %v2725_v57  ;;  %v8239_v3 = vadd.f32 %v3477_v1, %v2733_v19  ;;  %v3436_v4 = vpop.f32.mrb[18].mxu1  ;;  %v3479_v5 = vpop.f32.mrb[34].mxu0 }
 0xa9c   : > { %v8241_v25 = vmul.f32 0.70710677, %v3433_v20  ;;  %v8243_v6 = vmul.f32 0.70710677, %v3476_v63  ;;  %v3438_v11 = vpop.f32.mrb[19].mxu1  ;;  %v3481_v21 = vpop.f32.mrb[35].mxu0  ;;  %v8255_v62 = vadd.f32 %v3436_v4, %v2721_v53  ;;  %v8260_v26 = vadd.f32 %v3479_v5, %v2729_v54 }
 0xa9d   : > { %v8246_v7 = vmul.f32 0.70710677, %v8237_v2  ;;  %v8252_v10 = vmul.f32 0.70710677, %v8239_v3  ;;  %v8262_v15 = vadd.f32 %v3438_v11, %v2725_v57  ;;  %v8272_v42 = vadd.f32 %v3481_v21, %v2733_v19 }
 0xa9e   : > { %v3634_v32 = vand.u32 2147483647, %v8241_v25  ;;  %v3636_v8 = vand.u32 2147483647, %v8243_v6  ;;  %v8258_v43 = vmul.f32 0.70710677, %v8255_v62 }
 0xa9f   : > { %v3635_v9 = vand.u32 2147483647, %v8246_v7  ;;  %v3637_v14 = vand.u32 2147483647, %v8252_v10  ;;  %v8266_v30 = vmul.f32 0.70710677, %v8260_v26 }
 0xaa0   : > { %v3650_v12 = vmul.f32 0.3275911, %v3634_v32  ;;  %v3652_v13 = vmul.f32 0.3275911, %v3636_v8  ;;  %v3642_v28 = vand.u32 2147483647, %v8258_v43 }
 0xaa1   : > { %v3651_v18 = vmul.f32 0.3275911, %v3635_v9  ;;  %v3653_v41 = vmul.f32 0.3275911, %v3637_v14  ;;  %v3858_v29 = vsub.f32 0.0, %v3634_v32  ;;  %v3860_v33 = vsub.f32 0.0, %v3636_v8 }
 0xaa2   : > { %v3666_v22 = vadd.f32 1.0, %v3650_v12  ;;  %v3668_v23 = vadd.f32 1.0, %v3652_v13  ;;  %v3658_v24 = vmul.f32 0.3275911, %v3642_v28  ;;  %v3859_v34 = vsub.f32 0.0, %v3635_v9 }
 0xaa3   : > { %v3667_v38 = vadd.f32 1.0, %v3651_v18  ;;  %v3669_v27 = vadd.f32 1.0, %v3653_v41  ;;  %v3644_v36 = vand.u32 2147483647, %v8266_v30  ;;  %v8270_v39 = vmul.f32 0.70710677, %v8262_v15 }
 0xaa4   : > { %6490 = vrcp.f32 %v3666_v22  ;;  %v3674_v40 = vadd.f32 1.0, %v3658_v24  ;;  %v3874_v44 = vmul.f32 %v3858_v29, %v3634_v32  ;;  %v3876_v49 = vmul.f32 %v3860_v33, %v3636_v8 }
 0xaa5   : > { %6492 = vrcp.f32 %v3668_v23  ;;  %v3660_v45 = vmul.f32 0.3275911, %v3644_v36  ;;  %v8275_v46 = vand.u32 2147483647, %v8270_v39  ;;  %v3861_v50 = vsub.f32 0.0, %v3637_v14 }
 0xaa6   : > { %6494 = vrcp.f32 %v3667_v38  ;;  %v3875_v57 = vmul.f32 %v3859_v34, %v3635_v9  ;;  %v8285_v59 = vmul.f32 0.5, %v3433_v20  ;;  %v8287_v0 = vmul.f32 0.5, %v3476_v63 }
 0xaa7   : > { %6496 = vrcp.f32 %v3669_v27  ;;  %v3676_v19 = vadd.f32 1.0, %v3660_v45  ;;  %v3659_v58 = vmul.f32 0.3275911, %v8275_v46  ;;  %v8291_v4 = vmul.f32 0.70710677, %v8272_v42 }
 0xaa8   : > { %6498 = vrcp.f32 %v3674_v40  ;;  %v3890_v32 = vmul.f32 1.442695, %v3874_v44  ;;  %v3894_v9 = vmul.f32 1.442695, %v3876_v49  ;;  %v3877_v13 = vmul.f32 %v3861_v50, %v3637_v14 }
 0xaa9   : > { %6500 = vrcp.f32 %v3676_v19  ;;  %v3675_v8 = vadd.f32 1.0, %v3659_v58  ;;  %v8296_v18 = vand.u32 2147483647, %v8291_v4  ;;  %v3892_v21 = vmul.f32 1.442695, %v3875_v57 }
 0xaaa   : > { %v3866_v22 = vsub.f32 0.0, %v3642_v28  ;;  %v3868_v41 = vsub.f32 0.0, %v3644_v36  ;;  %vm3602_vm3 = vcmp.ge.f32.partialorder %v8241_v25, 0.0  ;;  %v3896_v34 = vmul.f32 1.442695, %v3877_v13 }
 0xaab   : > { %6502 = vrcp.f32 %v3675_v8  ;;  %v3661_v27 = vmul.f32 0.3275911, %v8296_v18  ;;  %vm3604_vm4 = vcmp.ge.f32.partialorder %v8243_v6, 0.0  ;;  %vm3603_vm5 = vcmp.ge.f32.partialorder %v8246_v7, 0.0 }
 0xaac   : > { %6504 = vpow2.f32 %v3890_v32  ;;  %v3882_v57 = vmul.f32 %v3866_v22, %v3642_v28  ;;  %v3884_v19 = vmul.f32 %v3868_v41, %v3644_v36  ;;  %vm3610_vm6 = vcmp.ge.f32.partialorder %v8258_v43, 0.0 }
 0xaad   : > { %6506 = vpow2.f32 %v3894_v9  ;;  %v3677_v40 = vadd.f32 1.0, %v3661_v27  ;;  %vm3612_vm7 = vcmp.ge.f32.partialorder %v8266_v30, 0.0  ;;  %vm3605_vm8 = vcmp.ge.f32.partialorder %v8252_v10, 0.0 }
 0xaae   : > { %v8278_v48 = vpop.eup %6490  ;;  %6508 = vpow2.f32 %v3892_v21  ;;  %v3906_v21 = vmul.f32 1.442695, %v3882_v57  ;;  %v3578_v43 = vmul.f32 0.5, %v8255_v62  ;;  %vm3611_vm9 = vcmp.ge.f32.partialorder %v8270_v39, 0.0 }
 0xaaf   : > { %v8281_v53 = vpop.eup %6492  ;;  %v3714_v54 = vmul.f32 1.0614054, %v8278_v48  ;;  %6510 = vrcp.f32 %v3677_v40  ;;  %vm3613_vm10 = vcmp.ge.f32.partialorder %v8291_v4, 0.0 }
 0xab0   : > { %v3716_v1 = vmul.f32 1.0614054, %v8281_v53  ;;  %v8293_v11 = vpop.eup %6494  ;;  %6512 = vpow2.f32 %v3896_v34 }
 0xab1   : > { %v3730_v5 = vadd.f32 -1.4531521, %v3714_v54  ;;  %v3715_v63 = vmul.f32 1.0614054, %v8293_v11  ;;  %v8300_v23 = vpop.eup %6496  ;;  %6514 = vpow2.f32 %v3906_v21 }
 0xab2   : > { %v3732_v12 = vadd.f32 -1.4531521, %v3716_v1  ;;  %v3717_v33 = vmul.f32 1.0614054, %v8300_v23  ;;  %v8308_v50 = vpop.eup %6498 }
 0xab3   : > { %v3746_v20 = vmul.f32 %v8278_v48, %v3730_v5  ;;  %v3731_v29 = vadd.f32 -1.4531521, %v3715_v63  ;;  %v3722_v32 = vmul.f32 1.0614054, %v8308_v50  ;;  %v8315_v9 = vpop.eup %6500 }
 0xab4   : > { %v3748_v38 = vmul.f32 %v8281_v53, %v3732_v12  ;;  %v3733_v49 = vadd.f32 -1.4531521, %v3717_v33  ;;  %v3867_v12 = vsub.f32 0.0, %v8275_v46  ;;  %v3724_v22 = vmul.f32 1.0614054, %v8315_v9 }
 0xab5   : > { %v3762_v14 = vadd.f32 1.4214138, %v3746_v20  ;;  %v3747_v45 = vmul.f32 %v8293_v11, %v3731_v29  ;;  %v3738_v20 = vadd.f32 -1.4531521, %v3722_v32  ;;  %v8323_v33 = vpop.eup %6502 }
 0xab6   : > { %v3764_v24 = vadd.f32 1.4214138, %v3748_v38  ;;  %v3749_v5 = vmul.f32 %v8300_v23, %v3733_v49  ;;  %v3910_v38 = vmul.f32 1.442695, %v3884_v19  ;;  %v3740_v34 = vadd.f32 -1.4531521, %v3724_v22 }
 0xab7   : > { %v3778_v44 = vmul.f32 %v8278_v48, %v3762_v14  ;;  %v3763_v1 = vadd.f32 1.4214138, %v3747_v45  ;;  %v3754_v29 = vmul.f32 %v8308_v50, %v3738_v20  ;;  %v3883_v40 = vmul.f32 %v3867_v12, %v8275_v46  ;;  %v6505_v45 = vpop.eup %6504 }
 0xab8   : > { %v3780_v54 = vmul.f32 %v8281_v53, %v3764_v24  ;;  %v3765_v36 = vadd.f32 1.4214138, %v3749_v5  ;;  %v3756_v32 = vmul.f32 %v8315_v9, %v3740_v34  ;;  %v3723_v46 = vmul.f32 1.0614054, %v8323_v33 }
 0xab9   : > { %v3794_v58 = vadd.f32 -0.28449672, %v3778_v44  ;;  %v3779_v28 = vmul.f32 %v8293_v11, %v3763_v1  ;;  %v3869_v44 = vsub.f32 0.0, %v8296_v18  ;;  %v3770_v19 = vadd.f32 1.4214138, %v3754_v29 }
 0xaba   : > { %v3796_v8 = vadd.f32 -0.28449672, %v3780_v54  ;;  %v3781_v14 = vmul.f32 %v8300_v23, %v3765_v36  ;;  %v7140_v1 = vmov -1.0   ;;  %v3772_v20 = vadd.f32 1.4214138, %v3756_v32 }
 0xabb   : > { %v3810_v13 = vmul.f32 %v8278_v48, %v3794_v58  ;;  %v3795_v27 = vadd.f32 -0.28449672, %v3779_v28  ;;  %v6507_v58 = vpop.eup %6506  ;;  %v3618_v5 = vsel %vm3602_vm3, 1.0, %v7140_v1  ;;  %v3786_v28 = vmul.f32 %v8308_v50, %v3770_v19 }
 0xabc   : > { %v3812_v63 = vmul.f32 %v8281_v53, %v3796_v8  ;;  %v3797_v57 = vadd.f32 -0.28449672, %v3781_v14  ;;  %v6509_v8 = vpop.eup %6508  ;;  %v3620_v25 = vsel %vm3604_vm4, 1.0, %v7140_v1  ;;  %6516 = vpow2.f32 %v3910_v38 }
 0xabd   : > { %v3826_v41 = vadd.f32 0.2548296, %v3810_v13  ;;  %v3811_v54 = vmul.f32 %v8293_v11, %v3795_v27  ;;  %v8337_v36 = vpop.eup %6510  ;;  %v3802_v22 = vadd.f32 -0.28449672, %v3786_v28  ;;  %v3885_v27 = vmul.f32 %v3869_v44, %v8296_v18 }
 0xabe   : > { %v3828_v24 = vadd.f32 0.2548296, %v3812_v63  ;;  %v3739_v63 = vadd.f32 -1.4531521, %v3723_v46  ;;  %v3788_v14 = vmul.f32 %v8315_v9, %v3772_v20  ;;  %v8352_v18 = vrot.slane %v8225_v52, %v1171_v60 }
 0xabf   : > { %v3842_v49 = vmul.f32 %v8278_v48, %v3826_v41  ;;  %v3827_v13 = vadd.f32 0.2548296, %v3811_v54  ;;  %v3813_v48 = vmul.f32 %v8300_v23, %v3797_v57  ;;  %v3908_v41 = vmul.f32 1.442695, %v3883_v40 }
 0xac0   : > { %v3844_v12 = vmul.f32 %v8281_v53, %v3828_v24  ;;  %v6513_v53 = vpop.eup %6512  ;;  %v3755_v29 = vmul.f32 %v8323_v33, %v3739_v63  ;;  %v3725_v24 = vmul.f32 1.0614054, %v8337_v36  ;;  %v3818_v38 = vmul.f32 %v8308_v50, %v3802_v22 }
 0xac1   : > { %v3922_v21 = vmul.f32 %v6505_v45, %v3842_v49  ;;  %v3843_v6 = vmul.f32 %v8293_v11, %v3827_v13  ;;  %v3829_v54 = vadd.f32 0.2548296, %v3813_v48  ;;  %v3804_v45 = vadd.f32 -0.28449672, %v3788_v14  ;;  %v6515_v60 = vpop.eup %6514 }
 0xac2   : > { %v3924_v34 = vmul.f32 %v6507_v58, %v3844_v12  ;;  %v3771_v49 = vadd.f32 1.4214138, %v3755_v29  ;;  %v3741_v40 = vadd.f32 -1.4531521, %v3725_v24  ;;  %v3834_v57 = vadd.f32 0.2548296, %v3818_v38 }
 0xac3   : > { %v3938_v44 = vsub.f32 1.0, %v3922_v21  ;;  %6518 = vpow2.f32 %v3908_v41  ;;  %v3912_v19 = vmul.f32 1.442695, %v3885_v27  ;;  %v3820_v58 = vmul.f32 %v8315_v9, %v3804_v45 }
 0xac4   : > { %v3787_v11 = vmul.f32 %v8323_v33, %v3771_v49  ;;  %v3757_v32 = vmul.f32 %v8337_v36, %v3741_v40  ;;  %v3940_v46 = vsub.f32 1.0, %v3924_v34  ;;  %v3923_v12 = vmul.f32 %v6509_v8, %v3843_v6 }
 0xac5   : > { %v3845_v13 = vmul.f32 %v8300_v23, %v3829_v54  ;;  %v3850_v48 = vmul.f32 %v8308_v50, %v3834_v57  ;;  %v3836_v28 = vadd.f32 0.2548296, %v3820_v58  ;;  %v8363_v21 = vrot.slane %v8225_v52, %v2744_v47 }
 0xac6   : > { %v3803_v20 = vadd.f32 -0.28449672, %v3787_v11  ;;  %v3773_v63 = vadd.f32 1.4214138, %v3757_v32  ;;  %v3954_v22 = vmul.f32 %v3938_v44, %v3618_v5  ;;  %v3619_v41 = vsel %vm3603_vm5, 1.0, %v7140_v1  ;;  %v6517_v8 = vpop.eup %6516 }
 0xac7   : > { %v3930_v27 = vmul.f32 %v6515_v60, %v3850_v48  ;;  %6520 = vpow2.f32 %v3912_v19  ;;  %v3626_v23 = vsel %vm3610_vm6, 1.0, %v7140_v1  ;;  %v3852_v50 = vmul.f32 %v8315_v9, %v3836_v28 }
 0xac8   : > { %v3819_v14 = vmul.f32 %v8323_v33, %v3803_v20  ;;  %v3789_v29 = vmul.f32 %v8337_v36, %v3773_v63  ;;  %v3939_v47 = vsub.f32 1.0, %v3923_v12  ;;  %v3925_v24 = vmul.f32 %v6513_v53, %v3845_v13 }
 0xac9   : > { %v3946_v5 = vsub.f32 1.0, %v3930_v27  ;;  %v3956_v7 = vmul.f32 %v3940_v46, %v3620_v25  ;;  %v3932_v34 = vmul.f32 %v6517_v8, %v3852_v50  ;;  %v3970_v38 = vadd.f32 1.0, %v3954_v22 }
 0xaca   : > { %v3835_v6 = vadd.f32 0.2548296, %v3819_v14  ;;  %v3805_v54 = vadd.f32 -0.28449672, %v3789_v29  ;;  %v3628_v9 = vsel %vm3612_vm7, 1.0, %v7140_v1  ;;  %v3955_v57 = vmul.f32 %v3939_v47, %v3619_v41 }
 0xacb   : > { %v3962_v45 = vmul.f32 %v3946_v5, %v3626_v23  ;;  %v3948_v49 = vsub.f32 1.0, %v3932_v34  ;;  %v3941_v30 = vsub.f32 1.0, %v3925_v24  ;;  %v3972_v19 = vadd.f32 1.0, %v3956_v7 }
 0xacc   : > { %v3851_v40 = vmul.f32 %v8323_v33, %v3835_v6  ;;  %v3821_v53 = vmul.f32 %v8337_v36, %v3805_v54  ;;  %v3986_v62 = vmul.f32 %v3970_v38, %v8285_v59  ;;  %v3621_v46 = vsel %vm3605_vm8, 1.0, %v7140_v1  ;;  %v6326_v38 = vld [vmem:[%s7783_s2 + $0x100] ss:$8 sps:$4 sm:$0xff]  }
 0xacd   : > { %v6519_v44 = vpop.eup %6518  ;;  %v3978_v25 = vadd.f32 1.0, %v3962_v45  ;;  %v3964_v58 = vmul.f32 %v3948_v49, %v3628_v9  ;;  %v3580_v33 = vmul.f32 0.5, %v8260_v26  ;;  %v3627_v48 = vsel %vm3611_vm9, 1.0, %v7140_v1 }
 0xace   : > { %v3931_v11 = vmul.f32 %v6519_v44, %v3851_v40  ;;  %v3837_v32 = vadd.f32 0.2548296, %v3821_v53  ;;  %v3971_v20 = vadd.f32 1.0, %v3955_v57  ;;  %v3957_v63 = vmul.f32 %v3941_v30, %v3621_v46  ;;  %v6331_v44 = vld [vmem:[%s7783_s2 + $0x114] ss:$8 sps:$4 sm:$0xff]  }
 0xacf   : > { %v3994_v12 = vmul.f32 %v3978_v25, %v3578_v43  ;;  %v3980_v13 = vadd.f32 1.0, %v3964_v58  ;;  %v8390_v59 = vmul.f32 %v3972_v19, %v8287_v0  ;;  %v3571_v26 = vmul.f32 0.5, %v8237_v2 }
 0xad0   : > { %v3947_v60 = vsub.f32 1.0, %v3931_v11  ;;  %v3853_v28 = vmul.f32 %v8337_v36, %v3837_v32  ;;  %v8398_v8 = vrot.slane %v8225_v52, %v1175_v61  ;;  %v3579_v23 = vmul.f32 0.5, %v8262_v15  ;;  %v6329_v32 = vld [vmem:[%s7783_s2 + $0x110] ss:$8 sps:$4 sm:$0xff]  }
 0xad1   : > { %v6521_v39 = vpop.eup %6520  ;;  %v4002_v22 = vpack.c.bf16 %v3994_v12, %v3986_v62  ;;  %v8392_v10 = vmul.f32 %v3980_v13, %v3580_v33  ;;  %v3987_v50 = vmul.f32 %v3971_v20, %v3571_v26  ;;  %v3973_v14 = vadd.f32 1.0, %v3957_v63  ;;  %v6334_v12 = vld [vmem:[%s7783_s2 + $0x124] ss:$8 sps:$4 sm:$0xff]   ;;  %v6332_v20 = vld [vmem:[%s7783_s2 + $0x120] ss:$8 sps:$4 sm:$0xff]  }
 0xad2   : > { %v3963_v41 = vmul.f32 %v3947_v60, %v3627_v48  ;;  %v3933_v27 = vmul.f32 %v6521_v39, %v3853_v28  ;;  %v3629_v29 = vsel %vm3613_vm10, 1.0, %v7140_v1  ;;  %v8407_v2 = vrot.slane %v8225_v52, %v2748_v51 }
 0xad3   : > { %v4004_v36 = vpack.c.bf16 %v8392_v10, %v8390_v59  ;;  %v3573_v54 = vmul.f32 0.5, %v8239_v3  ;;  %v3581_v51 = vmul.f32 0.5, %v8272_v42  ;;  %v6380_v10 = vld [vmem:[%s7783_s2 + $0x220] ss:$8 sps:$4 sm:$0xff]  }
 0xad4   : > { %v3979_v4 = vadd.f32 1.0, %v3963_v41  ;;  %v3949_v0 = vsub.f32 1.0, %v3933_v27  ;;  %v6337_v41 = vld [vmem:[%s7783_s2 + $0x134] ss:$8 sps:$4 sm:$0xff]  }
 0xad5   : > { %v3989_v30 = vmul.f32 %v3973_v14, %v3573_v54  ;;  %v6340_v14 = vld [vmem:[%s7783_s2 + $0x144] ss:$8 sps:$4 sm:$0xff]  }
 0xad6   : > { %v3995_v61 = vmul.f32 %v3979_v4, %v3579_v23  ;;  %v3965_v5 = vmul.f32 %v3949_v0, %v3629_v29  ;;  %v6335_v4 = vld [vmem:[%s7783_s2 + $0x130] ss:$8 sps:$4 sm:$0xff]  }
 0xad8   : > { %v3981_v45 = vadd.f32 1.0, %v3965_v5  ;;  %v4003_v9 = vpack.c.bf16 %v3995_v61, %v3987_v50  ;;  %v6338_v61 = vld [vmem:[%s7783_s2 + $0x140] ss:$8 sps:$4 sm:$0xff]  }
 0xad9   : > { %v3518_v47 = vpop.f32.mrb[20].mxu1  ;;  %v3561_v24 = vpop.f32.mrb[36].mxu0 }
 0xada   : > { %v8410_v7 = vadd.f32 %v3518_v47, %v8352_v18  ;;  %v8413_v15 = vadd.f32 %v3561_v24, %v8363_v21  ;;  %v3520_v34 = vpop.f32.mrb[21].mxu1  ;;  %v3563_v6 = vpop.f32.mrb[37].mxu0  ;;  %v3997_v25 = vmul.f32 %v3981_v45, %v3581_v51  ;;  %4822 = vmatprep.mubr.bf16.mxu1 %v4003_v9 }
 0xadb   : > { %v8418_v43 = vadd.f32 %v3520_v34, %v8398_v8  ;;  %v3522_v31 = vpop.f32.mrb[22].mxu1  ;;  %v3565_v52 = vpop.f32.mrb[38].mxu0  ;;  %v8435_v19 = vadd.f32 %v3563_v6, %v8407_v2  ;;  %4823 = vmatmul.mubr.bf16.vlgmr.msra.gmra.mrb[24].mxu1 %v4002_v22 }
 0xadc   : > { %v8422_v49 = vmul.f32 0.70710677, %v8410_v7  ;;  %v3524_v40 = vpop.f32.mrb[23].mxu1  ;;  %v8424_v53 = vpop.f32.mrb[39].mxu0  ;;  %v8428_v3 = vmul.f32 0.70710677, %v8413_v15  ;;  %4834 = vmatpush1.bf16.msra.mxu1 %v6326_v38  ;;  %v4005_v11 = vpack.c.bf16 %v3997_v25, %v3989_v30  ;;  %v8451_v39 = vadd.f32 %v3522_v31, %v8352_v18 }
 0xadd   : > { %v8431_v57 = vmul.f32 0.70710677, %v8418_v43  ;;  %4835 = vmatprep.subr.bf16.mxu1 %v6331_v44  ;;  %v8447_v48 = vmul.f32 0.70710677, %v8435_v19  ;;  %v8463_v23 = vadd.f32 %v3565_v52, %v8363_v21  ;;  %v8470_v50 = vadd.f32 %v3524_v40, %v8398_v8  ;;  %v6343_v8 = vld [vmem:[%s7783_s2 + $0x154] ss:$8 sps:$4 sm:$0xff]  }
 0xade   : > { %v3638_v42 = vand.u32 2147483647, %v8422_v49  ;;  %v8438_v58 = vand.u32 2147483647, %v8428_v3  ;;  %4865 = vmatprep.mubr.bf16.mxu1 %v4005_v11  ;;  %v8460_v26 = vmul.f32 0.70710677, %v8451_v39  ;;  %v8497_v9 = vadd.f32 %v8424_v53, %v8407_v2 }
 0xadf   : > { %v8444_v33 = vand.u32 2147483647, %v8431_v57  ;;  %v8455_v63 = vand.u32 2147483647, %v8447_v48  ;;  %v8475_v24 = vmul.f32 0.70710677, %v8463_v23 }
 0xae0   : > { %v3654_v62 = vmul.f32 0.3275911, %v3638_v42  ;;  %v3656_v46 = vmul.f32 0.3275911, %v8438_v58  ;;  %4836 = vmatpush1.bf16.msra.mxu1 %v6329_v32  ;;  %v8467_v0 = vand.u32 2147483647, %v8460_v26 }
 0xae1   : > { %v3655_v28 = vmul.f32 0.3275911, %v8444_v33  ;;  %4837 = vmatprep.subr.bf16.mxu1 %v6334_v12  ;;  %v3657_v27 = vmul.f32 0.3275911, %v8455_v63  ;;  %v3862_v29 = vsub.f32 0.0, %v3638_v42  ;;  %v3864_v38 = vsub.f32 0.0, %v8438_v58 }
 0xae2   : > { %v3670_v13 = vadd.f32 1.0, %v3654_v62  ;;  %v3672_v60 = vadd.f32 1.0, %v3656_v46  ;;  %v3662_v47 = vmul.f32 0.3275911, %v8467_v0  ;;  %v8478_v21 = vmul.f32 0.70710677, %v8470_v50 }
 0xae3   : > { %v3671_v22 = vadd.f32 1.0, %v3655_v28  ;;  %v3673_v18 = vadd.f32 1.0, %v3657_v27  ;;  %v8482_v34 = vand.u32 2147483647, %v8475_v24  ;;  %v3878_v54 = vmul.f32 %v3862_v29, %v3638_v42  ;;  %v6341_v40 = vld [vmem:[%s7783_s2 + $0x150] ss:$8 sps:$4 sm:$0xff]  }
 0xae4   : > { %6522 = vrcp.f32 %v3670_v13  ;;  %4838 = vmatpush1.bf16.msra.mxu1 %v6332_v20  ;;  %v3678_v5 = vadd.f32 1.0, %v3662_v47  ;;  %v8489_v31 = vand.u32 2147483647, %v8478_v21  ;;  %v3863_v30 = vsub.f32 0.0, %v8444_v33  ;;  %v6346_v32 = vld [vmem:[%s7783_s2 + $0x164] ss:$8 sps:$4 sm:$0xff]  }
 0xae5   : > { %6524 = vrcp.f32 %v3672_v60  ;;  %4839 = vmatprep.subr.bf16.mxu1 %v6337_v41  ;;  %v3664_v45 = vmul.f32 0.3275911, %v8482_v34  ;;  %v3898_v46 = vmul.f32 1.442695, %v3878_v54  ;;  %v3880_v2 = vmul.f32 %v3864_v38, %v8438_v58  ;;  %v6344_v58 = vld [vmem:[%s7783_s2 + $0x160] ss:$8 sps:$4 sm:$0xff]  }
 0xae6   : > { %6526 = vrcp.f32 %v3671_v22  ;;  %v3663_v25 = vmul.f32 0.3275911, %v8489_v31  ;;  %v8510_v28 = vmul.f32 0.70710677, %v8497_v9  ;;  %v3879_v41 = vmul.f32 %v3863_v30, %v8444_v33  ;;  %v6347_v38 = vld [vmem:[%s7783_s2 + $0x170] ss:$8 sps:$4 sm:$0xff]  }
 0xae7   : > { %6528 = vrcp.f32 %v3673_v18  ;;  %v3680_v11 = vadd.f32 1.0, %v3664_v45  ;;  %v3870_v27 = vsub.f32 0.0, %v8467_v0  ;;  %v6349_v18 = vld [vmem:[%s7783_s2 + $0x174] ss:$8 sps:$4 sm:$0xff]   ;;  %vm3606_vm11 = vcmp.ge.f32.partialorder %v8422_v49, 0.0 }
 0xae8   : > { %4840 = vmatpush1.bf16.msra.mxu1 %v6335_v4  ;;  %6530 = vrcp.f32 %v3678_v5  ;;  %v3679_v53 = vadd.f32 1.0, %v3663_v25  ;;  %v8523_v54 = vand.u32 2147483647, %v8510_v28  ;;  %v3900_v45 = vmul.f32 1.442695, %v3879_v41 }
 0xae9   : > { %4841 = vmatprep.subr.bf16.mxu1 %v6340_v14  ;;  %6532 = vrcp.f32 %v3680_v11  ;;  %v6352_v30 = vld [vmem:[%s7783_s2 + $0x184] ss:$8 sps:$4 sm:$0xff]   ;;  %vm3608_vm12 = vcmp.ge.f32.partialorder %v8428_v3, 0.0  ;;  %vm3607_vm13 = vcmp.ge.f32.partialorder %v8431_v57, 0.0  ;;  %vm3614_vm14 = vcmp.ge.f32.partialorder %v8460_v26, 0.0 }
 0xaea   : > { %6534 = vrcp.f32 %v3679_v53  ;;  %v3873_v49 = vsub.f32 0.0, %v8523_v54  ;;  %v3623_v3 = vsel %vm3607_vm13, 1.0, %v7140_v1  ;;  %vm3616_vm15 = vcmp.ge.f32.partialorder %v8475_v24, 0.0  ;;  %v6368_v24 = vld [vmem:[%s7783_s2 + $0x1e0] ss:$8 sps:$4 sm:$0xff]  }
 0xaeb   : > { %6536 = vpow2.f32 %v3898_v46  ;;  %v3665_v46 = vmul.f32 0.3275911, %v8523_v54  ;;  %vm3615_vm0 = vcmp.ge.f32.partialorder %v8478_v21, 0.0  ;;  %vm3609_vm1 = vcmp.ge.f32.partialorder %v8447_v48, 0.0 }
 0xaec   : > { %4842 = vmatpush1.bf16.msra.mxu1 %v6338_v61  ;;  %v3902_v61 = vmul.f32 1.442695, %v3880_v2  ;;  %v3865_v2 = vsub.f32 0.0, %v8455_v63  ;;  %vm3617_vm2 = vcmp.ge.f32.partialorder %v8510_v28, 0.0  ;;  %v6377_v28 = vld [vmem:[%s7783_s2 + $0x210] ss:$8 sps:$4 sm:$0xff]  }
 0xaed   : > { %4843 = vmatprep.subr.bf16.mxu1 %v6343_v8  ;;  %v3681_v41 = vadd.f32 1.0, %v3665_v46 }
 0xaee   : > { %v8485_v6 = vpop.eup %6522  ;;  %6538 = vpow2.f32 %v3902_v61  ;;  %v3881_v46 = vmul.f32 %v3865_v2, %v8455_v63  ;;  %v3622_v63 = vsel %vm3606_vm11, 1.0, %v7140_v1 }
 0xaef   : > { %v8491_v52 = vpop.eup %6524  ;;  %v3718_v51 = vmul.f32 1.0614054, %v8485_v6  ;;  %6540 = vrcp.f32 %v3681_v41 }
 0xaf0   : > { %v3720_v44 = vmul.f32 1.0614054, %v8491_v52  ;;  %v8504_v62 = vpop.eup %6526  ;;  %4844 = vmatpush1.bf16.msra.mxu1 %v6341_v40  ;;  %v3886_v40 = vmul.f32 %v3870_v27, %v8467_v0  ;;  %v3871_v0 = vsub.f32 0.0, %v8489_v31  ;;  %6542 = vpow2.f32 %v3900_v45 }
 0xaf1   : > { %v3734_v42 = vadd.f32 -1.4531521, %v3718_v51  ;;  %v3719_v60 = vmul.f32 1.0614054, %v8504_v62  ;;  %v8512_v20 = vpop.eup %6528  ;;  %4845 = vmatprep.subr.bf16.mxu1 %v6346_v32 }
 0xaf2   : > { %v3736_v12 = vadd.f32 -1.4531521, %v3720_v44  ;;  %v3721_v29 = vmul.f32 1.0614054, %v8512_v20  ;;  %v3872_v44 = vsub.f32 0.0, %v8482_v34  ;;  %v8531_v25 = vpop.eup %6530 }
 0xaf3   : > { %v3750_v13 = vmul.f32 %v8485_v6, %v3734_v42  ;;  %v3735_v14 = vadd.f32 -1.4531521, %v3719_v60  ;;  %v3726_v53 = vmul.f32 1.0614054, %v8531_v25 }
 0xaf4   : > { %v3752_v22 = vmul.f32 %v8491_v52, %v3736_v12  ;;  %v3737_v8 = vadd.f32 -1.4531521, %v3721_v29  ;;  %4846 = vmatpush1.bf16.msra.mxu1 %v6344_v58 }
 0xaf5   : > { %v3766_v4 = vadd.f32 1.4214138, %v3750_v13  ;;  %v3751_v33 = vmul.f32 %v8504_v62, %v3735_v14  ;;  %4847 = vmatprep.subr.bf16.mxu1 %v6349_v18  ;;  %v3742_v58 = vadd.f32 -1.4531521, %v3726_v53  ;;  %v6350_v18 = vld [vmem:[%s7783_s2 + $0x180] ss:$8 sps:$4 sm:$0xff]   ;;  %v8542_v14 = vpop.eup %6532 }
 0xaf6   : > { %v3768_v47 = vadd.f32 1.4214138, %v3752_v22  ;;  %v3753_v32 = vmul.f32 %v8512_v20, %v3737_v8  ;;  %v8546_v8 = vpop.eup %6534  ;;  %v6358_v53 = vld [vmem:[%s7783_s2 + $0x1a4] ss:$8 sps:$4 sm:$0xff]  }
 0xaf7   : > { %v3782_v5 = vmul.f32 %v8485_v6, %v3766_v4  ;;  %v3767_v11 = vadd.f32 1.4214138, %v3751_v33  ;;  %v3914_v4 = vmul.f32 1.442695, %v3886_v40  ;;  %v6355_v33 = vld [vmem:[%s7783_s2 + $0x194] ss:$8 sps:$4 sm:$0xff]   ;;  %v3758_v61 = vmul.f32 %v8531_v25, %v3742_v58 }
 0xaf8   : > { %v3784_v51 = vmul.f32 %v8491_v52, %v3768_v47  ;;  %v3769_v22 = vadd.f32 1.4214138, %v3753_v32  ;;  %4848 = vmatpush1.bf16.msra.mxu1 %v6347_v38  ;;  %v3887_v38 = vmul.f32 %v3871_v0, %v8489_v31 }
 0xaf9   : > { %v3798_v42 = vadd.f32 -0.28449672, %v3782_v5  ;;  %v3783_v60 = vmul.f32 %v8504_v62, %v3767_v11  ;;  %v3888_v5 = vmul.f32 %v3872_v44, %v8482_v34  ;;  %4849 = vmatprep.subr.bf16.mxu1 %v6352_v30  ;;  %v3727_v34 = vmul.f32 1.0614054, %v8546_v8  ;;  %v6353_v44 = vld [vmem:[%s7783_s2 + $0x190] ss:$8 sps:$4 sm:$0xff]   ;;  %v6537_v30 = vpop.eup %6536 }
 0xafa   : > { %v3800_v12 = vadd.f32 -0.28449672, %v3784_v51  ;;  %v3728_v51 = vmul.f32 1.0614054, %v8542_v14  ;;  %v3785_v11 = vmul.f32 %v8512_v20, %v3769_v22  ;;  %v3774_v45 = vadd.f32 1.4214138, %v3758_v61 }
 0xafb   : > { %v3814_v13 = vmul.f32 %v8485_v6, %v3798_v42  ;;  %v3799_v47 = vadd.f32 -0.28449672, %v3783_v60  ;;  %6544 = vpow2.f32 %v3914_v4  ;;  %v3918_v31 = vmul.f32 1.442695, %v3888_v5  ;;  %v6356_v4 = vld [vmem:[%s7783_s2 + $0x1a0] ss:$8 sps:$4 sm:$0xff]  }
 0xafc   : > { %v3816_v27 = vmul.f32 %v8491_v52, %v3800_v12  ;;  %v3744_v12 = vadd.f32 -1.4531521, %v3728_v51  ;;  %4850 = vmatpush1.bf16.msra.mxu1 %v6350_v18  ;;  %v3743_v0 = vadd.f32 -1.4531521, %v3727_v34  ;;  %v8559_v60 = vmul.f32 0.5, %v8410_v7  ;;  %v6539_v51 = vpop.eup %6538 }
 0xafd   : > { %v3830_v29 = vadd.f32 0.2548296, %v3814_v13  ;;  %v3815_v42 = vmul.f32 %v8504_v62, %v3799_v47  ;;  %4851 = vmatprep.subr.bf16.mxu1 %v6355_v33  ;;  %v3790_v22 = vmul.f32 %v8531_v25, %v3774_v45  ;;  %6546 = vpow2.f32 %v3918_v31  ;;  %v6361_v61 = vld [vmem:[%s7783_s2 + $0x1b4] ss:$8 sps:$4 sm:$0xff]   ;;  %v6359_v34 = vld [vmem:[%s7783_s2 + $0x1b0] ss:$8 sps:$4 sm:$0xff]  }
 0xafe   : > { %v3832_v40 = vadd.f32 0.2548296, %v3816_v27  ;;  %v3760_v41 = vmul.f32 %v8542_v14, %v3744_v12  ;;  %v3801_v27 = vadd.f32 -0.28449672, %v3785_v11  ;;  %v3759_v58 = vmul.f32 %v8546_v8, %v3743_v0  ;;  %v6364_v31 = vld [vmem:[%s7783_s2 + $0x1c4] ss:$8 sps:$4 sm:$0xff]  }
 0xaff   : > { %v3846_v32 = vmul.f32 %v8485_v6, %v3830_v29  ;;  %v3831_v13 = vadd.f32 0.2548296, %v3815_v42  ;;  %v3916_v6 = vmul.f32 1.442695, %v3887_v38  ;;  %v3904_v29 = vmul.f32 1.442695, %v3881_v46 }
 0xb00   : > { %v3848_v2 = vmul.f32 %v8491_v52, %v3832_v40  ;;  %v3806_v7 = vadd.f32 -0.28449672, %v3790_v22  ;;  %v3776_v47 = vadd.f32 1.4214138, %v3760_v41  ;;  %4852 = vmatpush1.bf16.msra.mxu1 %v6353_v44  ;;  %v3775_v33 = vadd.f32 1.4214138, %v3759_v58  ;;  %v8575_v40 = vpop.eup %6540 }
 0xb01   : > { %v3926_v18 = vmul.f32 %v6537_v30, %v3846_v32  ;;  %v3847_v5 = vmul.f32 %v8504_v62, %v3831_v13  ;;  %4853 = vmatprep.subr.bf16.mxu1 %v6358_v53  ;;  %6548 = vpow2.f32 %v3916_v6  ;;  %v3817_v62 = vmul.f32 %v8512_v20, %v3801_v27  ;;  %v6543_v44 = vpop.eup %6542  ;;  %v6362_v58 = vld [vmem:[%s7783_s2 + $0x1c0] ss:$8 sps:$4 sm:$0xff]  }
 0xb02   : > { %v3822_v52 = vmul.f32 %v8531_v25, %v3806_v7  ;;  %v3792_v38 = vmul.f32 %v8542_v14, %v3776_v47  ;;  %v3928_v42 = vmul.f32 %v6539_v51, %v3848_v2  ;;  %v3791_v11 = vmul.f32 %v8546_v8, %v3775_v33 }
 0xb03   : > { %v3942_v30 = vsub.f32 1.0, %v3926_v18  ;;  %6550 = vpow2.f32 %v3904_v29  ;;  %v3624_v45 = vsel %vm3608_vm12, 1.0, %v7140_v1  ;;  %v3927_v12 = vmul.f32 %v6543_v44, %v3847_v5 }
 0xb04   : > { %v3838_v32 = vadd.f32 0.2548296, %v3822_v52  ;;  %v3808_v46 = vadd.f32 -0.28449672, %v3792_v38  ;;  %4854 = vmatpush1.bf16.msra.mxu1 %v6356_v4  ;;  %v3807_v53 = vadd.f32 -0.28449672, %v3791_v11  ;;  %v3889_v13 = vmul.f32 %v3873_v49, %v8523_v54 }
 0xb05   : > { %4855 = vmatprep.subr.bf16.mxu1 %v6361_v61  ;;  %v3729_v41 = vmul.f32 1.0614054, %v8575_v40  ;;  %v6545_v6 = vpop.eup %6544  ;;  %v3944_v2 = vsub.f32 1.0, %v3928_v42  ;;  %v3833_v27 = vadd.f32 0.2548296, %v3817_v62  ;;  %v3958_v4 = vmul.f32 %v3942_v30, %v3622_v63 }
 0xb06   : > { %v3854_v0 = vmul.f32 %v8531_v25, %v3838_v32  ;;  %v3824_v22 = vmul.f32 %v8542_v14, %v3808_v46  ;;  %v3823_v54 = vmul.f32 %v8546_v8, %v3807_v53  ;;  %v6367_v25 = vld [vmem:[%s7783_s2 + $0x1d4] ss:$8 sps:$4 sm:$0xff]   ;;  %v3943_v47 = vsub.f32 1.0, %v3927_v12  ;;  %v6365_v30 = vld [vmem:[%s7783_s2 + $0x1d0] ss:$8 sps:$4 sm:$0xff]  }
 0xb07   : > { %v3745_v7 = vadd.f32 -1.4531521, %v3729_v41  ;;  %v3630_v5 = vsel %vm3614_vm14, 1.0, %v7140_v1  ;;  %v3920_v49 = vmul.f32 1.442695, %v3889_v13  ;;  %v6547_v51 = vpop.eup %6546  ;;  %v3960_v52 = vmul.f32 %v3944_v2, %v3624_v45 }
 0xb08   : > { %v3934_v18 = vmul.f32 %v6545_v6, %v3854_v0  ;;  %v3840_v29 = vadd.f32 0.2548296, %v3824_v22  ;;  %4856 = vmatpush1.bf16.msra.mxu1 %v6359_v34  ;;  %v3839_v33 = vadd.f32 0.2548296, %v3823_v54  ;;  %v3849_v38 = vmul.f32 %v8512_v20, %v3833_v27  ;;  %v6370_v45 = vld [vmem:[%s7783_s2 + $0x1e4] ss:$8 sps:$4 sm:$0xff]  }
 0xb09   : > { %4857 = vmatprep.subr.bf16.mxu1 %v6364_v31  ;;  %v3761_v63 = vmul.f32 %v8575_v40, %v3745_v7  ;;  %v3974_v62 = vadd.f32 1.0, %v3958_v4  ;;  %v3959_v32 = vmul.f32 %v3943_v47, %v3623_v3  ;;  %6552 = vpow2.f32 %v3920_v49  ;;  %v6373_v4 = vld [vmem:[%s7783_s2 + $0x1f4] ss:$8 sps:$4 sm:$0xff]  }
 0xb0a   : > { %v3950_v57 = vsub.f32 1.0, %v3934_v18  ;;  %v3856_v61 = vmul.f32 %v8542_v14, %v3840_v29  ;;  %v3855_v26 = vmul.f32 %v8546_v8, %v3839_v33  ;;  %v3582_v14 = vmul.f32 0.5, %v8451_v39 }
 0xb0b   : > { %v6549_v42 = vpop.eup %6548  ;;  %v3777_v44 = vadd.f32 1.4214138, %v3761_v63  ;;  %v3632_v8 = vsel %vm3616_vm15, 1.0, %v7140_v1  ;;  %v3976_v31 = vadd.f32 1.0, %v3960_v52  ;;  %v3631_v39 = vsel %vm3615_vm0, 1.0, %v7140_v1 }
 0xb0c   : > { %v3966_v11 = vmul.f32 %v3950_v57, %v3630_v5  ;;  %v3936_v34 = vmul.f32 %v6547_v51, %v3856_v61  ;;  %4858 = vmatpush1.bf16.msra.mxu1 %v6362_v58  ;;  %v3935_v46 = vmul.f32 %v6549_v42, %v3855_v26  ;;  %v8616_v41 = vmul.f32 %v3974_v62, %v8559_v60  ;;  %v6376_v63 = vld [vmem:[%s7783_s2 + $0x204] ss:$8 sps:$4 sm:$0xff]   ;;  %v6374_v62 = vld [vmem:[%s7783_s2 + $0x200] ss:$8 sps:$4 sm:$0xff]  }
 0xb0d   : > { %4859 = vmatprep.subr.bf16.mxu1 %v6367_v25  ;;  %v6551_v20 = vpop.eup %6550  ;;  %v3793_v13 = vmul.f32 %v8575_v40, %v3777_v44  ;;  %v3576_v27 = vmul.f32 0.5, %v8413_v15  ;;  %v3975_v54 = vadd.f32 1.0, %v3959_v32  ;;  %v3584_v18 = vmul.f32 0.5, %v8463_v23  ;;  %v6371_v23 = vld [vmem:[%s7783_s2 + $0x1f0] ss:$8 sps:$4 sm:$0xff]  }
 0xb0e   : > { %v3982_v12 = vadd.f32 1.0, %v3966_v11  ;;  %v3952_v53 = vsub.f32 1.0, %v3936_v34  ;;  %v3929_v0 = vmul.f32 %v6551_v20, %v3849_v38  ;;  %v3951_v22 = vsub.f32 1.0, %v3935_v46  ;;  %v6379_v11 = vld [vmem:[%s7783_s2 + $0x214] ss:$8 sps:$4 sm:$0xff]  }
 0xb0f   : > { %v3809_v3 = vadd.f32 -0.28449672, %v3793_v13  ;;  %v3575_v7 = vmul.f32 0.5, %v8418_v43  ;;  %v3583_v15 = vmul.f32 0.5, %v8470_v50  ;;  %v8630_v47 = vmul.f32 %v3976_v31, %v3576_v27  ;;  %v6386_v20 = vld [vmem:[%s7783_s2 + $0x240] ss:$8 sps:$4 sm:$0xff]  }
 0xb10   : > { %v8618_v6 = vmul.f32 %v3982_v12, %v3582_v14  ;;  %v3968_v2 = vmul.f32 %v3952_v53, %v3632_v8  ;;  %4860 = vmatpush1.bf16.msra.mxu1 %v6365_v30  ;;  %v3967_v58 = vmul.f32 %v3951_v22, %v3631_v39  ;;  %v3945_v5 = vsub.f32 1.0, %v3929_v0  ;;  %v6382_v30 = vld [vmem:[%s7783_s2 + $0x224] ss:$8 sps:$4 sm:$0xff]   ;;  %v6391_v12 = vld [vmem:[%s7783_s2 + $0x254] ss:$8 sps:$4 sm:$0xff]  }
 0xb11   : > { %4861 = vmatprep.subr.bf16.mxu1 %v6370_v45  ;;  %v3825_v29 = vmul.f32 %v8575_v40, %v3809_v3  ;;  %v3991_v57 = vmul.f32 %v3975_v54, %v3575_v7  ;;  %v3625_v52 = vsel %vm3609_vm1, 1.0, %v7140_v1  ;;  %v3577_v32 = vmul.f32 0.5, %v8435_v19  ;;  %v6383_v19 = vld [vmem:[%s7783_s2 + $0x230] ss:$8 sps:$4 sm:$0xff]   ;;  %v6394_v53 = vld [vmem:[%s7783_s2 + $0x264] ss:$8 sps:$4 sm:$0xff]  }
 0xb12   : > { %v4006_v21 = vpack.c.bf16 %v8618_v6, %v8616_v41  ;;  %v3984_v60 = vadd.f32 1.0, %v3968_v2  ;;  %v3983_v25 = vadd.f32 1.0, %v3967_v58  ;;  %v3961_v26 = vmul.f32 %v3945_v5, %v3625_v52  ;;  %v6389_v8 = vld [vmem:[%s7783_s2 + $0x250] ss:$8 sps:$4 sm:$0xff]   ;;  %v6392_v13 = vld [vmem:[%s7783_s2 + $0x260] ss:$8 sps:$4 sm:$0xff]  }
 0xb13   : > { %v3841_v49 = vadd.f32 0.2548296, %v3825_v29  ;;  %v6553_v51 = vpop.eup %6552  ;;  %v3585_v14 = vmul.f32 0.5, %v8497_v9  ;;  %v6388_v9 = vld [vmem:[%s7783_s2 + $0x244] ss:$8 sps:$4 sm:$0xff]  }
 0xb14   : > { %v8632_v33 = vmul.f32 %v3984_v60, %v3584_v18  ;;  %4862 = vmatpush1.bf16.msra.mxu1 %v6368_v24  ;;  %v3999_v61 = vmul.f32 %v3983_v25, %v3583_v15  ;;  %v3977_v48 = vadd.f32 1.0, %v3961_v26  ;;  %v6397_v31 = vld [vmem:[%s7783_s2 + $0x274] ss:$8 sps:$4 sm:$0xff]   ;;  %v6395_v0 = vld [vmem:[%s7783_s2 + $0x270] ss:$8 sps:$4 sm:$0xff]  }
 0xb15   : > { %4863 = vmatprep.subr.bf16.mxu1 %v6373_v4  ;;  %v3857_v50 = vmul.f32 %v8575_v40, %v3841_v49  ;;  %v3633_v40 = vsel %vm3617_vm2, 1.0, %v7140_v1  ;;  %v6400_v39 = vld [vmem:[%s7783_s2 + $0x284] ss:$8 sps:$4 sm:$0xff]   ;;  %v6398_v22 = vld [vmem:[%s7783_s2 + $0x280] ss:$8 sps:$4 sm:$0xff]  }
 0xb16   : > { %v4008_v43 = vpack.c.bf16 %v8632_v33, %v8630_v47  ;;  %v4007_v38 = vpack.c.bf16 %v3999_v61, %v3991_v57  ;;  %v8653_v46 = vmul.f32 %v3977_v48, %v3577_v32  ;;  %v6403_v2 = vld [vmem:[%s7783_s2 + $0x294] ss:$8 sps:$4 sm:$0xff]   ;;  %v6401_v3 = vld [vmem:[%s7783_s2 + $0x290] ss:$8 sps:$4 sm:$0xff]   ;;  %v6406_v24 = vld [vmem:[%s7783_s2 + $0x2a4] ss:$8 sps:$4 sm:$0xff]  }
 0xb17   : > { %v3937_v42 = vmul.f32 %v6553_v51, %v3857_v50  ;;  %v6404_v27 = vld [vmem:[%s7783_s2 + $0x2a0] ss:$8 sps:$4 sm:$0xff]   ;;  %v6409_v54 = vld [vmem:[%s7783_s2 + $0x2b4] ss:$8 sps:$4 sm:$0xff]   ;;  %v6407_v58 = vld [vmem:[%s7783_s2 + $0x2b0] ss:$8 sps:$4 sm:$0xff]  }
 0xb18   : > { %4864 = vmatpush1.bf16.msra.mxu1 %v6371_v23  ;;  %v6412_v4 = vld [vmem:[%s7783_s2 + $0x2c4] ss:$8 sps:$4 sm:$0xff]   ;;  %v6410_v18 = vld [vmem:[%s7783_s2 + $0x2c0] ss:$8 sps:$4 sm:$0xff]   ;;  %v6415_v60 = vld [vmem:[%s7783_s2 + $0x2d4] ss:$8 sps:$4 sm:$0xff]  }
 0xb19   : > { %4876 = vmatprep.subr.bf16.mxu1 %v6376_v63  ;;  %v3953_v34 = vsub.f32 1.0, %v3937_v42  ;;  %v6413_v29 = vld [vmem:[%s7783_s2 + $0x2d0] ss:$8 sps:$4 sm:$0xff]   ;;  %v6418_v7 = vld [vmem:[%s7783_s2 + $0x2e4] ss:$8 sps:$4 sm:$0xff]  }
 0xb1a   : > { %v6416_v15 = vld [vmem:[%s7783_s2 + $0x2e0] ss:$8 sps:$4 sm:$0xff]   ;;  %v6421_v25 = vld [vmem:[%s7783_s2 + $0x2f4] ss:$8 sps:$4 sm:$0xff]   ;;  %v6419_v5 = vld [vmem:[%s7783_s2 + $0x2f0] ss:$8 sps:$4 sm:$0xff]  }
 0xb1b   : > { %4866 = vmatmul.mubr.bf16.vlgmr.msra.gmra.mrb[24].mxu1 %v4004_v36  ;;  %v3969_v44 = vmul.f32 %v3953_v34, %v3633_v40  ;;  %v6385_v36 = vld [vmem:[%s7783_s2 + $0x234] ss:$8 sps:$4 sm:$0xff]   ;;  %v6424_v49 = vld [vmem:[%s7783_s2 + $0x304] ss:$8 sps:$4 sm:$0xff]   ;;  %v6422_v23 = vld [vmem:[%s7783_s2 + $0x300] ss:$8 sps:$4 sm:$0xff]  }
 0xb1c   : > { %4877 = vmatpush1.bf16.msra.mxu1 %v6374_v62  ;;  %4908 = vmatprep.mubr.bf16.mxu1 %v4007_v38  ;;  %v6427_v57 = vld [vmem:[%s7783_s2 + $0x314] ss:$8 sps:$4 sm:$0xff]   ;;  %v6425_v61 = vld [vmem:[%s7783_s2 + $0x310] ss:$8 sps:$4 sm:$0xff]   ;;  %v6430_v63 = vld [vmem:[%s7783_s2 + $0x324] ss:$8 sps:$4 sm:$0xff]  }
 0xb1d   : > { %4878 = vmatprep.subr.bf16.mxu1 %v6379_v11  ;;  %v3985_v1 = vadd.f32 1.0, %v3969_v44  ;;  %v6428_v50 = vld [vmem:[%s7783_s2 + $0x320] ss:$8 sps:$4 sm:$0xff]   ;;  %v6433_v51 = vld [vmem:[%s7783_s2 + $0x334] ss:$8 sps:$4 sm:$0xff]  }
 0xb1e   : > { %v6431_v52 = vld [vmem:[%s7783_s2 + $0x330] ss:$8 sps:$4 sm:$0xff]   ;;  %v6436_v41 = vld [vmem:[%s7783_s2 + $0x344] ss:$8 sps:$4 sm:$0xff]   ;;  %v6434_v6 = vld [vmem:[%s7783_s2 + $0x340] ss:$8 sps:$4 sm:$0xff]  }
 0xb1f   : > { %v8655_v59 = vmul.f32 %v3985_v1, %v3585_v14  ;;  %v6437_v38 = vld [vmem:[%s7783_s2 + $0x350] ss:$8 sps:$4 sm:$0xff]   ;;  %v6442_v26 = vld [vmem:[%s7783_s2 + $0x364] ss:$8 sps:$4 sm:$0xff]   ;;  %v6440_v42 = vld [vmem:[%s7783_s2 + $0x360] ss:$8 sps:$4 sm:$0xff]  }
 0xb20   : > { %4879 = vmatpush1.bf16.msra.mxu1 %v6377_v28  ;;  %v6445_v62 = vld [vmem:[%s7783_s2 + $0x374] ss:$8 sps:$4 sm:$0xff]   ;;  %v6443_v11 = vld [vmem:[%s7783_s2 + $0x370] ss:$8 sps:$4 sm:$0xff]   ;;  %v6448_v34 = vld [vmem:[%s7783_s2 + $0x384] ss:$8 sps:$4 sm:$0xff]  }
 0xb21   : > { %4880 = vmatprep.subr.bf16.mxu1 %v6382_v30  ;;  %v4009_v45 = vpack.c.bf16 %v8655_v59, %v8653_v46  ;;  %v6446_v40 = vld [vmem:[%s7783_s2 + $0x380] ss:$8 sps:$4 sm:$0xff]   ;;  %v6451_v48 = vld [vmem:[%s7783_s2 + $0x394] ss:$8 sps:$4 sm:$0xff]   ;;  %v6449_v44 = vld [vmem:[%s7783_s2 + $0x390] ss:$8 sps:$4 sm:$0xff]  }
 0xb22   : > { %v6454_v28 = vld [vmem:[%s7783_s2 + $0x3a4] ss:$8 sps:$4 sm:$0xff]   ;;  %v6452_v30 = vld [vmem:[%s7783_s2 + $0x3a0] ss:$8 sps:$4 sm:$0xff]   ;;  %v6457_v32 = vld [vmem:[%s7783_s2 + $0x3b4] ss:$8 sps:$4 sm:$0xff]  }
 0xb23   : > { %v6455_v14 = vld [vmem:[%s7783_s2 + $0x3b0] ss:$8 sps:$4 sm:$0xff]   ;;  %v6460_v1 = vld [vmem:[%s7783_s2 + $0x3c4] ss:$8 sps:$4 sm:$0xff]   ;;  %v6458_v46 = vld [vmem:[%s7783_s2 + $0x3c0] ss:$8 sps:$4 sm:$0xff]  }
 0xb24   : > { %4881 = vmatpush1.bf16.msra.mxu1 %v6380_v10  ;;  %v6463_v59 = vld [vmem:[%s7783_s2 + $0x3d4] ss:$8 sps:$4 sm:$0xff]   ;;  %v6461_v10 = vld [vmem:[%s7783_s2 + $0x3d0] ss:$8 sps:$4 sm:$0xff]  }
 0xb25   : > { %4882 = vmatprep.subr.bf16.mxu1 %v6385_v36  ;;  %v6466_v36 = vld [vmem:[%s7783_s2 + $0x3e4] ss:$8 sps:$4 sm:$0xff]  }
 0xb28   : > { %4883 = vmatpush1.bf16.msra.mxu1 %v6383_v19  ;;  %v6469_v19 = vld [vmem:[%s7783_s2 + $0x3f4] ss:$8 sps:$4 sm:$0xff]  }
 0xb29   : > { %4884 = vmatprep.subr.bf16.mxu1 %v6388_v9  ;;  %v6467_v9 = vld [vmem:[%s7783_s2 + $0x3f0] ss:$8 sps:$4 sm:$0xff]  }
 0xb2c   : > { %4885 = vmatpush1.bf16.msra.mxu1 %v6386_v20  ;;  %v4138_v20 = vld [vmem:[%s854_s21] sm:$0x3] }
 0xb2d   : > { %4886 = vmatprep.subr.bf16.mxu1 %v6391_v12  ;;  %v4143_v12 = vrot.slane %v4138_v20, %v7910_v35 }
 0xb30   : > { %4887 = vmatpush1.bf16.msra.mxu1 %v6389_v8  ;;  %v4147_v8 = vrot.slane %v4138_v20, %v7915_v37 }
 0xb31   : > { %4888 = vmatprep.subr.bf16.mxu1 %v6394_v53 }
 0xb34   : > { %4889 = vmatpush1.bf16.msra.mxu1 %v6392_v13 }
 0xb35   : > { %4890 = vmatprep.subr.bf16.mxu1 %v6397_v31 }
 0xb38   : > { %4891 = vmatpush1.bf16.msra.mxu1 %v6395_v0 }
 0xb39   : > { %4892 = vmatprep.subr.bf16.mxu1 %v6400_v39 }
 0xb3c   : > { %4893 = vmatpush1.bf16.msra.mxu1 %v6398_v22 }
 0xb3d   : > { %4894 = vmatprep.subr.bf16.mxu1 %v6403_v2 }
 0xb40   : > { %4895 = vmatpush1.bf16.msra.mxu1 %v6401_v3 }
 0xb41   : > { %4896 = vmatprep.subr.bf16.mxu1 %v6406_v24 }
 0xb44   : > { %4897 = vmatpush1.bf16.msra.mxu1 %v6404_v27 }
 0xb45   : > { %4898 = vmatprep.subr.bf16.mxu1 %v6409_v54 }
 0xb48   : > { %4899 = vmatpush1.bf16.msra.mxu1 %v6407_v58 }
 0xb49   : > { %4900 = vmatprep.subr.bf16.mxu1 %v6412_v4 }
 0xb4c   : > { %4901 = vmatpush1.bf16.msra.mxu1 %v6410_v18 }
 0xb4d   : > { %4902 = vmatprep.subr.bf16.mxu1 %v6415_v60 }
 0xb50   : > { %4903 = vmatpush1.bf16.msra.mxu1 %v6413_v29 }
 0xb51   : > { %4904 = vmatprep.subr.bf16.mxu1 %v6418_v7 }
 0xb54   : > { %4905 = vmatpush1.bf16.msra.mxu1 %v6416_v15 }
 0xb55   : > { %4906 = vmatprep.subr.bf16.mxu1 %v6421_v25 }
 0xb58   : > { %4907 = vmatpush1.bf16.msra.mxu1 %v6419_v5 }
 0xb59   : > { %4919 = vmatprep.subr.bf16.mxu1 %v6424_v49 }
 0xb5b   : > { %4909 = vmatmul.mubr.bf16.vlgmr.msra.gmra.mrb[24].mxu1 %v4006_v21  ;;  %v6439_v21 = vld [vmem:[%s7783_s2 + $0x354] ss:$8 sps:$4 sm:$0xff]  }
 0xb5c   : > { %4920 = vmatpush1.bf16.msra.mxu1 %v6422_v23  ;;  %4951 = vmatprep.mubr.bf16.mxu1 %v4009_v45  ;;  %v6464_v45 = vld [vmem:[%s7783_s2 + $0x3e0] ss:$8 sps:$4 sm:$0xff]  }
 0xb5d   : > { %4921 = vmatprep.subr.bf16.mxu1 %v6427_v57 }
 0xb60   : > { %4922 = vmatpush1.bf16.msra.mxu1 %v6425_v61 }
 0xb61   : > { %4923 = vmatprep.subr.bf16.mxu1 %v6430_v63 }
 0xb64   : > { %4924 = vmatpush1.bf16.msra.mxu1 %v6428_v50 }
 0xb65   : > { %4925 = vmatprep.subr.bf16.mxu1 %v6433_v51 }
 0xb68   : > { %4926 = vmatpush1.bf16.msra.mxu1 %v6431_v52  ;;  %v4966_v52 = vld [vmem:[%s863_s20] sm:$0x3] }
 0xb69   : > { %4927 = vmatprep.subr.bf16.mxu1 %v6436_v41  ;;  %v4967_v41 = vld [vmem:[%s872_s28] sm:$0x3] }
 0xb6c   : > { %4928 = vmatpush1.bf16.msra.mxu1 %v6434_v6  ;;  %v5004_v6 = vrot.slane %v4966_v52, %v7910_v35 }
 0xb6d   : > { %4929 = vmatprep.subr.bf16.mxu1 %v6439_v21  ;;  %v5008_v21 = vrot.slane %v4966_v52, %v7915_v37 }
 0xb70   : > { %4930 = vmatpush1.bf16.msra.mxu1 %v6437_v38 }
 0xb71   : > { %4931 = vmatprep.subr.bf16.mxu1 %v6442_v26  ;;  %v5019_v26 = vrot.slane %v4967_v41, %v7910_v35 }
 0xb74   : > { %4932 = vmatpush1.bf16.msra.mxu1 %v6440_v42  ;;  %v5023_v42 = vrot.slane %v4967_v41, %v7915_v37 }
 0xb75   : > { %4933 = vmatprep.subr.bf16.mxu1 %v6445_v62 }
 0xb78   : > { %4934 = vmatpush1.bf16.msra.mxu1 %v6443_v11 }
 0xb79   : > { %4935 = vmatprep.subr.bf16.mxu1 %v6448_v34 }
 0xb7c   : > { %4936 = vmatpush1.bf16.msra.mxu1 %v6446_v40 }
 0xb7d   : > { %4937 = vmatprep.subr.bf16.mxu1 %v6451_v48 }
 0xb80   : > { %4938 = vmatpush1.bf16.msra.mxu1 %v6449_v44 }
 0xb81   : > { %4939 = vmatprep.subr.bf16.mxu1 %v6454_v28 }
 0xb84   : > { %4940 = vmatpush1.bf16.msra.mxu1 %v6452_v30 }
 0xb85   : > { %4941 = vmatprep.subr.bf16.mxu1 %v6457_v32 }
 0xb88   : > { %4942 = vmatpush1.bf16.msra.mxu1 %v6455_v14 }
 0xb89   : > { %4943 = vmatprep.subr.bf16.mxu1 %v6460_v1 }
 0xb8c   : > { %4944 = vmatpush1.bf16.msra.mxu1 %v6458_v46 }
 0xb8d   : > { %4945 = vmatprep.subr.bf16.mxu1 %v6463_v59 }
 0xb90   : > { %4946 = vmatpush1.bf16.msra.mxu1 %v6461_v10 }
 0xb91   : > { %4947 = vmatprep.subr.bf16.mxu1 %v6466_v36 }
 0xb94   : > { %4948 = vmatpush1.bf16.msra.mxu1 %v6464_v45 }
 0xb95   : > { %4949 = vmatprep.subr.bf16.mxu1 %v6469_v19 }
 0xb98   : > { %4950 = vmatpush1.bf16.msra.mxu1 %v6467_v9 }
 0xb9b   : > { %4952 = vmatmul.mubr.bf16.vlgmr.msra.gmra.mrb[24].mxu1 %v4008_v43 }
 0xc6e   : > { %v4953_v53 = vpop.f32.mrb[24].mxu1 }
 0xc6f   : > { %v5899_v13 = vadd.f32 %v4953_v53, %v4143_v12  ;;  %v4955_v31 = vpop.f32.mrb[25].mxu1 }
 0xc70   : > { %v5900_v0 = vadd.f32 %v4955_v31, %v4147_v8  ;;  %v4957_v39 = vpop.f32.mrb[26].mxu1 }
 0xc71   : > { %v4962_v22 = vadd.f32 %v5899_v13, %v8117_v55  ;;  %v5901_v2 = vadd.f32 %v4957_v39, %v4143_v12  ;;  %v4959_v3 = vpop.f32.mrb[27].mxu1 }
 0xc72   : > { %v4963_v24 = vadd.f32 %v5900_v0, %v8113_v16  ;;  %v5902_v27 = vadd.f32 %v4959_v3, %v4147_v8 }
 0xc73   : > { %v4964_v47 = vadd.f32 %v5901_v2, %v8119_v56 }
 0xc74   : > { %v4965_v33 = vadd.f32 %v5902_v27, %v8115_v17  ;;  %v4968_v43 = vadd.f32 %v4963_v24, %v4962_v22 }
 0xc76   : > { %4969 = vadd.xlane.f32.xlu0 %v4968_v43  ;;  %v4971_v54 = vadd.f32 %v4965_v33, %v4964_v47 }
 0xc78   : > { %4972 = vadd.xlane.f32.xlu1 %v4971_v54 }
 0xd03   : > { %v4970_v58 = vpop.xlane.xlu0 %4969 }
 0xd04   : > { %v4974_v4 = vmul.f32 0.00390625, %v4970_v58 }
 0xd05   : > { %v4973_v18 = vpop.xlane.xlu1 %4972 }
 0xd06   : > { %v4976_v60 = vsub.f32 %v4962_v22, %v4974_v4  ;;  %v4977_v29 = vsub.f32 %v4963_v24, %v4974_v4  ;;  %v4975_v7 = vmul.f32 0.00390625, %v4973_v18 }
 0xd08   : > { %v4978_v55 = vsub.f32 %v4964_v47, %v4975_v7  ;;  %v4979_v15 = vsub.f32 %v4965_v33, %v4975_v7  ;;  %v4980_v25 = vmul.f32 %v4976_v60, %v4976_v60  ;;  %v4981_v16 = vmul.f32 %v4977_v29, %v4977_v29 }
 0xd0a   : > { %v4984_v5 = vadd.f32 %v4981_v16, %v4980_v25  ;;  %v4982_v56 = vmul.f32 %v4978_v55, %v4978_v55  ;;  %v4983_v49 = vmul.f32 %v4979_v15, %v4979_v15 }
 0xd0c   : > { %4985 = vadd.xlane.f32.xlu0 %v4984_v5  ;;  %v4987_v17 = vadd.f32 %v4983_v49, %v4982_v56 }
 0xd0e   : > { %4988 = vadd.xlane.f32.xlu1 %v4987_v17 }
 0xd99   : > { %v4986_v23 = vpop.xlane.xlu0 %4985 }
 0xd9a   : > { %v4990_v57 = vmul.f32 0.00390625, %v4986_v23 }
 0xd9b   : > { %v4989_v61 = vpop.xlane.xlu1 %4988 }
 0xd9c   : > { %v4992_v63 = vadd.f32 1e-12, %v4990_v57  ;;  %v4991_v50 = vmul.f32 0.00390625, %v4989_v61 }
 0xd9e   : > { %6554 = vrsqrt.f32 %v4992_v63  ;;  %v4993_v51 = vadd.f32 1e-12, %v4991_v50 }
 0xda0   : > { %6556 = vrsqrt.f32 %v4993_v51 }
 0xda8   : > { %v6555_v38 = vpop.eup %6554 }
 0xda9   : > { %v4996_v62 = vmul.f32 %v6555_v38, %v4976_v60  ;;  %v4997_v11 = vmul.f32 %v6555_v38, %v4977_v29 }
 0xdaa   : > { %v6557_v34 = vpop.eup %6556 }
 0xdab   : > { %v5011_v40 = vmul.f32 %v5004_v6, %v4996_v62  ;;  %v5012_v48 = vmul.f32 %v5008_v21, %v4997_v11  ;;  %v4998_v44 = vmul.f32 %v6557_v34, %v4978_v55  ;;  %v4999_v28 = vmul.f32 %v6557_v34, %v4979_v15  ;;  %5037 = sbr.rel (%p5820_p8) target bundleno = 3507 (0xdb3), region = 156 }
 0xdad   : > { %v5026_v30 = vadd.f32 %v5019_v26, %v5011_v40  ;;  %v5027_v32 = vadd.f32 %v5023_v42, %v5012_v48  ;;  %v5013_v14 = vmul.f32 %v5004_v6, %v4998_v44  ;;  %v5014_v1 = vmul.f32 %v5008_v21, %v4999_v28 }
 0xdaf   : > { %5030 = vst [vmem:[#allocation2] sm:$0xff] %v5026_v30  ;;  %5031 = vst [vmem:[#allocation2 + $0x8] sm:$0xff] %v5027_v32  ;;  %v5028_v46 = vadd.f32 %v5019_v26, %v5013_v14  ;;  %v5029_v59 = vadd.f32 %v5023_v42, %v5014_v1 }
 0xdb0   : > { %5038 = vst [vmem:[#allocation23] sm:$0xff] (!%p5820_p8), %v5026_v30  ;;  %5039 = vst [vmem:[#allocation23 + $0x8] sm:$0xff] (!%p5820_p8), %v5027_v32 }
 0xdb1   : > { %5032 = vst [vmem:[#allocation2 + $0x10] sm:$0xff] %v5028_v46  ;;  %5033 = vst [vmem:[#allocation2 + $0x18] sm:$0xff] %v5029_v59 }
 0xdb2   : > { %5040 = vst [vmem:[#allocation23 + $0x10] sm:$0xff] %v5028_v46  ;;  %5041 = vst [vmem:[#allocation23 + $0x18] sm:$0xff] %v5029_v59 }
 0xdb3 PF: > { %s8902_s27 = sld [smem:[#allocation31_spill]]  ;;  %s7141_s26 = smov [#allocation23]  }
 0xdb4   : > { %s5048_s15 = sshll.u32 %s7141_s26, 4  ;;  %s5049_s15 = int_to_ptr.vmem [resolvable:$true] %s5048_s15 }
 0xdb5   : > { %s7034_s0 = scalar_lea.vmem %s5049_s15, 512  ;;  %p7041_p9 = scmp.lt.s32.totalorder %s5049_s15, %s5049_s15 }
 0xdb6   : > { %p7035_p0 = scmp.ne.s32.totalorder %s5049_s15, %s7034_s0  ;;  %p7042_p1 = scmp.lt.s32.totalorder %s7034_s0, %s7034_s0 }
 0xdb8   : > { %p7043_p6 = por %p7042_p1, %p7041_p9 }
 0xdb9   : > { %p6028_p5 = scmp.eq.s32.totalorder %s8902_s27, 1 }
 0xdbb   : > { %p7036_p2 = pnand %p7035_p0, %p6028_p5 }
 0xdbd   : > { %p7037_p7 = pneg %p7036_p2 }
 0xdbf   : > { %p7044_p11 = pnand %p7043_p6, %p7037_p7 }
 0xdc1   : > { %7047 = shalt.err (!%p7044_p11)
}
 0xdc2   : > { %s8903_s1 = sld [smem:[#allocation48_spill]] }
 0xdc8   : > { %s7048_s25 = scalar_lea.hbm %s8903_s1, 512 }
 0xdc9   : > { %p7049_p12 = scmp.ne.s32.totalorder %s8903_s1, %s7048_s25  ;;  %p7054_p3 = scmp.lt.u32.totalorder %s7048_s25, %s8903_s1 }
 0xdcb   : > { %p7050_p10 = pnand %p7049_p12, %p6028_p5 }
 0xdcd   : > { %p7051_p4 = pneg %p7050_p10 }
 0xdcf   : > { %p7056_p13 = pnand %p7054_p3, %p7051_p4 }
 0xdd1   : > { %7059 = shalt.err (!%p7056_p13)
}
 0xdd2   : > { %s7142_s23 = smov 256   ;;  %s7143_s24 = smov 16  }
 0xdd3   : > { %5966 = dma.vmem_to_hbm [thread:$0]  (%p6028_p5), %s5049_s15, 512, %s8903_s1, [#allocation5], %s7142_s23, %s7142_s23, %s7143_s24  }
 0xdd4   : > { %7093 = dma.done.wait (%p6028_p5), [#allocation5], 512  }
 0xdd5   : > { %7095 = vsyncadd (%p6028_p5), [#allocation5], 4294966784 }
 0xdd6 PF: > { %s8904_s24 = sld [smem:[#allocation32_spill]]  ;;  %s8905_s21 = sld [smem:[#allocation29_spill]] }
 0xdd7   : > { %s8906_s22 = sld [smem:[#allocation30_spill]]  ;;  %s8907_s23 = sld [smem:[#allocation33_spill]] }
 0xddc   : > { %p27_p8 = scmp.ge.s32.totalorder %s8904_s24, 4  }
 0xdde   :  { %29 = sbr.rel (!%p27_p8) target bundleno = 18 (0x12), region = 266 }
 0xde5   :  { %5064 = vsyncpa [#allocation4], 1 }
 0xde6   :  { %5066 = vsyncpa [#allocation4 + $0x1], 1 }
 0xde7   :  { %5067 = vsyncpa [#allocation7], 1 }
 0xde8   :  { %5068 = vsyncpa [#allocation10], 1 }
 0xde9   :  { %5069 = vsyncpa [#allocation5], 1 }
 0xdea   :  { %5071 = vsyncpa [#allocation5 + $0x1], 1 }

</bundles_post_ra>
